<compile_context>
chip_gen: v6e
topology: v6e:2x2x1
jax: 0.10.0
libtpu: 0.0.40
codegen_flags: <defaults>
</compile_context>

<pallas_src>
import numpy as np
import jax
import jax.numpy as jnp
from jax import lax
from jax.experimental import pallas as pl
from jax.experimental.pallas import tpu as pltpu

# ---- configuration (RMCArguments) -------------------------------------------
MEM_SLOTS = 1
HEAD_SIZE = 3
NUM_HEADS = 4
INPUT_SIZE = 5                        # num_embedding_dims
FORGET_BIAS = 1.0
INPUT_BIAS = 0.0
ATT_MLP_LAYERS = 2                    # RelationalMemory default (attmlplayers not forwarded)
MEM_SIZE = HEAD_SIZE * NUM_HEADS      # 12
KEY_SIZE = HEAD_SIZE                  # 3
VALUE_SIZE = HEAD_SIZE                # 3
QKV_SIZE = 2 * KEY_SIZE + VALUE_SIZE  # 9
TOTAL_QKV = QKV_SIZE * NUM_HEADS      # 36
N_SLOTS = MEM_SLOTS + 1               # 2 (memory row + projected-input row)
OUTPUT_SIZE = 1
EPS = 1e-5
BATCH = 4
SEQ_LEN = 8

# ---- lane-layout constants ----------------------------------------------------
SLOT = 16                      # lanes per slot (12 real + 4 zero pad)
CAT = N_SLOTS * SLOT           # 32: [memory slot | input slot]
QKV_CAT = 3 * CAT              # 96: [q_cat | k_cat | v_cat]
Q_OFF, K_OFF, V_OFF = 0, CAT, 2 * CAT
GATE_OFF = QKV_CAT             # 96: [input gate | forget gate] lanes in W1 / W2 / P row 0
X_PAD = 8                      # input features padded 5 -> 8 (full contraction tile)
OUT_LANES = 128                # lane-dense per-step output slab
OUT_LOGIT = SLOT               # lane 16 of the output slab holds the readout logit
# W2 rows 16:48 band lane offsets
HMAT_OFF, MLP_OFF, WIN_OFF = 0, CAT, 2 * CAT          # 0, 32, 64
# P slab lane offsets
BIN_OFF, WOUT_OFF = 96, 112                           # row 1
LN2G_OFF, LN2B_OFF = 96, 112                          # row 2
LN1G_OFF, LN1B_OFF, BMLP_OFF, BOUT_OFF = 0, 32, 64, 96  # row 3


# ---- the fused whole-sequence kernel -------------------------------------------
def rrnn_seq_kernel(x_ref, mem0_ref, w1_ref, w2_ref, p_ref, out_ref, mem_ref):
    """Runs the entire T-step recurrence in one kernel invocation (no grid).

    x_ref    : (T*BP, X_PAD)  padded inputs, all timesteps
    mem0_ref : (BP, SLOT)     initial memory, lanes 12:16 zero
    w1_ref   : (16, 128)      per-step weights  [qkv(mem slot) 96 | gate(tanh mem) 32]
    w2_ref   : (48, 128)      rows 0:16 off-chain weights [qkv(inp slot) | gate(inp)],
                              rows 16:48 [head-sum H | block-diag MLP | input projector]
    p_ref    : (8, 128)       biases / LayerNorm affines (see pack_params)
    out_ref  : (T*BP, 128)    per-step slab: lanes 0:16 next_mem, lane 16 logit
    mem_ref  : (BP, SLOT)     final memory
    """
    f32 = jnp.float32
    bp = mem0_ref.shape[0]
    total = x_ref.shape[0]
    n_steps = total // bp

    # ---- one-time parameter unpack (hoisted out of the recurrence) ----------------
    w1 = w1_ref[...]
    w2 = w2_ref[...]
    p = p_ref[...]
    w_qkv_m = w1[:, 0:QKV_CAT]                    # (16, 96)
    w_gate_m = w1[:, GATE_OFF:GATE_OFF + CAT]     # (16, 32)
    w_qkv_i = w2[0:16, 0:QKV_CAT]                 # (16, 96)
    w_gate_i = w2[0:16, GATE_OFF:GATE_OFF + CAT]  # (16, 32)
    h_mat = w2[16:48, HMAT_OFF:HMAT_OFF + CAT]    # (32, 32) per-head sum + broadcast
    w_mlp = w2[16:48, MLP_OFF:MLP_OFF + CAT]      # (32, 32) block-diag shared MLP
    w_in = w2[16:16 + X_PAD, WIN_OFF:WIN_OFF + SLOT]  # (8, 16) input projector
    qkv_bias = p[0:1, 0:QKV_CAT]
    gate_bias = p[0:1, GATE_OFF:GATE_OFF + CAT]
    lnq_g = p[1:2, 0:QKV_CAT]
    b_in = p[1:2, BIN_OFF:BIN_OFF + SLOT]
    w_out = p[1:2, WOUT_OFF:WOUT_OFF + SLOT]
    lnq_b = p[2:3, 0:QKV_CAT]
    ln2_g = p[2:3, LN2G_OFF:LN2G_OFF + SLOT]
    ln2_b = p[2:3, LN2B_OFF:LN2B_OFF + SLOT]
    ln1_g = p[3:4, LN1G_OFF:LN1G_OFF + CAT]
    ln1_b = p[3:4, LN1B_OFF:LN1B_OFF + CAT]
    b_mlp = p[3:4, BMLP_OFF:BMLP_OFF + CAT]
    b_out = p[3:4, BOUT_OFF:BOUT_OFF + 1]

    inv_nq = 1.0 / float(N_SLOTS * TOTAL_QKV)   # LN divisors count only the real elements
    inv_nm = 1.0 / float(N_SLOTS * MEM_SIZE)

    def joint_ln(val, inv_n, gamma, beta):
        # LayerNorm over both slots jointly; zero pad lanes carry gamma=beta=0 so they stay
        # exactly zero and the sums over all lanes equal the sums over the real elements.
        mean = jnp.sum(val, axis=-1, keepdims=True) * inv_n
        var = jnp.sum(val * val, axis=-1, keepdims=True) * inv_n - mean * mean
        return (val - mean) * lax.rsqrt(var + EPS) * gamma + beta

    # ---- off-recurrence precompute for ALL timesteps (input slot is mem-independent) --
    x_all = x_ref[...]                                                           # (T*BP, 8)
    inp_all = jnp.dot(x_all, w_in, preferred_element_type=f32) + b_in            # (T*BP, 16)
    qkv_pre = jnp.dot(inp_all, w_qkv_i, preferred_element_type=f32) + qkv_bias   # (T*BP, 96)
    gate_pre = jnp.dot(inp_all, w_gate_i, preferred_element_type=f32) + gate_bias  # (T*BP, 32)

    # ---- recurrence: fully unrolled; 6 small MXU dots + a short EUP chain per step ----
    mem = mem0_ref[...]                                                          # (BP, 16)
    mems = []
    for t in range(n_steps):
        lo = t * bp
        inp = inp_all[lo:lo + bp]                                                # (BP, 16)

        # memory-slot qkv projection + precomputed input-slot qkv, joint LayerNorm
        qkv = jnp.dot(mem, w_qkv_m, preferred_element_type=f32) + qkv_pre[lo:lo + bp]
        qkv = joint_ln(qkv, inv_nq, lnq_g, lnq_b)                                # (BP, 96)
        q = qkv[:, Q_OFF:Q_OFF + CAT]    # 1/sqrt(key) is folded into the lnq affine
        k = qkv[:, K_OFF:K_OFF + CAT]
        v = qkv[:, V_OFF:V_OFF + CAT]
        k_swap = jnp.concatenate([k[:, SLOT:], k[:, :SLOT]], axis=-1)
        v_swap = jnp.concatenate([v[:, SLOT:], v[:, :SLOT]], axis=-1)

        # per-head scores for both query slots in one dot each (H sums 3 lanes + broadcasts)
        s_same = jnp.dot(q * k, h_mat, preferred_element_type=f32)       # [s_mm | s_ii]
        s_cross = jnp.dot(q * k_swap, h_mat, preferred_element_type=f32)  # [s_mi | s_im]
        g = jax.nn.sigmoid(s_same - s_cross)          # exact softmax weight for 2 keys
        att = v_swap + g * (v - v_swap)               # (BP, 32) [att_m | att_i]

        # residual + LayerNorm([N_SLOTS, MEM_SIZE])
        h = joint_ln(jnp.concatenate([mem, inp], axis=-1) + att, inv_nm, ln1_g, ln1_b)

        # shared 2-layer MLP (both slots through one block-diagonal matmul per layer)
        a = h
        for _ in range(ATT_MLP_LAYERS):
            a = jnp.maximum(jnp.dot(a, w_mlp, preferred_element_type=f32) + b_mlp, 0.0)

        # residual + second LayerNorm: stats over both slots, only the memory slot is kept
        r = h + a
        mean2 = jnp.sum(r, axis=-1, keepdims=True) * inv_nm
        var2 = jnp.sum(r * r, axis=-1, keepdims=True) * inv_nm - mean2 * mean2
        nm = (r[:, 0:SLOT] - mean2) * lax.rsqrt(var2 + EPS) * ln2_g + ln2_b      # (BP, 16)

        # input/forget gating from the ORIGINAL memory plus the precomputed input half
        gates = (jnp.dot(jnp.tanh(mem), w_gate_m, preferred_element_type=f32)
                 + gate_pre[lo:lo + bp])                                         # (BP, 32)
        ig = jax.nn.sigmoid(gates[:, 0:SLOT])
        fg = jax.nn.sigmoid(gates[:, SLOT:])
        mem = ig * jnp.tanh(nm) + fg * mem                                       # pads stay 0
        mems.append(mem)

    mem_ref[...] = mem

    # readout Linear(12 -> 1) for all steps at once + single lane-dense output store
    hist = jnp.concatenate(mems, axis=0)                                         # (T*BP, 16)
    logit = jnp.sum(hist * w_out, axis=-1, keepdims=True) + b_out                # (T*BP, 1)
    tail = jnp.zeros((total, OUT_LANES - SLOT - 1), f32)
    out_ref[...] = jnp.concatenate([hist, logit, tail], axis=-1)


# ---- host-side parameter packing (glue only, not compute) ----------------------
def pack_params(params):
    """Fold the head-major lane shuffle, the 1/sqrt(key) scale and the constant gate biases
    into three lane-aligned f32 slabs (3 one-time parameter DMAs, all bands 8-row aligned)."""
    f = lambda a: np.asarray(a, np.float32)
    w_qkv, b_qkv = f(params["w_qkv"]), f(params["b_qkv"])[0]
    lnq_w, lnq_b = f(params["lnq_w"]), f(params["lnq_b"])
    w_mlp, b_mlp = f(params["w_mlp"]), f(params["b_mlp"])[0]
    w_ig, b_ig = f(params["w_ig"]), f(params["b_ig"])[0]
    w_mg, b_mg = f(params["w_mg"]), f(params["b_mg"])[0]
    w_in, b_in = f(params["w_in"]), f(params["b_in"])[0]
    w_out, b_out = f(params["w_out"])[0], float(f(params["b_out"])[0, 0])
    ln1_w, ln1_b = f(params["ln1_w"]), f(params["ln1_b"])
    ln2_w, ln2_b = f(params["ln2_w"]), f(params["ln2_b"])
    scale = KEY_SIZE ** -0.5

    def split_qkv(a):   # (..., 36) interleaved per head -> head-major (..., 12) q, k, v
        q = np.concatenate([a[..., h * QKV_SIZE:h * QKV_SIZE + KEY_SIZE]
                            for h in range(NUM_HEADS)], -1)
        k = np.concatenate([a[..., h * QKV_SIZE + KEY_SIZE:h * QKV_SIZE + 2 * KEY_SIZE]
                            for h in range(NUM_HEADS)], -1)
        v = np.concatenate([a[..., h * QKV_SIZE + 2 * KEY_SIZE:(h + 1) * QKV_SIZE]
                            for h in range(NUM_HEADS)], -1)
        return q, k, v

    wq, wk, wv = split_qkv(w_qkv)
    bq, bk, bv = split_qkv(b_qkv)
    gq, gk, gv = split_qkv(lnq_w)
    zq, zk, zv = split_qkv(lnq_b)

    # W1: per-step weights [qkv for the memory slot | gate-from-tanh(mem)]
    w1 = np.zeros((16, 128), np.float32)
    w1[:MEM_SIZE, Q_OFF:Q_OFF + MEM_SIZE] = wq
    w1[:MEM_SIZE, K_OFF:K_OFF + MEM_SIZE] = wk
    w1[:MEM_SIZE, V_OFF:V_OFF + MEM_SIZE] = wv
    w1[:MEM_SIZE, GATE_OFF:GATE_OFF + MEM_SIZE] = w_mg[:, :MEM_SIZE]
    w1[:MEM_SIZE, GATE_OFF + SLOT:GATE_OFF + SLOT + MEM_SIZE] = w_mg[:, MEM_SIZE:]

    # W2 rows 0:16: off-chain weights [qkv for the input slot | gate-from-input]
    #    rows 16:48: [per-head sum/broadcast H | block-diag MLP | input projector]
    w2 = np.zeros((48, 128), np.float32)
    w2[:MEM_SIZE, Q_OFF + SLOT:Q_OFF + SLOT + MEM_SIZE] = wq
    w2[:MEM_SIZE, K_OFF + SLOT:K_OFF + SLOT + MEM_SIZE] = wk
    w2[:MEM_SIZE, V_OFF + SLOT:V_OFF + SLOT + MEM_SIZE] = wv
    w2[:MEM_SIZE, GATE_OFF:GATE_OFF + MEM_SIZE] = w_ig[:, :MEM_SIZE]
    w2[:MEM_SIZE, GATE_OFF + SLOT:GATE_OFF + SLOT + MEM_SIZE] = w_ig[:, MEM_SIZE:]
    for s in range(N_SLOTS):
        base = s * SLOT
        for h in range(NUM_HEADS):
            lo = base + h * HEAD_SIZE
            w2[16 + lo:16 + lo + HEAD_SIZE, HMAT_OFF + lo:HMAT_OFF + lo + HEAD_SIZE] = 1.0
        w2[16 + base:16 + base + MEM_SIZE, MLP_OFF + base:MLP_OFF + base + MEM_SIZE] = w_mlp
    w2[16:16 + INPUT_SIZE, WIN_OFF:WIN_OFF + MEM_SIZE] = w_in

    # P: biases and LayerNorm affines (pad lanes stay zero so pad activations stay zero)
    p = np.zeros((8, 128), np.float32)
    for s in range(N_SLOTS):
        base = s * SLOT
        p[0, Q_OFF + base:Q_OFF + base + MEM_SIZE] = bq
        p[0, K_OFF + base:K_OFF + base + MEM_SIZE] = bk
        p[0, V_OFF + base:V_OFF + base + MEM_SIZE] = bv
        p[1, Q_OFF + base:Q_OFF + base + MEM_SIZE] = gq[s] * scale   # fold 1/sqrt(key)
        p[1, K_OFF + base:K_OFF + base + MEM_SIZE] = gk[s]
        p[1, V_OFF + base:V_OFF + base + MEM_SIZE] = gv[s]
        p[2, Q_OFF + base:Q_OFF + base + MEM_SIZE] = zq[s] * scale
        p[2, K_OFF + base:K_OFF + base + MEM_SIZE] = zk[s]
        p[2, V_OFF + base:V_OFF + base + MEM_SIZE] = zv[s]
        p[3, LN1G_OFF + base:LN1G_OFF + base + MEM_SIZE] = ln1_w[s]
        p[3, LN1B_OFF + base:LN1B_OFF + base + MEM_SIZE] = ln1_b[s]
        p[3, BMLP_OFF + base:BMLP_OFF + base + MEM_SIZE] = b_mlp
    p[0, GATE_OFF:GATE_OFF + MEM_SIZE] = b_ig[:MEM_SIZE] + b_mg[:MEM_SIZE] + INPUT_BIAS
    p[0, GATE_OFF + SLOT:GATE_OFF + SLOT + MEM_SIZE] = (
        b_ig[MEM_SIZE:] + b_mg[MEM_SIZE:] + FORGET_BIAS)
    p[1, BIN_OFF:BIN_OFF + MEM_SIZE] = b_in
    p[1, WOUT_OFF:WOUT_OFF + MEM_SIZE] = w_out
    p[2, LN2G_OFF:LN2G_OFF + MEM_SIZE] = ln2_w[0]   # only the memory-slot row of LN2 is used
    p[2, LN2B_OFF:LN2B_OFF + MEM_SIZE] = ln2_b[0]
    p[3, BOUT_OFF] = b_out
    return jnp.asarray(w1), jnp.asarray(w2), jnp.asarray(p)


# ---- wrappers -------------------------------------------------------------------
def rrnn_forward_seq(x_seq, memory, params):
    """x_seq: (T, B, INPUT_SIZE); memory: (B, MEM_SLOTS, MEM_SIZE).
    Runs the full recurrence in ONE pallas_call (no grid; everything resident in VMEM).
    Returns (outs (T, B, 1), final_memory (B, MEM_SLOTS, MEM_SIZE))."""
    T, B, _ = x_seq.shape
    bp = max(8, ((B + 7) // 8) * 8)   # fill all 8 f32 sublanes of every vreg

    x_p = jnp.zeros((T, bp, X_PAD), jnp.float32)
    x_p = x_p.at[:, :B, :INPUT_SIZE].set(x_seq.astype(jnp.float32))
    x2d = x_p.reshape(T * bp, X_PAD)
    mem_p = jnp.zeros((bp, SLOT), jnp.float32)
    mem_p = mem_p.at[:B, :MEM_SIZE].set(
        memory.reshape(B, MEM_SLOTS * MEM_SIZE).astype(jnp.float32))

    w1, w2, p_slab = pack_params(params)

    out_slab, mem_out = pl.pallas_call(
        rrnn_seq_kernel,
        out_shape=(
            jax.ShapeDtypeStruct((T * bp, OUT_LANES), jnp.float32),
            jax.ShapeDtypeStruct((bp, SLOT), jnp.float32),
        ),
        in_specs=[pl.BlockSpec(memory_space=pltpu.MemorySpace.VMEM)] * 5,
        out_specs=(
            pl.BlockSpec(memory_space=pltpu.MemorySpace.VMEM),
            pl.BlockSpec(memory_space=pltpu.MemorySpace.VMEM),
        ),
    )(x2d, mem_p, w1, w2, p_slab)

    outs = out_slab.reshape(T, bp, OUT_LANES)[:, :B, OUT_LOGIT:OUT_LOGIT + OUTPUT_SIZE]
    final_mem = mem_out[:B, :MEM_SIZE].reshape(B, MEM_SLOTS, MEM_SIZE)
    return outs, final_mem


def rrnn_forward(x, memory, params):
    """Single timestep == the PyTorch module's forward(input, memory)."""
    outs, final_mem = rrnn_forward_seq(x[None], memory, params)
    return outs[0], final_mem


# ---- deterministic parameter init (mirrors nn.Linear / nn.LayerNorm defaults) ----
def init_params(key):
    keys = jax.random.split(key, 12)

    def lin(k, fan_in, shape_w, shape_b):
        bound = 1.0 / np.sqrt(fan_in)
        kw, kb = jax.random.split(k)
        w = jax.random.uniform(kw, shape_w, jnp.float32, -bound, bound)
        b = jax.random.uniform(kb, shape_b, jnp.float32, -bound, bound)
        return w, b

    p = {}
    p["w_in"], p["b_in"] = lin(keys[0], INPUT_SIZE, (INPUT_SIZE, MEM_SIZE), (1, MEM_SIZE))
    p["w_qkv"], p["b_qkv"] = lin(keys[1], MEM_SIZE, (MEM_SIZE, TOTAL_QKV), (1, TOTAL_QKV))
    p["w_mlp"], p["b_mlp"] = lin(keys[2], MEM_SIZE, (MEM_SIZE, MEM_SIZE), (1, MEM_SIZE))
    p["w_ig"], p["b_ig"] = lin(keys[3], MEM_SIZE, (MEM_SIZE, 2 * MEM_SIZE), (1, 2 * MEM_SIZE))
    p["w_mg"], p["b_mg"] = lin(keys[4], MEM_SIZE, (MEM_SIZE, 2 * MEM_SIZE), (1, 2 * MEM_SIZE))
    p["w_out"], p["b_out"] = lin(keys[5], MEM_SIZE, (1, MEM_SIZE), (1, 1))
    # LayerNorm affines default to gamma=1 / beta=0; perturb slightly so the head-major
    # permutation + scale folding is actually exercised by the correctness check.
    p["lnq_w"] = 1.0 + 0.1 * jax.random.normal(keys[6], (N_SLOTS, TOTAL_QKV), jnp.float32)
    p["lnq_b"] = 0.1 * jax.random.normal(keys[7], (N_SLOTS, TOTAL_QKV), jnp.float32)
    p["ln1_w"] = 1.0 + 0.1 * jax.random.normal(keys[8], (N_SLOTS, MEM_SIZE), jnp.float32)
    p["ln1_b"] = 0.1 * jax.random.normal(keys[9], (N_SLOTS, MEM_SIZE), jnp.float32)
    p["ln2_w"] = 1.0 + 0.1 * jax.random.normal(keys[10], (N_SLOTS, MEM_SIZE), jnp.float32)
    p["ln2_b"] = 0.1 * jax.random.normal(keys[11], (N_SLOTS, MEM_SIZE), jnp.float32)
    return p


def initial_state(batch_size):
    init = jnp.tile(jnp.eye(MEM_SLOTS, dtype=jnp.float32)[None], (batch_size, 1, 1))
    if MEM_SIZE > MEM_SLOTS:
        pad = jnp.zeros((batch_size, MEM_SLOTS, MEM_SIZE - MEM_SLOTS), jnp.float32)
        init = jnp.concatenate([init, pad], axis=-1)
    return init


# ---- pure-JAX single-step reference (mirrors the PyTorch code literally) ---------
def rrnn_reference(x, memory, params):
    B = x.shape[0]
    inp = x.reshape(B, -1) @ params["w_in"] + params["b_in"]
    mpi = jnp.concatenate([memory, inp[:, None, :]], axis=1)           # (B, 2, MEM_SIZE)

    def ln(t, w, b):
        mean = jnp.mean(t, axis=(1, 2), keepdims=True)
        var = jnp.mean(jnp.square(t), axis=(1, 2), keepdims=True) - mean * mean
        return (t - mean) / jnp.sqrt(var + EPS) * w[None] + b[None]

    qkv = mpi @ params["w_qkv"] + params["b_qkv"]
    qkv = ln(qkv, params["lnq_w"], params["lnq_b"])
    qkv = qkv.reshape(B, N_SLOTS, NUM_HEADS, QKV_SIZE).transpose(0, 2, 1, 3)
    q = qkv[..., :KEY_SIZE] * (KEY_SIZE ** -0.5)
    k = qkv[..., KEY_SIZE:2 * KEY_SIZE]
    v = qkv[..., 2 * KEY_SIZE:]
    dot = jnp.einsum("bhnd,bhmd->bhnm", q, k)
    w = jax.nn.softmax(dot, axis=-1)
    att = jnp.einsum("bhnm,bhmd->bhnd", w, v).transpose(0, 2, 1, 3).reshape(B, N_SLOTS, MEM_SIZE)

    mem1 = ln(mpi + att, params["ln1_w"], params["ln1_b"])
    a = mem1
    for _ in range(ATT_MLP_LAYERS):
        a = jax.nn.relu(a @ params["w_mlp"] + params["b_mlp"])
    mem2 = ln(mem1 + a, params["ln2_w"], params["ln2_b"])
    next_memory = mem2[:, :MEM_SLOTS, :]

    mem_t = jnp.tanh(memory)
    gate_inputs = (inp @ params["w_ig"] + params["b_ig"])[:, None, :]
    gate_memory = mem_t @ params["w_mg"] + params["b_mg"]
    gates = gate_memory + gate_inputs
    input_gate = jax.nn.sigmoid(gates[..., :MEM_SIZE] + INPUT_BIAS)
    forget_gate = jax.nn.sigmoid(gates[..., MEM_SIZE:] + FORGET_BIAS)
    next_memory = input_gate * jnp.tanh(next_memory) + forget_gate * memory

    logit = next_memory.reshape(B, -1)
    out = logit @ params["w_out"].T + params["b_out"]
    return out, next_memory


if __name__ == "__main__":
    key = jax.random.PRNGKey(0)
    pkey, xkey = jax.random.split(key)
    params = init_params(pkey)

    x_seq = jax.random.normal(xkey, (SEQ_LEN, BATCH, INPUT_SIZE), jnp.float32)
    memory0 = initial_state(BATCH)

    # fused multi-timestep kernel: one pallas_call for the whole sequence
    outs, final_mem = rrnn_forward_seq(x_seq, memory0, params)
    jax.block_until_ready((outs, final_mem))

    # step-by-step pure-JAX reference
    ref_outs = []
    m = memory0
    for t in range(SEQ_LEN):
        o, m = rrnn_reference(x_seq[t], m, params)
        ref_outs.append(o)
    ref_outs = jnp.stack(ref_outs, axis=0)

    assert outs.shape == (SEQ_LEN, BATCH, OUTPUT_SIZE)
    assert final_mem.shape == (BATCH, MEM_SLOTS, MEM_SIZE)
    assert np.allclose(np.asarray(outs), np.asarray(ref_outs), rtol=5e-2, atol=5e-2)
    assert np.allclose(np.asarray(final_mem), np.asarray(m), rtol=5e-2, atol=5e-2)

    # single-step path == the PyTorch module's forward(input, memory)
    out1, mem1 = rrnn_forward(x_seq[0], memory0, params)
    jax.block_until_ready((out1, mem1))
    ref_o1, ref_m1 = rrnn_reference(x_seq[0], memory0, params)
    assert np.allclose(np.asarray(out1), np.asarray(ref_o1), rtol=5e-2, atol=5e-2)
    assert np.allclose(np.asarray(mem1), np.asarray(ref_m1), rtol=5e-2, atol=5e-2)

    print("KERNEL_OK")
</pallas_src>

<mosaic_0001>
module attributes {stable_mosaic.version = 11 : i64} {
  func.func @rrnn_seq_kernel(%arg0: memref<64x8xf32, #tpu.memory_space<vmem>>, %arg1: memref<8x16xf32, #tpu.memory_space<vmem>>, %arg2: memref<16x128xf32, #tpu.memory_space<vmem>>, %arg3: memref<48x128xf32, #tpu.memory_space<vmem>>, %arg4: memref<8x128xf32, #tpu.memory_space<vmem>>, %arg5: memref<64x128xf32, #tpu.memory_space<vmem>>, %arg6: memref<8x16xf32, #tpu.memory_space<vmem>>) attributes {dimension_semantics = [], scalar_prefetch = 0 : i64, scratch_operands = 0 : i64, tpu.core_type = #tpu.core_type<tc>} {
    %c0 = arith.constant 0 : index
    %c0_0 = arith.constant 0 : index
    %0 = vector.load %arg2[%c0, %c0_0] : memref<16x128xf32, #tpu.memory_space<vmem>>, vector<16x128xf32>
    %c0_1 = arith.constant 0 : index
    %c0_2 = arith.constant 0 : index
    %1 = vector.load %arg3[%c0_1, %c0_2] : memref<48x128xf32, #tpu.memory_space<vmem>>, vector<48x128xf32>
    %c0_3 = arith.constant 0 : index
    %c0_4 = arith.constant 0 : index
    %2 = vector.load %arg4[%c0_3, %c0_4] : memref<8x128xf32, #tpu.memory_space<vmem>>, vector<8x128xf32>
    %3 = vector.extract_strided_slice %0 {offsets = [0, 0], sizes = [16, 96], strides = [1, 1]} : vector<16x128xf32> to vector<16x96xf32>
    %4 = vector.extract_strided_slice %0 {offsets = [0, 96], sizes = [16, 32], strides = [1, 1]} : vector<16x128xf32> to vector<16x32xf32>
    %5 = vector.extract_strided_slice %1 {offsets = [0, 0], sizes = [16, 96], strides = [1, 1]} : vector<48x128xf32> to vector<16x96xf32>
    %6 = vector.extract_strided_slice %1 {offsets = [0, 96], sizes = [16, 32], strides = [1, 1]} : vector<48x128xf32> to vector<16x32xf32>
    %7 = vector.extract_strided_slice %1 {offsets = [16, 0], sizes = [32, 32], strides = [1, 1]} : vector<48x128xf32> to vector<32x32xf32>
    %8 = vector.extract_strided_slice %1 {offsets = [16, 32], sizes = [32, 32], strides = [1, 1]} : vector<48x128xf32> to vector<32x32xf32>
    %9 = vector.extract_strided_slice %1 {offsets = [16, 64], sizes = [8, 16], strides = [1, 1]} : vector<48x128xf32> to vector<8x16xf32>
    %10 = vector.extract_strided_slice %2 {offsets = [0, 0], sizes = [1, 96], strides = [1, 1]} : vector<8x128xf32> to vector<1x96xf32>
    %11 = vector.extract_strided_slice %2 {offsets = [0, 96], sizes = [1, 32], strides = [1, 1]} : vector<8x128xf32> to vector<1x32xf32>
    %12 = vector.extract_strided_slice %2 {offsets = [1, 0], sizes = [1, 96], strides = [1, 1]} : vector<8x128xf32> to vector<1x96xf32>
    %13 = vector.extract_strided_slice %2 {offsets = [1, 96], sizes = [1, 16], strides = [1, 1]} : vector<8x128xf32> to vector<1x16xf32>
    %14 = vector.extract_strided_slice %2 {offsets = [1, 112], sizes = [1, 16], strides = [1, 1]} : vector<8x128xf32> to vector<1x16xf32>
    %15 = vector.extract_strided_slice %2 {offsets = [2, 0], sizes = [1, 96], strides = [1, 1]} : vector<8x128xf32> to vector<1x96xf32>
    %16 = vector.extract_strided_slice %2 {offsets = [2, 96], sizes = [1, 16], strides = [1, 1]} : vector<8x128xf32> to vector<1x16xf32>
    %17 = vector.extract_strided_slice %2 {offsets = [2, 112], sizes = [1, 16], strides = [1, 1]} : vector<8x128xf32> to vector<1x16xf32>
    %18 = vector.extract_strided_slice %2 {offsets = [3, 0], sizes = [1, 32], strides = [1, 1]} : vector<8x128xf32> to vector<1x32xf32>
    %19 = vector.extract_strided_slice %2 {offsets = [3, 32], sizes = [1, 32], strides = [1, 1]} : vector<8x128xf32> to vector<1x32xf32>
    %20 = vector.extract_strided_slice %2 {offsets = [3, 64], sizes = [1, 32], strides = [1, 1]} : vector<8x128xf32> to vector<1x32xf32>
    %21 = vector.extract_strided_slice %2 {offsets = [3, 96], sizes = [1, 1], strides = [1, 1]} : vector<8x128xf32> to vector<1x1xf32>
    %c0_5 = arith.constant 0 : index
    %c0_6 = arith.constant 0 : index
    %22 = vector.load %arg0[%c0_5, %c0_6] : memref<64x8xf32, #tpu.memory_space<vmem>>, vector<64x8xf32>
    %cst = arith.constant dense<0.000000e+00> : vector<64x16xf32>
    %23 = tpu.matmul %22, %9, %cst {dimension_numbers = #tpu.dot_dimension_numbers<[1], [0], [0], [1], [0, 0, 1, 1], [], []>} : vector<64x8xf32>, vector<8x16xf32>, vector<64x16xf32> -> vector<64x16xf32>
    %24 = vector.broadcast %13 : vector<1x16xf32> to vector<64x16xf32>
    %25 = arith.addf %23, %24 : vector<64x16xf32>
    %cst_7 = arith.constant dense<0.000000e+00> : vector<64x96xf32>
    %26 = tpu.matmul %25, %5, %cst_7 {dimension_numbers = #tpu.dot_dimension_numbers<[1], [0], [0], [1], [0, 0, 1, 1], [], []>} : vector<64x16xf32>, vector<16x96xf32>, vector<64x96xf32> -> vector<64x96xf32>
    %27 = vector.broadcast %10 : vector<1x96xf32> to vector<64x96xf32>
    %28 = arith.addf %26, %27 : vector<64x96xf32>
    %cst_8 = arith.constant dense<0.000000e+00> : vector<64x32xf32>
    %29 = tpu.matmul %25, %6, %cst_8 {dimension_numbers = #tpu.dot_dimension_numbers<[1], [0], [0], [1], [0, 0, 1, 1], [], []>} : vector<64x16xf32>, vector<16x32xf32>, vector<64x32xf32> -> vector<64x32xf32>
    %30 = vector.broadcast %11 : vector<1x32xf32> to vector<64x32xf32>
    %31 = arith.addf %29, %30 : vector<64x32xf32>
    %c0_9 = arith.constant 0 : index
    %c0_10 = arith.constant 0 : index
    %32 = vector.load %arg1[%c0_9, %c0_10] : memref<8x16xf32, #tpu.memory_space<vmem>>, vector<8x16xf32>
    %33 = vector.extract_strided_slice %25 {offsets = [0, 0], sizes = [8, 16], strides = [1, 1]} : vector<64x16xf32> to vector<8x16xf32>
    %cst_11 = arith.constant dense<0.000000e+00> : vector<8x96xf32>
    %34 = tpu.matmul %32, %3, %cst_11 {dimension_numbers = #tpu.dot_dimension_numbers<[1], [0], [0], [1], [0, 0, 1, 1], [], []>} : vector<8x16xf32>, vector<16x96xf32>, vector<8x96xf32> -> vector<8x96xf32>
    %35 = vector.extract_strided_slice %28 {offsets = [0, 0], sizes = [8, 96], strides = [1, 1]} : vector<64x96xf32> to vector<8x96xf32>
    %36 = arith.addf %34, %35 : vector<8x96xf32>
    %cst_12 = arith.constant dense<0.000000e+00> : vector<8xf32>
    %37 = vector.multi_reduction <add>, %36, %cst_12 [1] : vector<8x96xf32> to vector<8xf32>
    %38 = vector.shape_cast %37 : vector<8xf32> to vector<8x1xf32>
    %cst_13 = arith.constant 0.013888889 : f32
    %39 = vector.broadcast %cst_13 : f32 to vector<8x1xf32>
    %40 = arith.mulf %38, %39 : vector<8x1xf32>
    %41 = arith.mulf %36, %36 : vector<8x96xf32>
    %cst_14 = arith.constant dense<0.000000e+00> : vector<8xf32>
    %42 = vector.multi_reduction <add>, %41, %cst_14 [1] : vector<8x96xf32> to vector<8xf32>
    %43 = vector.shape_cast %42 : vector<8xf32> to vector<8x1xf32>
    %cst_15 = arith.constant 0.013888889 : f32
    %44 = vector.broadcast %cst_15 : f32 to vector<8x1xf32>
    %45 = arith.mulf %43, %44 : vector<8x1xf32>
    %46 = arith.mulf %40, %40 : vector<8x1xf32>
    %47 = arith.subf %45, %46 : vector<8x1xf32>
    %48 = vector.broadcast %40 : vector<8x1xf32> to vector<8x96xf32>
    %49 = arith.subf %36, %48 : vector<8x96xf32>
    %cst_16 = arith.constant 9.99999974E-6 : f32
    %50 = vector.broadcast %cst_16 : f32 to vector<8x1xf32>
    %51 = arith.addf %47, %50 : vector<8x1xf32>
    %52 = math.rsqrt %51 : vector<8x1xf32>
    %53 = vector.broadcast %52 : vector<8x1xf32> to vector<8x96xf32>
    %54 = arith.mulf %49, %53 : vector<8x96xf32>
    %55 = vector.broadcast %12 : vector<1x96xf32> to vector<8x96xf32>
    %56 = arith.mulf %54, %55 : vector<8x96xf32>
    %57 = vector.broadcast %15 : vector<1x96xf32> to vector<8x96xf32>
    %58 = arith.addf %56, %57 : vector<8x96xf32>
    %59 = vector.extract_strided_slice %58 {offsets = [0, 0], sizes = [8, 32], strides = [1, 1]} : vector<8x96xf32> to vector<8x32xf32>
    %60 = vector.extract_strided_slice %58 {offsets = [0, 32], sizes = [8, 32], strides = [1, 1]} : vector<8x96xf32> to vector<8x32xf32>
    %61 = vector.extract_strided_slice %58 {offsets = [0, 64], sizes = [8, 32], strides = [1, 1]} : vector<8x96xf32> to vector<8x32xf32>
    %62 = vector.extract_strided_slice %60 {offsets = [0, 16], sizes = [8, 16], strides = [1, 1]} : vector<8x32xf32> to vector<8x16xf32>
    %63 = vector.extract_strided_slice %60 {offsets = [0, 0], sizes = [8, 16], strides = [1, 1]} : vector<8x32xf32> to vector<8x16xf32>
    %64 = tpu.concatenate %62, %63 in 1 : vector<8x16xf32>, vector<8x16xf32> -> vector<8x32xf32>
    %65 = vector.extract_strided_slice %61 {offsets = [0, 16], sizes = [8, 16], strides = [1, 1]} : vector<8x32xf32> to vector<8x16xf32>
    %66 = vector.extract_strided_slice %61 {offsets = [0, 0], sizes = [8, 16], strides = [1, 1]} : vector<8x32xf32> to vector<8x16xf32>
    %67 = tpu.concatenate %65, %66 in 1 : vector<8x16xf32>, vector<8x16xf32> -> vector<8x32xf32>
    %68 = arith.mulf %59, %60 : vector<8x32xf32>
    %cst_17 = arith.constant dense<0.000000e+00> : vector<8x32xf32>
    %69 = tpu.matmul %68, %7, %cst_17 {dimension_numbers = #tpu.dot_dimension_numbers<[1], [0], [0], [1], [0, 0, 1, 1], [], []>} : vector<8x32xf32>, vector<32x32xf32>, vector<8x32xf32> -> vector<8x32xf32>
    %70 = arith.mulf %59, %64 : vector<8x32xf32>
    %cst_18 = arith.constant dense<0.000000e+00> : vector<8x32xf32>
    %71 = tpu.matmul %70, %7, %cst_18 {dimension_numbers = #tpu.dot_dimension_numbers<[1], [0], [0], [1], [0, 0, 1, 1], [], []>} : vector<8x32xf32>, vector<32x32xf32>, vector<8x32xf32> -> vector<8x32xf32>
    %72 = arith.subf %69, %71 : vector<8x32xf32>
    %73 = arith.negf %72 : vector<8x32xf32>
    %74 = math.exp %73 : vector<8x32xf32>
    %cst_19 = arith.constant 1.000000e+00 : f32
    %75 = vector.broadcast %cst_19 : f32 to vector<8x32xf32>
    %76 = arith.addf %75, %74 : vector<8x32xf32>
    %77 = arith.divf %75, %76 : vector<8x32xf32>
    %78 = arith.subf %61, %67 : vector<8x32xf32>
    %79 = arith.mulf %77, %78 : vector<8x32xf32>
    %80 = arith.addf %67, %79 : vector<8x32xf32>
    %81 = tpu.concatenate %32, %33 in 1 : vector<8x16xf32>, vector<8x16xf32> -> vector<8x32xf32>
    %82 = arith.addf %81, %80 : vector<8x32xf32>
    %cst_20 = arith.constant dense<0.000000e+00> : vector<8xf32>
    %83 = vector.multi_reduction <add>, %82, %cst_20 [1] : vector<8x32xf32> to vector<8xf32>
    %84 = vector.shape_cast %83 : vector<8xf32> to vector<8x1xf32>
    %cst_21 = arith.constant 0.0416666679 : f32
    %85 = vector.broadcast %cst_21 : f32 to vector<8x1xf32>
    %86 = arith.mulf %84, %85 : vector<8x1xf32>
    %87 = arith.mulf %82, %82 : vector<8x32xf32>
    %cst_22 = arith.constant dense<0.000000e+00> : vector<8xf32>
    %88 = vector.multi_reduction <add>, %87, %cst_22 [1] : vector<8x32xf32> to vector<8xf32>
    %89 = vector.shape_cast %88 : vector<8xf32> to vector<8x1xf32>
    %cst_23 = arith.constant 0.0416666679 : f32
    %90 = vector.broadcast %cst_23 : f32 to vector<8x1xf32>
    %91 = arith.mulf %89, %90 : vector<8x1xf32>
    %92 = arith.mulf %86, %86 : vector<8x1xf32>
    %93 = arith.subf %91, %92 : vector<8x1xf32>
    %94 = vector.broadcast %86 : vector<8x1xf32> to vector<8x32xf32>
    %95 = arith.subf %82, %94 : vector<8x32xf32>
    %cst_24 = arith.constant 9.99999974E-6 : f32
    %96 = vector.broadcast %cst_24 : f32 to vector<8x1xf32>
    %97 = arith.addf %93, %96 : vector<8x1xf32>
    %98 = math.rsqrt %97 : vector<8x1xf32>
    %99 = vector.broadcast %98 : vector<8x1xf32> to vector<8x32xf32>
    %100 = arith.mulf %95, %99 : vector<8x32xf32>
    %101 = vector.broadcast %18 : vector<1x32xf32> to vector<8x32xf32>
    %102 = arith.mulf %100, %101 : vector<8x32xf32>
    %103 = vector.broadcast %19 : vector<1x32xf32> to vector<8x32xf32>
    %104 = arith.addf %102, %103 : vector<8x32xf32>
    %cst_25 = arith.constant dense<0.000000e+00> : vector<8x32xf32>
    %105 = tpu.matmul %104, %8, %cst_25 {dimension_numbers = #tpu.dot_dimension_numbers<[1], [0], [0], [1], [0, 0, 1, 1], [], []>} : vector<8x32xf32>, vector<32x32xf32>, vector<8x32xf32> -> vector<8x32xf32>
    %106 = vector.broadcast %20 : vector<1x32xf32> to vector<8x32xf32>
    %107 = arith.addf %105, %106 : vector<8x32xf32>
    %cst_26 = arith.constant 0.000000e+00 : f32
    %108 = vector.broadcast %cst_26 : f32 to vector<8x32xf32>
    %109 = arith.maximumf %107, %108 : vector<8x32xf32>
    %cst_27 = arith.constant dense<0.000000e+00> : vector<8x32xf32>
    %110 = tpu.matmul %109, %8, %cst_27 {dimension_numbers = #tpu.dot_dimension_numbers<[1], [0], [0], [1], [0, 0, 1, 1], [], []>} : vector<8x32xf32>, vector<32x32xf32>, vector<8x32xf32> -> vector<8x32xf32>
    %111 = vector.broadcast %20 : vector<1x32xf32> to vector<8x32xf32>
    %112 = arith.addf %110, %111 : vector<8x32xf32>
    %cst_28 = arith.constant 0.000000e+00 : f32
    %113 = vector.broadcast %cst_28 : f32 to vector<8x32xf32>
    %114 = arith.maximumf %112, %113 : vector<8x32xf32>
    %115 = arith.addf %104, %114 : vector<8x32xf32>
    %cst_29 = arith.constant dense<0.000000e+00> : vector<8xf32>
    %116 = vector.multi_reduction <add>, %115, %cst_29 [1] : vector<8x32xf32> to vector<8xf32>
    %117 = vector.shape_cast %116 : vector<8xf32> to vector<8x1xf32>
    %cst_30 = arith.constant 0.0416666679 : f32
    %118 = vector.broadcast %cst_30 : f32 to vector<8x1xf32>
    %119 = arith.mulf %117, %118 : vector<8x1xf32>
    %120 = arith.mulf %115, %115 : vector<8x32xf32>
    %cst_31 = arith.constant dense<0.000000e+00> : vector<8xf32>
    %121 = vector.multi_reduction <add>, %120, %cst_31 [1] : vector<8x32xf32> to vector<8xf32>
    %122 = vector.shape_cast %121 : vector<8xf32> to vector<8x1xf32>
    %cst_32 = arith.constant 0.0416666679 : f32
    %123 = vector.broadcast %cst_32 : f32 to vector<8x1xf32>
    %124 = arith.mulf %122, %123 : vector<8x1xf32>
    %125 = arith.mulf %119, %119 : vector<8x1xf32>
    %126 = arith.subf %124, %125 : vector<8x1xf32>
    %127 = vector.extract_strided_slice %115 {offsets = [0, 0], sizes = [8, 16], strides = [1, 1]} : vector<8x32xf32> to vector<8x16xf32>
    %128 = vector.broadcast %119 : vector<8x1xf32> to vector<8x16xf32>
    %129 = arith.subf %127, %128 : vector<8x16xf32>
    %cst_33 = arith.constant 9.99999974E-6 : f32
    %130 = vector.broadcast %cst_33 : f32 to vector<8x1xf32>
    %131 = arith.addf %126, %130 : vector<8x1xf32>
    %132 = math.rsqrt %131 : vector<8x1xf32>
    %133 = vector.broadcast %132 : vector<8x1xf32> to vector<8x16xf32>
    %134 = arith.mulf %129, %133 : vector<8x16xf32>
    %135 = vector.broadcast %16 : vector<1x16xf32> to vector<8x16xf32>
    %136 = arith.mulf %134, %135 : vector<8x16xf32>
    %137 = vector.broadcast %17 : vector<1x16xf32> to vector<8x16xf32>
    %138 = arith.addf %136, %137 : vector<8x16xf32>
    %139 = math.tanh %32 : vector<8x16xf32>
    %cst_34 = arith.constant dense<0.000000e+00> : vector<8x32xf32>
    %140 = tpu.matmul %139, %4, %cst_34 {dimension_numbers = #tpu.dot_dimension_numbers<[1], [0], [0], [1], [0, 0, 1, 1], [], []>} : vector<8x16xf32>, vector<16x32xf32>, vector<8x32xf32> -> vector<8x32xf32>
    %141 = vector.extract_strided_slice %31 {offsets = [0, 0], sizes = [8, 32], strides = [1, 1]} : vector<64x32xf32> to vector<8x32xf32>
    %142 = arith.addf %140, %141 : vector<8x32xf32>
    %143 = vector.extract_strided_slice %142 {offsets = [0, 0], sizes = [8, 16], strides = [1, 1]} : vector<8x32xf32> to vector<8x16xf32>
    %144 = arith.negf %143 : vector<8x16xf32>
    %145 = math.exp %144 : vector<8x16xf32>
    %cst_35 = arith.constant 1.000000e+00 : f32
    %146 = vector.broadcast %cst_35 : f32 to vector<8x16xf32>
    %147 = arith.addf %146, %145 : vector<8x16xf32>
    %148 = arith.divf %146, %147 : vector<8x16xf32>
    %149 = vector.extract_strided_slice %142 {offsets = [0, 16], sizes = [8, 16], strides = [1, 1]} : vector<8x32xf32> to vector<8x16xf32>
    %150 = arith.negf %149 : vector<8x16xf32>
    %151 = math.exp %150 : vector<8x16xf32>
    %cst_36 = arith.constant 1.000000e+00 : f32
    %152 = vector.broadcast %cst_36 : f32 to vector<8x16xf32>
    %153 = arith.addf %152, %151 : vector<8x16xf32>
    %154 = arith.divf %152, %153 : vector<8x16xf32>
    %155 = math.tanh %138 : vector<8x16xf32>
    %156 = arith.mulf %148, %155 : vector<8x16xf32>
    %157 = arith.mulf %154, %32 : vector<8x16xf32>
    %158 = arith.addf %156, %157 : vector<8x16xf32>
    %159 = vector.extract_strided_slice %25 {offsets = [8, 0], sizes = [8, 16], strides = [1, 1]} : vector<64x16xf32> to vector<8x16xf32>
    %cst_37 = arith.constant dense<0.000000e+00> : vector<8x96xf32>
    %160 = tpu.matmul %158, %3, %cst_37 {dimension_numbers = #tpu.dot_dimension_numbers<[1], [0], [0], [1], [0, 0, 1, 1], [], []>} : vector<8x16xf32>, vector<16x96xf32>, vector<8x96xf32> -> vector<8x96xf32>
    %161 = vector.extract_strided_slice %28 {offsets = [8, 0], sizes = [8, 96], strides = [1, 1]} : vector<64x96xf32> to vector<8x96xf32>
    %162 = arith.addf %160, %161 : vector<8x96xf32>
    %cst_38 = arith.constant dense<0.000000e+00> : vector<8xf32>
    %163 = vector.multi_reduction <add>, %162, %cst_38 [1] : vector<8x96xf32> to vector<8xf32>
    %164 = vector.shape_cast %163 : vector<8xf32> to vector<8x1xf32>
    %cst_39 = arith.constant 0.013888889 : f32
    %165 = vector.broadcast %cst_39 : f32 to vector<8x1xf32>
    %166 = arith.mulf %164, %165 : vector<8x1xf32>
    %167 = arith.mulf %162, %162 : vector<8x96xf32>
    %cst_40 = arith.constant dense<0.000000e+00> : vector<8xf32>
    %168 = vector.multi_reduction <add>, %167, %cst_40 [1] : vector<8x96xf32> to vector<8xf32>
    %169 = vector.shape_cast %168 : vector<8xf32> to vector<8x1xf32>
    %cst_41 = arith.constant 0.013888889 : f32
    %170 = vector.broadcast %cst_41 : f32 to vector<8x1xf32>
    %171 = arith.mulf %169, %170 : vector<8x1xf32>
    %172 = arith.mulf %166, %166 : vector<8x1xf32>
    %173 = arith.subf %171, %172 : vector<8x1xf32>
    %174 = vector.broadcast %166 : vector<8x1xf32> to vector<8x96xf32>
    %175 = arith.subf %162, %174 : vector<8x96xf32>
    %cst_42 = arith.constant 9.99999974E-6 : f32
    %176 = vector.broadcast %cst_42 : f32 to vector<8x1xf32>
    %177 = arith.addf %173, %176 : vector<8x1xf32>
    %178 = math.rsqrt %177 : vector<8x1xf32>
    %179 = vector.broadcast %178 : vector<8x1xf32> to vector<8x96xf32>
    %180 = arith.mulf %175, %179 : vector<8x96xf32>
    %181 = vector.broadcast %12 : vector<1x96xf32> to vector<8x96xf32>
    %182 = arith.mulf %180, %181 : vector<8x96xf32>
    %183 = vector.broadcast %15 : vector<1x96xf32> to vector<8x96xf32>
    %184 = arith.addf %182, %183 : vector<8x96xf32>
    %185 = vector.extract_strided_slice %184 {offsets = [0, 0], sizes = [8, 32], strides = [1, 1]} : vector<8x96xf32> to vector<8x32xf32>
    %186 = vector.extract_strided_slice %184 {offsets = [0, 32], sizes = [8, 32], strides = [1, 1]} : vector<8x96xf32> to vector<8x32xf32>
    %187 = vector.extract_strided_slice %184 {offsets = [0, 64], sizes = [8, 32], strides = [1, 1]} : vector<8x96xf32> to vector<8x32xf32>
    %188 = vector.extract_strided_slice %186 {offsets = [0, 16], sizes = [8, 16], strides = [1, 1]} : vector<8x32xf32> to vector<8x16xf32>
    %189 = vector.extract_strided_slice %186 {offsets = [0, 0], sizes = [8, 16], strides = [1, 1]} : vector<8x32xf32> to vector<8x16xf32>
    %190 = tpu.concatenate %188, %189 in 1 : vector<8x16xf32>, vector<8x16xf32> -> vector<8x32xf32>
    %191 = vector.extract_strided_slice %187 {offsets = [0, 16], sizes = [8, 16], strides = [1, 1]} : vector<8x32xf32> to vector<8x16xf32>
    %192 = vector.extract_strided_slice %187 {offsets = [0, 0], sizes = [8, 16], strides = [1, 1]} : vector<8x32xf32> to vector<8x16xf32>
    %193 = tpu.concatenate %191, %192 in 1 : vector<8x16xf32>, vector<8x16xf32> -> vector<8x32xf32>
    %194 = arith.mulf %185, %186 : vector<8x32xf32>
    %cst_43 = arith.constant dense<0.000000e+00> : vector<8x32xf32>
    %195 = tpu.matmul %194, %7, %cst_43 {dimension_numbers = #tpu.dot_dimension_numbers<[1], [0], [0], [1], [0, 0, 1, 1], [], []>} : vector<8x32xf32>, vector<32x32xf32>, vector<8x32xf32> -> vector<8x32xf32>
    %196 = arith.mulf %185, %190 : vector<8x32xf32>
    %cst_44 = arith.constant dense<0.000000e+00> : vector<8x32xf32>
    %197 = tpu.matmul %196, %7, %cst_44 {dimension_numbers = #tpu.dot_dimension_numbers<[1], [0], [0], [1], [0, 0, 1, 1], [], []>} : vector<8x32xf32>, vector<32x32xf32>, vector<8x32xf32> -> vector<8x32xf32>
    %198 = arith.subf %195, %197 : vector<8x32xf32>
    %199 = arith.negf %198 : vector<8x32xf32>
    %200 = math.exp %199 : vector<8x32xf32>
    %cst_45 = arith.constant 1.000000e+00 : f32
    %201 = vector.broadcast %cst_45 : f32 to vector<8x32xf32>
    %202 = arith.addf %201, %200 : vector<8x32xf32>
    %203 = arith.divf %201, %202 : vector<8x32xf32>
    %204 = arith.subf %187, %193 : vector<8x32xf32>
    %205 = arith.mulf %203, %204 : vector<8x32xf32>
    %206 = arith.addf %193, %205 : vector<8x32xf32>
    %207 = tpu.concatenate %158, %159 in 1 : vector<8x16xf32>, vector<8x16xf32> -> vector<8x32xf32>
    %208 = arith.addf %207, %206 : vector<8x32xf32>
    %cst_46 = arith.constant dense<0.000000e+00> : vector<8xf32>
    %209 = vector.multi_reduction <add>, %208, %cst_46 [1] : vector<8x32xf32> to vector<8xf32>
    %210 = vector.shape_cast %209 : vector<8xf32> to vector<8x1xf32>
    %cst_47 = arith.constant 0.0416666679 : f32
    %211 = vector.broadcast %cst_47 : f32 to vector<8x1xf32>
    %212 = arith.mulf %210, %211 : vector<8x1xf32>
    %213 = arith.mulf %208, %208 : vector<8x32xf32>
    %cst_48 = arith.constant dense<0.000000e+00> : vector<8xf32>
    %214 = vector.multi_reduction <add>, %213, %cst_48 [1] : vector<8x32xf32> to vector<8xf32>
    %215 = vector.shape_cast %214 : vector<8xf32> to vector<8x1xf32>
    %cst_49 = arith.constant 0.0416666679 : f32
    %216 = vector.broadcast %cst_49 : f32 to vector<8x1xf32>
    %217 = arith.mulf %215, %216 : vector<8x1xf32>
    %218 = arith.mulf %212, %212 : vector<8x1xf32>
    %219 = arith.subf %217, %218 : vector<8x1xf32>
    %220 = vector.broadcast %212 : vector<8x1xf32> to vector<8x32xf32>
    %221 = arith.subf %208, %220 : vector<8x32xf32>
    %cst_50 = arith.constant 9.99999974E-6 : f32
    %222 = vector.broadcast %cst_50 : f32 to vector<8x1xf32>
    %223 = arith.addf %219, %222 : vector<8x1xf32>
    %224 = math.rsqrt %223 : vector<8x1xf32>
    %225 = vector.broadcast %224 : vector<8x1xf32> to vector<8x32xf32>
    %226 = arith.mulf %221, %225 : vector<8x32xf32>
    %227 = vector.broadcast %18 : vector<1x32xf32> to vector<8x32xf32>
    %228 = arith.mulf %226, %227 : vector<8x32xf32>
    %229 = vector.broadcast %19 : vector<1x32xf32> to vector<8x32xf32>
    %230 = arith.addf %228, %229 : vector<8x32xf32>
    %cst_51 = arith.constant dense<0.000000e+00> : vector<8x32xf32>
    %231 = tpu.matmul %230, %8, %cst_51 {dimension_numbers = #tpu.dot_dimension_numbers<[1], [0], [0], [1], [0, 0, 1, 1], [], []>} : vector<8x32xf32>, vector<32x32xf32>, vector<8x32xf32> -> vector<8x32xf32>
    %232 = vector.broadcast %20 : vector<1x32xf32> to vector<8x32xf32>
    %233 = arith.addf %231, %232 : vector<8x32xf32>
    %cst_52 = arith.constant 0.000000e+00 : f32
    %234 = vector.broadcast %cst_52 : f32 to vector<8x32xf32>
    %235 = arith.maximumf %233, %234 : vector<8x32xf32>
    %cst_53 = arith.constant dense<0.000000e+00> : vector<8x32xf32>
    %236 = tpu.matmul %235, %8, %cst_53 {dimension_numbers = #tpu.dot_dimension_numbers<[1], [0], [0], [1], [0, 0, 1, 1], [], []>} : vector<8x32xf32>, vector<32x32xf32>, vector<8x32xf32> -> vector<8x32xf32>
    %237 = vector.broadcast %20 : vector<1x32xf32> to vector<8x32xf32>
    %238 = arith.addf %236, %237 : vector<8x32xf32>
    %cst_54 = arith.constant 0.000000e+00 : f32
    %239 = vector.broadcast %cst_54 : f32 to vector<8x32xf32>
    %240 = arith.maximumf %238, %239 : vector<8x32xf32>
    %241 = arith.addf %230, %240 : vector<8x32xf32>
    %cst_55 = arith.constant dense<0.000000e+00> : vector<8xf32>
    %242 = vector.multi_reduction <add>, %241, %cst_55 [1] : vector<8x32xf32> to vector<8xf32>
    %243 = vector.shape_cast %242 : vector<8xf32> to vector<8x1xf32>
    %cst_56 = arith.constant 0.0416666679 : f32
    %244 = vector.broadcast %cst_56 : f32 to vector<8x1xf32>
    %245 = arith.mulf %243, %244 : vector<8x1xf32>
    %246 = arith.mulf %241, %241 : vector<8x32xf32>
    %cst_57 = arith.constant dense<0.000000e+00> : vector<8xf32>
    %247 = vector.multi_reduction <add>, %246, %cst_57 [1] : vector<8x32xf32> to vector<8xf32>
    %248 = vector.shape_cast %247 : vector<8xf32> to vector<8x1xf32>
    %cst_58 = arith.constant 0.0416666679 : f32
    %249 = vector.broadcast %cst_58 : f32 to vector<8x1xf32>
    %250 = arith.mulf %248, %249 : vector<8x1xf32>
    %251 = arith.mulf %245, %245 : vector<8x1xf32>
    %252 = arith.subf %250, %251 : vector<8x1xf32>
    %253 = vector.extract_strided_slice %241 {offsets = [0, 0], sizes = [8, 16], strides = [1, 1]} : vector<8x32xf32> to vector<8x16xf32>
    %254 = vector.broadcast %245 : vector<8x1xf32> to vector<8x16xf32>
    %255 = arith.subf %253, %254 : vector<8x16xf32>
    %cst_59 = arith.constant 9.99999974E-6 : f32
    %256 = vector.broadcast %cst_59 : f32 to vector<8x1xf32>
    %257 = arith.addf %252, %256 : vector<8x1xf32>
    %258 = math.rsqrt %257 : vector<8x1xf32>
    %259 = vector.broadcast %258 : vector<8x1xf32> to vector<8x16xf32>
    %260 = arith.mulf %255, %259 : vector<8x16xf32>
    %261 = vector.broadcast %16 : vector<1x16xf32> to vector<8x16xf32>
    %262 = arith.mulf %260, %261 : vector<8x16xf32>
    %263 = vector.broadcast %17 : vector<1x16xf32> to vector<8x16xf32>
    %264 = arith.addf %262, %263 : vector<8x16xf32>
    %265 = math.tanh %158 : vector<8x16xf32>
    %cst_60 = arith.constant dense<0.000000e+00> : vector<8x32xf32>
    %266 = tpu.matmul %265, %4, %cst_60 {dimension_numbers = #tpu.dot_dimension_numbers<[1], [0], [0], [1], [0, 0, 1, 1], [], []>} : vector<8x16xf32>, vector<16x32xf32>, vector<8x32xf32> -> vector<8x32xf32>
    %267 = vector.extract_strided_slice %31 {offsets = [8, 0], sizes = [8, 32], strides = [1, 1]} : vector<64x32xf32> to vector<8x32xf32>
    %268 = arith.addf %266, %267 : vector<8x32xf32>
    %269 = vector.extract_strided_slice %268 {offsets = [0, 0], sizes = [8, 16], strides = [1, 1]} : vector<8x32xf32> to vector<8x16xf32>
    %270 = arith.negf %269 : vector<8x16xf32>
    %271 = math.exp %270 : vector<8x16xf32>
    %cst_61 = arith.constant 1.000000e+00 : f32
    %272 = vector.broadcast %cst_61 : f32 to vector<8x16xf32>
    %273 = arith.addf %272, %271 : vector<8x16xf32>
    %274 = arith.divf %272, %273 : vector<8x16xf32>
    %275 = vector.extract_strided_slice %268 {offsets = [0, 16], sizes = [8, 16], strides = [1, 1]} : vector<8x32xf32> to vector<8x16xf32>
    %276 = arith.negf %275 : vector<8x16xf32>
    %277 = math.exp %276 : vector<8x16xf32>
    %cst_62 = arith.constant 1.000000e+00 : f32
    %278 = vector.broadcast %cst_62 : f32 to vector<8x16xf32>
    %279 = arith.addf %278, %277 : vector<8x16xf32>
    %280 = arith.divf %278, %279 : vector<8x16xf32>
    %281 = math.tanh %264 : vector<8x16xf32>
    %282 = arith.mulf %274, %281 : vector<8x16xf32>
    %283 = arith.mulf %280, %158 : vector<8x16xf32>
    %284 = arith.addf %282, %283 : vector<8x16xf32>
    %285 = vector.extract_strided_slice %25 {offsets = [16, 0], sizes = [8, 16], strides = [1, 1]} : vector<64x16xf32> to vector<8x16xf32>
    %cst_63 = arith.constant dense<0.000000e+00> : vector<8x96xf32>
    %286 = tpu.matmul %284, %3, %cst_63 {dimension_numbers = #tpu.dot_dimension_numbers<[1], [0], [0], [1], [0, 0, 1, 1], [], []>} : vector<8x16xf32>, vector<16x96xf32>, vector<8x96xf32> -> vector<8x96xf32>
    %287 = vector.extract_strided_slice %28 {offsets = [16, 0], sizes = [8, 96], strides = [1, 1]} : vector<64x96xf32> to vector<8x96xf32>
    %288 = arith.addf %286, %287 : vector<8x96xf32>
    %cst_64 = arith.constant dense<0.000000e+00> : vector<8xf32>
    %289 = vector.multi_reduction <add>, %288, %cst_64 [1] : vector<8x96xf32> to vector<8xf32>
    %290 = vector.shape_cast %289 : vector<8xf32> to vector<8x1xf32>
    %cst_65 = arith.constant 0.013888889 : f32
    %291 = vector.broadcast %cst_65 : f32 to vector<8x1xf32>
    %292 = arith.mulf %290, %291 : vector<8x1xf32>
    %293 = arith.mulf %288, %288 : vector<8x96xf32>
    %cst_66 = arith.constant dense<0.000000e+00> : vector<8xf32>
    %294 = vector.multi_reduction <add>, %293, %cst_66 [1] : vector<8x96xf32> to vector<8xf32>
    %295 = vector.shape_cast %294 : vector<8xf32> to vector<8x1xf32>
    %cst_67 = arith.constant 0.013888889 : f32
    %296 = vector.broadcast %cst_67 : f32 to vector<8x1xf32>
    %297 = arith.mulf %295, %296 : vector<8x1xf32>
    %298 = arith.mulf %292, %292 : vector<8x1xf32>
    %299 = arith.subf %297, %298 : vector<8x1xf32>
    %300 = vector.broadcast %292 : vector<8x1xf32> to vector<8x96xf32>
    %301 = arith.subf %288, %300 : vector<8x96xf32>
    %cst_68 = arith.constant 9.99999974E-6 : f32
    %302 = vector.broadcast %cst_68 : f32 to vector<8x1xf32>
    %303 = arith.addf %299, %302 : vector<8x1xf32>
    %304 = math.rsqrt %303 : vector<8x1xf32>
    %305 = vector.broadcast %304 : vector<8x1xf32> to vector<8x96xf32>
    %306 = arith.mulf %301, %305 : vector<8x96xf32>
    %307 = vector.broadcast %12 : vector<1x96xf32> to vector<8x96xf32>
    %308 = arith.mulf %306, %307 : vector<8x96xf32>
    %309 = vector.broadcast %15 : vector<1x96xf32> to vector<8x96xf32>
    %310 = arith.addf %308, %309 : vector<8x96xf32>
    %311 = vector.extract_strided_slice %310 {offsets = [0, 0], sizes = [8, 32], strides = [1, 1]} : vector<8x96xf32> to vector<8x32xf32>
    %312 = vector.extract_strided_slice %310 {offsets = [0, 32], sizes = [8, 32], strides = [1, 1]} : vector<8x96xf32> to vector<8x32xf32>
    %313 = vector.extract_strided_slice %310 {offsets = [0, 64], sizes = [8, 32], strides = [1, 1]} : vector<8x96xf32> to vector<8x32xf32>
    %314 = vector.extract_strided_slice %312 {offsets = [0, 16], sizes = [8, 16], strides = [1, 1]} : vector<8x32xf32> to vector<8x16xf32>
    %315 = vector.extract_strided_slice %312 {offsets = [0, 0], sizes = [8, 16], strides = [1, 1]} : vector<8x32xf32> to vector<8x16xf32>
    %316 = tpu.concatenate %314, %315 in 1 : vector<8x16xf32>, vector<8x16xf32> -> vector<8x32xf32>
    %317 = vector.extract_strided_slice %313 {offsets = [0, 16], sizes = [8, 16], strides = [1, 1]} : vector<8x32xf32> to vector<8x16xf32>
    %318 = vector.extract_strided_slice %313 {offsets = [0, 0], sizes = [8, 16], strides = [1, 1]} : vector<8x32xf32> to vector<8x16xf32>
    %319 = tpu.concatenate %317, %318 in 1 : vector<8x16xf32>, vector<8x16xf32> -> vector<8x32xf32>
    %320 = arith.mulf %311, %312 : vector<8x32xf32>
    %cst_69 = arith.constant dense<0.000000e+00> : vector<8x32xf32>
    %321 = tpu.matmul %320, %7, %cst_69 {dimension_numbers = #tpu.dot_dimension_numbers<[1], [0], [0], [1], [0, 0, 1, 1], [], []>} : vector<8x32xf32>, vector<32x32xf32>, vector<8x32xf32> -> vector<8x32xf32>
    %322 = arith.mulf %311, %316 : vector<8x32xf32>
    %cst_70 = arith.constant dense<0.000000e+00> : vector<8x32xf32>
    %323 = tpu.matmul %322, %7, %cst_70 {dimension_numbers = #tpu.dot_dimension_numbers<[1], [0], [0], [1], [0, 0, 1, 1], [], []>} : vector<8x32xf32>, vector<32x32xf32>, vector<8x32xf32> -> vector<8x32xf32>
    %324 = arith.subf %321, %323 : vector<8x32xf32>
    %325 = arith.negf %324 : vector<8x32xf32>
    %326 = math.exp %325 : vector<8x32xf32>
    %cst_71 = arith.constant 1.000000e+00 : f32
    %327 = vector.broadcast %cst_71 : f32 to vector<8x32xf32>
    %328 = arith.addf %327, %326 : vector<8x32xf32>
    %329 = arith.divf %327, %328 : vector<8x32xf32>
    %330 = arith.subf %313, %319 : vector<8x32xf32>
    %331 = arith.mulf %329, %330 : vector<8x32xf32>
    %332 = arith.addf %319, %331 : vector<8x32xf32>
    %333 = tpu.concatenate %284, %285 in 1 : vector<8x16xf32>, vector<8x16xf32> -> vector<8x32xf32>
    %334 = arith.addf %333, %332 : vector<8x32xf32>
    %cst_72 = arith.constant dense<0.000000e+00> : vector<8xf32>
    %335 = vector.multi_reduction <add>, %334, %cst_72 [1] : vector<8x32xf32> to vector<8xf32>
    %336 = vector.shape_cast %335 : vector<8xf32> to vector<8x1xf32>
    %cst_73 = arith.constant 0.0416666679 : f32
    %337 = vector.broadcast %cst_73 : f32 to vector<8x1xf32>
    %338 = arith.mulf %336, %337 : vector<8x1xf32>
    %339 = arith.mulf %334, %334 : vector<8x32xf32>
    %cst_74 = arith.constant dense<0.000000e+00> : vector<8xf32>
    %340 = vector.multi_reduction <add>, %339, %cst_74 [1] : vector<8x32xf32> to vector<8xf32>
    %341 = vector.shape_cast %340 : vector<8xf32> to vector<8x1xf32>
    %cst_75 = arith.constant 0.0416666679 : f32
    %342 = vector.broadcast %cst_75 : f32 to vector<8x1xf32>
    %343 = arith.mulf %341, %342 : vector<8x1xf32>
    %344 = arith.mulf %338, %338 : vector<8x1xf32>
    %345 = arith.subf %343, %344 : vector<8x1xf32>
    %346 = vector.broadcast %338 : vector<8x1xf32> to vector<8x32xf32>
    %347 = arith.subf %334, %346 : vector<8x32xf32>
    %cst_76 = arith.constant 9.99999974E-6 : f32
    %348 = vector.broadcast %cst_76 : f32 to vector<8x1xf32>
    %349 = arith.addf %345, %348 : vector<8x1xf32>
    %350 = math.rsqrt %349 : vector<8x1xf32>
    %351 = vector.broadcast %350 : vector<8x1xf32> to vector<8x32xf32>
    %352 = arith.mulf %347, %351 : vector<8x32xf32>
    %353 = vector.broadcast %18 : vector<1x32xf32> to vector<8x32xf32>
    %354 = arith.mulf %352, %353 : vector<8x32xf32>
    %355 = vector.broadcast %19 : vector<1x32xf32> to vector<8x32xf32>
    %356 = arith.addf %354, %355 : vector<8x32xf32>
    %cst_77 = arith.constant dense<0.000000e+00> : vector<8x32xf32>
    %357 = tpu.matmul %356, %8, %cst_77 {dimension_numbers = #tpu.dot_dimension_numbers<[1], [0], [0], [1], [0, 0, 1, 1], [], []>} : vector<8x32xf32>, vector<32x32xf32>, vector<8x32xf32> -> vector<8x32xf32>
    %358 = vector.broadcast %20 : vector<1x32xf32> to vector<8x32xf32>
    %359 = arith.addf %357, %358 : vector<8x32xf32>
    %cst_78 = arith.constant 0.000000e+00 : f32
    %360 = vector.broadcast %cst_78 : f32 to vector<8x32xf32>
    %361 = arith.maximumf %359, %360 : vector<8x32xf32>
    %cst_79 = arith.constant dense<0.000000e+00> : vector<8x32xf32>
    %362 = tpu.matmul %361, %8, %cst_79 {dimension_numbers = #tpu.dot_dimension_numbers<[1], [0], [0], [1], [0, 0, 1, 1], [], []>} : vector<8x32xf32>, vector<32x32xf32>, vector<8x32xf32> -> vector<8x32xf32>
    %363 = vector.broadcast %20 : vector<1x32xf32> to vector<8x32xf32>
    %364 = arith.addf %362, %363 : vector<8x32xf32>
    %cst_80 = arith.constant 0.000000e+00 : f32
    %365 = vector.broadcast %cst_80 : f32 to vector<8x32xf32>
    %366 = arith.maximumf %364, %365 : vector<8x32xf32>
    %367 = arith.addf %356, %366 : vector<8x32xf32>
    %cst_81 = arith.constant dense<0.000000e+00> : vector<8xf32>
    %368 = vector.multi_reduction <add>, %367, %cst_81 [1] : vector<8x32xf32> to vector<8xf32>
    %369 = vector.shape_cast %368 : vector<8xf32> to vector<8x1xf32>
    %cst_82 = arith.constant 0.0416666679 : f32
    %370 = vector.broadcast %cst_82 : f32 to vector<8x1xf32>
    %371 = arith.mulf %369, %370 : vector<8x1xf32>
    %372 = arith.mulf %367, %367 : vector<8x32xf32>
    %cst_83 = arith.constant dense<0.000000e+00> : vector<8xf32>
    %373 = vector.multi_reduction <add>, %372, %cst_83 [1] : vector<8x32xf32> to vector<8xf32>
    %374 = vector.shape_cast %373 : vector<8xf32> to vector<8x1xf32>
    %cst_84 = arith.constant 0.0416666679 : f32
    %375 = vector.broadcast %cst_84 : f32 to vector<8x1xf32>
    %376 = arith.mulf %374, %375 : vector<8x1xf32>
    %377 = arith.mulf %371, %371 : vector<8x1xf32>
    %378 = arith.subf %376, %377 : vector<8x1xf32>
    %379 = vector.extract_strided_slice %367 {offsets = [0, 0], sizes = [8, 16], strides = [1, 1]} : vector<8x32xf32> to vector<8x16xf32>
    %380 = vector.broadcast %371 : vector<8x1xf32> to vector<8x16xf32>
    %381 = arith.subf %379, %380 : vector<8x16xf32>
    %cst_85 = arith.constant 9.99999974E-6 : f32
    %382 = vector.broadcast %cst_85 : f32 to vector<8x1xf32>
    %383 = arith.addf %378, %382 : vector<8x1xf32>
    %384 = math.rsqrt %383 : vector<8x1xf32>
    %385 = vector.broadcast %384 : vector<8x1xf32> to vector<8x16xf32>
    %386 = arith.mulf %381, %385 : vector<8x16xf32>
    %387 = vector.broadcast %16 : vector<1x16xf32> to vector<8x16xf32>
    %388 = arith.mulf %386, %387 : vector<8x16xf32>
    %389 = vector.broadcast %17 : vector<1x16xf32> to vector<8x16xf32>
    %390 = arith.addf %388, %389 : vector<8x16xf32>
    %391 = math.tanh %284 : vector<8x16xf32>
    %cst_86 = arith.constant dense<0.000000e+00> : vector<8x32xf32>
    %392 = tpu.matmul %391, %4, %cst_86 {dimension_numbers = #tpu.dot_dimension_numbers<[1], [0], [0], [1], [0, 0, 1, 1], [], []>} : vector<8x16xf32>, vector<16x32xf32>, vector<8x32xf32> -> vector<8x32xf32>
    %393 = vector.extract_strided_slice %31 {offsets = [16, 0], sizes = [8, 32], strides = [1, 1]} : vector<64x32xf32> to vector<8x32xf32>
    %394 = arith.addf %392, %393 : vector<8x32xf32>
    %395 = vector.extract_strided_slice %394 {offsets = [0, 0], sizes = [8, 16], strides = [1, 1]} : vector<8x32xf32> to vector<8x16xf32>
    %396 = arith.negf %395 : vector<8x16xf32>
    %397 = math.exp %396 : vector<8x16xf32>
    %cst_87 = arith.constant 1.000000e+00 : f32
    %398 = vector.broadcast %cst_87 : f32 to vector<8x16xf32>
    %399 = arith.addf %398, %397 : vector<8x16xf32>
    %400 = arith.divf %398, %399 : vector<8x16xf32>
    %401 = vector.extract_strided_slice %394 {offsets = [0, 16], sizes = [8, 16], strides = [1, 1]} : vector<8x32xf32> to vector<8x16xf32>
    %402 = arith.negf %401 : vector<8x16xf32>
    %403 = math.exp %402 : vector<8x16xf32>
    %cst_88 = arith.constant 1.000000e+00 : f32
    %404 = vector.broadcast %cst_88 : f32 to vector<8x16xf32>
    %405 = arith.addf %404, %403 : vector<8x16xf32>
    %406 = arith.divf %404, %405 : vector<8x16xf32>
    %407 = math.tanh %390 : vector<8x16xf32>
    %408 = arith.mulf %400, %407 : vector<8x16xf32>
    %409 = arith.mulf %406, %284 : vector<8x16xf32>
    %410 = arith.addf %408, %409 : vector<8x16xf32>
    %411 = vector.extract_strided_slice %25 {offsets = [24, 0], sizes = [8, 16], strides = [1, 1]} : vector<64x16xf32> to vector<8x16xf32>
    %cst_89 = arith.constant dense<0.000000e+00> : vector<8x96xf32>
    %412 = tpu.matmul %410, %3, %cst_89 {dimension_numbers = #tpu.dot_dimension_numbers<[1], [0], [0], [1], [0, 0, 1, 1], [], []>} : vector<8x16xf32>, vector<16x96xf32>, vector<8x96xf32> -> vector<8x96xf32>
    %413 = vector.extract_strided_slice %28 {offsets = [24, 0], sizes = [8, 96], strides = [1, 1]} : vector<64x96xf32> to vector<8x96xf32>
    %414 = arith.addf %412, %413 : vector<8x96xf32>
    %cst_90 = arith.constant dense<0.000000e+00> : vector<8xf32>
    %415 = vector.multi_reduction <add>, %414, %cst_90 [1] : vector<8x96xf32> to vector<8xf32>
    %416 = vector.shape_cast %415 : vector<8xf32> to vector<8x1xf32>
    %cst_91 = arith.constant 0.013888889 : f32
    %417 = vector.broadcast %cst_91 : f32 to vector<8x1xf32>
    %418 = arith.mulf %416, %417 : vector<8x1xf32>
    %419 = arith.mulf %414, %414 : vector<8x96xf32>
    %cst_92 = arith.constant dense<0.000000e+00> : vector<8xf32>
    %420 = vector.multi_reduction <add>, %419, %cst_92 [1] : vector<8x96xf32> to vector<8xf32>
    %421 = vector.shape_cast %420 : vector<8xf32> to vector<8x1xf32>
    %cst_93 = arith.constant 0.013888889 : f32
    %422 = vector.broadcast %cst_93 : f32 to vector<8x1xf32>
    %423 = arith.mulf %421, %422 : vector<8x1xf32>
    %424 = arith.mulf %418, %418 : vector<8x1xf32>
    %425 = arith.subf %423, %424 : vector<8x1xf32>
    %426 = vector.broadcast %418 : vector<8x1xf32> to vector<8x96xf32>
    %427 = arith.subf %414, %426 : vector<8x96xf32>
    %cst_94 = arith.constant 9.99999974E-6 : f32
    %428 = vector.broadcast %cst_94 : f32 to vector<8x1xf32>
    %429 = arith.addf %425, %428 : vector<8x1xf32>
    %430 = math.rsqrt %429 : vector<8x1xf32>
    %431 = vector.broadcast %430 : vector<8x1xf32> to vector<8x96xf32>
    %432 = arith.mulf %427, %431 : vector<8x96xf32>
    %433 = vector.broadcast %12 : vector<1x96xf32> to vector<8x96xf32>
    %434 = arith.mulf %432, %433 : vector<8x96xf32>
    %435 = vector.broadcast %15 : vector<1x96xf32> to vector<8x96xf32>
    %436 = arith.addf %434, %435 : vector<8x96xf32>
    %437 = vector.extract_strided_slice %436 {offsets = [0, 0], sizes = [8, 32], strides = [1, 1]} : vector<8x96xf32> to vector<8x32xf32>
    %438 = vector.extract_strided_slice %436 {offsets = [0, 32], sizes = [8, 32], strides = [1, 1]} : vector<8x96xf32> to vector<8x32xf32>
    %439 = vector.extract_strided_slice %436 {offsets = [0, 64], sizes = [8, 32], strides = [1, 1]} : vector<8x96xf32> to vector<8x32xf32>
    %440 = vector.extract_strided_slice %438 {offsets = [0, 16], sizes = [8, 16], strides = [1, 1]} : vector<8x32xf32> to vector<8x16xf32>
    %441 = vector.extract_strided_slice %438 {offsets = [0, 0], sizes = [8, 16], strides = [1, 1]} : vector<8x32xf32> to vector<8x16xf32>
    %442 = tpu.concatenate %440, %441 in 1 : vector<8x16xf32>, vector<8x16xf32> -> vector<8x32xf32>
    %443 = vector.extract_strided_slice %439 {offsets = [0, 16], sizes = [8, 16], strides = [1, 1]} : vector<8x32xf32> to vector<8x16xf32>
    %444 = vector.extract_strided_slice %439 {offsets = [0, 0], sizes = [8, 16], strides = [1, 1]} : vector<8x32xf32> to vector<8x16xf32>
    %445 = tpu.concatenate %443, %444 in 1 : vector<8x16xf32>, vector<8x16xf32> -> vector<8x32xf32>
    %446 = arith.mulf %437, %438 : vector<8x32xf32>
    %cst_95 = arith.constant dense<0.000000e+00> : vector<8x32xf32>
    %447 = tpu.matmul %446, %7, %cst_95 {dimension_numbers = #tpu.dot_dimension_numbers<[1], [0], [0], [1], [0, 0, 1, 1], [], []>} : vector<8x32xf32>, vector<32x32xf32>, vector<8x32xf32> -> vector<8x32xf32>
    %448 = arith.mulf %437, %442 : vector<8x32xf32>
    %cst_96 = arith.constant dense<0.000000e+00> : vector<8x32xf32>
    %449 = tpu.matmul %448, %7, %cst_96 {dimension_numbers = #tpu.dot_dimension_numbers<[1], [0], [0], [1], [0, 0, 1, 1], [], []>} : vector<8x32xf32>, vector<32x32xf32>, vector<8x32xf32> -> vector<8x32xf32>
    %450 = arith.subf %447, %449 : vector<8x32xf32>
    %451 = arith.negf %450 : vector<8x32xf32>
    %452 = math.exp %451 : vector<8x32xf32>
    %cst_97 = arith.constant 1.000000e+00 : f32
    %453 = vector.broadcast %cst_97 : f32 to vector<8x32xf32>
    %454 = arith.addf %453, %452 : vector<8x32xf32>
    %455 = arith.divf %453, %454 : vector<8x32xf32>
    %456 = arith.subf %439, %445 : vector<8x32xf32>
    %457 = arith.mulf %455, %456 : vector<8x32xf32>
    %458 = arith.addf %445, %457 : vector<8x32xf32>
    %459 = tpu.concatenate %410, %411 in 1 : vector<8x16xf32>, vector<8x16xf32> -> vector<8x32xf32>
    %460 = arith.addf %459, %458 : vector<8x32xf32>
    %cst_98 = arith.constant dense<0.000000e+00> : vector<8xf32>
    %461 = vector.multi_reduction <add>, %460, %cst_98 [1] : vector<8x32xf32> to vector<8xf32>
    %462 = vector.shape_cast %461 : vector<8xf32> to vector<8x1xf32>
    %cst_99 = arith.constant 0.0416666679 : f32
    %463 = vector.broadcast %cst_99 : f32 to vector<8x1xf32>
    %464 = arith.mulf %462, %463 : vector<8x1xf32>
    %465 = arith.mulf %460, %460 : vector<8x32xf32>
    %cst_100 = arith.constant dense<0.000000e+00> : vector<8xf32>
    %466 = vector.multi_reduction <add>, %465, %cst_100 [1] : vector<8x32xf32> to vector<8xf32>
    %467 = vector.shape_cast %466 : vector<8xf32> to vector<8x1xf32>
    %cst_101 = arith.constant 0.0416666679 : f32
    %468 = vector.broadcast %cst_101 : f32 to vector<8x1xf32>
    %469 = arith.mulf %467, %468 : vector<8x1xf32>
    %470 = arith.mulf %464, %464 : vector<8x1xf32>
    %471 = arith.subf %469, %470 : vector<8x1xf32>
    %472 = vector.broadcast %464 : vector<8x1xf32> to vector<8x32xf32>
    %473 = arith.subf %460, %472 : vector<8x32xf32>
    %cst_102 = arith.constant 9.99999974E-6 : f32
    %474 = vector.broadcast %cst_102 : f32 to vector<8x1xf32>
    %475 = arith.addf %471, %474 : vector<8x1xf32>
    %476 = math.rsqrt %475 : vector<8x1xf32>
    %477 = vector.broadcast %476 : vector<8x1xf32> to vector<8x32xf32>
    %478 = arith.mulf %473, %477 : vector<8x32xf32>
    %479 = vector.broadcast %18 : vector<1x32xf32> to vector<8x32xf32>
    %480 = arith.mulf %478, %479 : vector<8x32xf32>
    %481 = vector.broadcast %19 : vector<1x32xf32> to vector<8x32xf32>
    %482 = arith.addf %480, %481 : vector<8x32xf32>
    %cst_103 = arith.constant dense<0.000000e+00> : vector<8x32xf32>
    %483 = tpu.matmul %482, %8, %cst_103 {dimension_numbers = #tpu.dot_dimension_numbers<[1], [0], [0], [1], [0, 0, 1, 1], [], []>} : vector<8x32xf32>, vector<32x32xf32>, vector<8x32xf32> -> vector<8x32xf32>
    %484 = vector.broadcast %20 : vector<1x32xf32> to vector<8x32xf32>
    %485 = arith.addf %483, %484 : vector<8x32xf32>
    %cst_104 = arith.constant 0.000000e+00 : f32
    %486 = vector.broadcast %cst_104 : f32 to vector<8x32xf32>
    %487 = arith.maximumf %485, %486 : vector<8x32xf32>
    %cst_105 = arith.constant dense<0.000000e+00> : vector<8x32xf32>
    %488 = tpu.matmul %487, %8, %cst_105 {dimension_numbers = #tpu.dot_dimension_numbers<[1], [0], [0], [1], [0, 0, 1, 1], [], []>} : vector<8x32xf32>, vector<32x32xf32>, vector<8x32xf32> -> vector<8x32xf32>
    %489 = vector.broadcast %20 : vector<1x32xf32> to vector<8x32xf32>
    %490 = arith.addf %488, %489 : vector<8x32xf32>
    %cst_106 = arith.constant 0.000000e+00 : f32
    %491 = vector.broadcast %cst_106 : f32 to vector<8x32xf32>
    %492 = arith.maximumf %490, %491 : vector<8x32xf32>
    %493 = arith.addf %482, %492 : vector<8x32xf32>
    %cst_107 = arith.constant dense<0.000000e+00> : vector<8xf32>
    %494 = vector.multi_reduction <add>, %493, %cst_107 [1] : vector<8x32xf32> to vector<8xf32>
    %495 = vector.shape_cast %494 : vector<8xf32> to vector<8x1xf32>
    %cst_108 = arith.constant 0.0416666679 : f32
    %496 = vector.broadcast %cst_108 : f32 to vector<8x1xf32>
    %497 = arith.mulf %495, %496 : vector<8x1xf32>
    %498 = arith.mulf %493, %493 : vector<8x32xf32>
    %cst_109 = arith.constant dense<0.000000e+00> : vector<8xf32>
    %499 = vector.multi_reduction <add>, %498, %cst_109 [1] : vector<8x32xf32> to vector<8xf32>
    %500 = vector.shape_cast %499 : vector<8xf32> to vector<8x1xf32>
    %cst_110 = arith.constant 0.0416666679 : f32
    %501 = vector.broadcast %cst_110 : f32 to vector<8x1xf32>
    %502 = arith.mulf %500, %501 : vector<8x1xf32>
    %503 = arith.mulf %497, %497 : vector<8x1xf32>
    %504 = arith.subf %502, %503 : vector<8x1xf32>
    %505 = vector.extract_strided_slice %493 {offsets = [0, 0], sizes = [8, 16], strides = [1, 1]} : vector<8x32xf32> to vector<8x16xf32>
    %506 = vector.broadcast %497 : vector<8x1xf32> to vector<8x16xf32>
    %507 = arith.subf %505, %506 : vector<8x16xf32>
    %cst_111 = arith.constant 9.99999974E-6 : f32
    %508 = vector.broadcast %cst_111 : f32 to vector<8x1xf32>
    %509 = arith.addf %504, %508 : vector<8x1xf32>
    %510 = math.rsqrt %509 : vector<8x1xf32>
    %511 = vector.broadcast %510 : vector<8x1xf32> to vector<8x16xf32>
    %512 = arith.mulf %507, %511 : vector<8x16xf32>
    %513 = vector.broadcast %16 : vector<1x16xf32> to vector<8x16xf32>
    %514 = arith.mulf %512, %513 : vector<8x16xf32>
    %515 = vector.broadcast %17 : vector<1x16xf32> to vector<8x16xf32>
    %516 = arith.addf %514, %515 : vector<8x16xf32>
    %517 = math.tanh %410 : vector<8x16xf32>
    %cst_112 = arith.constant dense<0.000000e+00> : vector<8x32xf32>
    %518 = tpu.matmul %517, %4, %cst_112 {dimension_numbers = #tpu.dot_dimension_numbers<[1], [0], [0], [1], [0, 0, 1, 1], [], []>} : vector<8x16xf32>, vector<16x32xf32>, vector<8x32xf32> -> vector<8x32xf32>
    %519 = vector.extract_strided_slice %31 {offsets = [24, 0], sizes = [8, 32], strides = [1, 1]} : vector<64x32xf32> to vector<8x32xf32>
    %520 = arith.addf %518, %519 : vector<8x32xf32>
    %521 = vector.extract_strided_slice %520 {offsets = [0, 0], sizes = [8, 16], strides = [1, 1]} : vector<8x32xf32> to vector<8x16xf32>
    %522 = arith.negf %521 : vector<8x16xf32>
    %523 = math.exp %522 : vector<8x16xf32>
    %cst_113 = arith.constant 1.000000e+00 : f32
    %524 = vector.broadcast %cst_113 : f32 to vector<8x16xf32>
    %525 = arith.addf %524, %523 : vector<8x16xf32>
    %526 = arith.divf %524, %525 : vector<8x16xf32>
    %527 = vector.extract_strided_slice %520 {offsets = [0, 16], sizes = [8, 16], strides = [1, 1]} : vector<8x32xf32> to vector<8x16xf32>
    %528 = arith.negf %527 : vector<8x16xf32>
    %529 = math.exp %528 : vector<8x16xf32>
    %cst_114 = arith.constant 1.000000e+00 : f32
    %530 = vector.broadcast %cst_114 : f32 to vector<8x16xf32>
    %531 = arith.addf %530, %529 : vector<8x16xf32>
    %532 = arith.divf %530, %531 : vector<8x16xf32>
    %533 = math.tanh %516 : vector<8x16xf32>
    %534 = arith.mulf %526, %533 : vector<8x16xf32>
    %535 = arith.mulf %532, %410 : vector<8x16xf32>
    %536 = arith.addf %534, %535 : vector<8x16xf32>
    %537 = vector.extract_strided_slice %25 {offsets = [32, 0], sizes = [8, 16], strides = [1, 1]} : vector<64x16xf32> to vector<8x16xf32>
    %cst_115 = arith.constant dense<0.000000e+00> : vector<8x96xf32>
    %538 = tpu.matmul %536, %3, %cst_115 {dimension_numbers = #tpu.dot_dimension_numbers<[1], [0], [0], [1], [0, 0, 1, 1], [], []>} : vector<8x16xf32>, vector<16x96xf32>, vector<8x96xf32> -> vector<8x96xf32>
    %539 = vector.extract_strided_slice %28 {offsets = [32, 0], sizes = [8, 96], strides = [1, 1]} : vector<64x96xf32> to vector<8x96xf32>
    %540 = arith.addf %538, %539 : vector<8x96xf32>
    %cst_116 = arith.constant dense<0.000000e+00> : vector<8xf32>
    %541 = vector.multi_reduction <add>, %540, %cst_116 [1] : vector<8x96xf32> to vector<8xf32>
    %542 = vector.shape_cast %541 : vector<8xf32> to vector<8x1xf32>
    %cst_117 = arith.constant 0.013888889 : f32
    %543 = vector.broadcast %cst_117 : f32 to vector<8x1xf32>
    %544 = arith.mulf %542, %543 : vector<8x1xf32>
    %545 = arith.mulf %540, %540 : vector<8x96xf32>
    %cst_118 = arith.constant dense<0.000000e+00> : vector<8xf32>
    %546 = vector.multi_reduction <add>, %545, %cst_118 [1] : vector<8x96xf32> to vector<8xf32>
    %547 = vector.shape_cast %546 : vector<8xf32> to vector<8x1xf32>
    %cst_119 = arith.constant 0.013888889 : f32
    %548 = vector.broadcast %cst_119 : f32 to vector<8x1xf32>
    %549 = arith.mulf %547, %548 : vector<8x1xf32>
    %550 = arith.mulf %544, %544 : vector<8x1xf32>
    %551 = arith.subf %549, %550 : vector<8x1xf32>
    %552 = vector.broadcast %544 : vector<8x1xf32> to vector<8x96xf32>
    %553 = arith.subf %540, %552 : vector<8x96xf32>
    %cst_120 = arith.constant 9.99999974E-6 : f32
    %554 = vector.broadcast %cst_120 : f32 to vector<8x1xf32>
    %555 = arith.addf %551, %554 : vector<8x1xf32>
    %556 = math.rsqrt %555 : vector<8x1xf32>
    %557 = vector.broadcast %556 : vector<8x1xf32> to vector<8x96xf32>
    %558 = arith.mulf %553, %557 : vector<8x96xf32>
    %559 = vector.broadcast %12 : vector<1x96xf32> to vector<8x96xf32>
    %560 = arith.mulf %558, %559 : vector<8x96xf32>
    %561 = vector.broadcast %15 : vector<1x96xf32> to vector<8x96xf32>
    %562 = arith.addf %560, %561 : vector<8x96xf32>
    %563 = vector.extract_strided_slice %562 {offsets = [0, 0], sizes = [8, 32], strides = [1, 1]} : vector<8x96xf32> to vector<8x32xf32>
    %564 = vector.extract_strided_slice %562 {offsets = [0, 32], sizes = [8, 32], strides = [1, 1]} : vector<8x96xf32> to vector<8x32xf32>
    %565 = vector.extract_strided_slice %562 {offsets = [0, 64], sizes = [8, 32], strides = [1, 1]} : vector<8x96xf32> to vector<8x32xf32>
    %566 = vector.extract_strided_slice %564 {offsets = [0, 16], sizes = [8, 16], strides = [1, 1]} : vector<8x32xf32> to vector<8x16xf32>
    %567 = vector.extract_strided_slice %564 {offsets = [0, 0], sizes = [8, 16], strides = [1, 1]} : vector<8x32xf32> to vector<8x16xf32>
    %568 = tpu.concatenate %566, %567 in 1 : vector<8x16xf32>, vector<8x16xf32> -> vector<8x32xf32>
    %569 = vector.extract_strided_slice %565 {offsets = [0, 16], sizes = [8, 16], strides = [1, 1]} : vector<8x32xf32> to vector<8x16xf32>
    %570 = vector.extract_strided_slice %565 {offsets = [0, 0], sizes = [8, 16], strides = [1, 1]} : vector<8x32xf32> to vector<8x16xf32>
    %571 = tpu.concatenate %569, %570 in 1 : vector<8x16xf32>, vector<8x16xf32> -> vector<8x32xf32>
    %572 = arith.mulf %563, %564 : vector<8x32xf32>
    %cst_121 = arith.constant dense<0.000000e+00> : vector<8x32xf32>
    %573 = tpu.matmul %572, %7, %cst_121 {dimension_numbers = #tpu.dot_dimension_numbers<[1], [0], [0], [1], [0, 0, 1, 1], [], []>} : vector<8x32xf32>, vector<32x32xf32>, vector<8x32xf32> -> vector<8x32xf32>
    %574 = arith.mulf %563, %568 : vector<8x32xf32>
    %cst_122 = arith.constant dense<0.000000e+00> : vector<8x32xf32>
    %575 = tpu.matmul %574, %7, %cst_122 {dimension_numbers = #tpu.dot_dimension_numbers<[1], [0], [0], [1], [0, 0, 1, 1], [], []>} : vector<8x32xf32>, vector<32x32xf32>, vector<8x32xf32> -> vector<8x32xf32>
    %576 = arith.subf %573, %575 : vector<8x32xf32>
    %577 = arith.negf %576 : vector<8x32xf32>
    %578 = math.exp %577 : vector<8x32xf32>
    %cst_123 = arith.constant 1.000000e+00 : f32
    %579 = vector.broadcast %cst_123 : f32 to vector<8x32xf32>
    %580 = arith.addf %579, %578 : vector<8x32xf32>
    %581 = arith.divf %579, %580 : vector<8x32xf32>
    %582 = arith.subf %565, %571 : vector<8x32xf32>
    %583 = arith.mulf %581, %582 : vector<8x32xf32>
    %584 = arith.addf %571, %583 : vector<8x32xf32>
    %585 = tpu.concatenate %536, %537 in 1 : vector<8x16xf32>, vector<8x16xf32> -> vector<8x32xf32>
    %586 = arith.addf %585, %584 : vector<8x32xf32>
    %cst_124 = arith.constant dense<0.000000e+00> : vector<8xf32>
    %587 = vector.multi_reduction <add>, %586, %cst_124 [1] : vector<8x32xf32> to vector<8xf32>
    %588 = vector.shape_cast %587 : vector<8xf32> to vector<8x1xf32>
    %cst_125 = arith.constant 0.0416666679 : f32
    %589 = vector.broadcast %cst_125 : f32 to vector<8x1xf32>
    %590 = arith.mulf %588, %589 : vector<8x1xf32>
    %591 = arith.mulf %586, %586 : vector<8x32xf32>
    %cst_126 = arith.constant dense<0.000000e+00> : vector<8xf32>
    %592 = vector.multi_reduction <add>, %591, %cst_126 [1] : vector<8x32xf32> to vector<8xf32>
    %593 = vector.shape_cast %592 : vector<8xf32> to vector<8x1xf32>
    %cst_127 = arith.constant 0.0416666679 : f32
    %594 = vector.broadcast %cst_127 : f32 to vector<8x1xf32>
    %595 = arith.mulf %593, %594 : vector<8x1xf32>
    %596 = arith.mulf %590, %590 : vector<8x1xf32>
    %597 = arith.subf %595, %596 : vector<8x1xf32>
    %598 = vector.broadcast %590 : vector<8x1xf32> to vector<8x32xf32>
    %599 = arith.subf %586, %598 : vector<8x32xf32>
    %cst_128 = arith.constant 9.99999974E-6 : f32
    %600 = vector.broadcast %cst_128 : f32 to vector<8x1xf32>
    %601 = arith.addf %597, %600 : vector<8x1xf32>
    %602 = math.rsqrt %601 : vector<8x1xf32>
    %603 = vector.broadcast %602 : vector<8x1xf32> to vector<8x32xf32>
    %604 = arith.mulf %599, %603 : vector<8x32xf32>
    %605 = vector.broadcast %18 : vector<1x32xf32> to vector<8x32xf32>
    %606 = arith.mulf %604, %605 : vector<8x32xf32>
    %607 = vector.broadcast %19 : vector<1x32xf32> to vector<8x32xf32>
    %608 = arith.addf %606, %607 : vector<8x32xf32>
    %cst_129 = arith.constant dense<0.000000e+00> : vector<8x32xf32>
    %609 = tpu.matmul %608, %8, %cst_129 {dimension_numbers = #tpu.dot_dimension_numbers<[1], [0], [0], [1], [0, 0, 1, 1], [], []>} : vector<8x32xf32>, vector<32x32xf32>, vector<8x32xf32> -> vector<8x32xf32>
    %610 = vector.broadcast %20 : vector<1x32xf32> to vector<8x32xf32>
    %611 = arith.addf %609, %610 : vector<8x32xf32>
    %cst_130 = arith.constant 0.000000e+00 : f32
    %612 = vector.broadcast %cst_130 : f32 to vector<8x32xf32>
    %613 = arith.maximumf %611, %612 : vector<8x32xf32>
    %cst_131 = arith.constant dense<0.000000e+00> : vector<8x32xf32>
    %614 = tpu.matmul %613, %8, %cst_131 {dimension_numbers = #tpu.dot_dimension_numbers<[1], [0], [0], [1], [0, 0, 1, 1], [], []>} : vector<8x32xf32>, vector<32x32xf32>, vector<8x32xf32> -> vector<8x32xf32>
    %615 = vector.broadcast %20 : vector<1x32xf32> to vector<8x32xf32>
    %616 = arith.addf %614, %615 : vector<8x32xf32>
    %cst_132 = arith.constant 0.000000e+00 : f32
    %617 = vector.broadcast %cst_132 : f32 to vector<8x32xf32>
    %618 = arith.maximumf %616, %617 : vector<8x32xf32>
    %619 = arith.addf %608, %618 : vector<8x32xf32>
    %cst_133 = arith.constant dense<0.000000e+00> : vector<8xf32>
    %620 = vector.multi_reduction <add>, %619, %cst_133 [1] : vector<8x32xf32> to vector<8xf32>
    %621 = vector.shape_cast %620 : vector<8xf32> to vector<8x1xf32>
    %cst_134 = arith.constant 0.0416666679 : f32
    %622 = vector.broadcast %cst_134 : f32 to vector<8x1xf32>
    %623 = arith.mulf %621, %622 : vector<8x1xf32>
    %624 = arith.mulf %619, %619 : vector<8x32xf32>
    %cst_135 = arith.constant dense<0.000000e+00> : vector<8xf32>
    %625 = vector.multi_reduction <add>, %624, %cst_135 [1] : vector<8x32xf32> to vector<8xf32>
    %626 = vector.shape_cast %625 : vector<8xf32> to vector<8x1xf32>
    %cst_136 = arith.constant 0.0416666679 : f32
    %627 = vector.broadcast %cst_136 : f32 to vector<8x1xf32>
    %628 = arith.mulf %626, %627 : vector<8x1xf32>
    %629 = arith.mulf %623, %623 : vector<8x1xf32>
    %630 = arith.subf %628, %629 : vector<8x1xf32>
    %631 = vector.extract_strided_slice %619 {offsets = [0, 0], sizes = [8, 16], strides = [1, 1]} : vector<8x32xf32> to vector<8x16xf32>
    %632 = vector.broadcast %623 : vector<8x1xf32> to vector<8x16xf32>
    %633 = arith.subf %631, %632 : vector<8x16xf32>
    %cst_137 = arith.constant 9.99999974E-6 : f32
    %634 = vector.broadcast %cst_137 : f32 to vector<8x1xf32>
    %635 = arith.addf %630, %634 : vector<8x1xf32>
    %636 = math.rsqrt %635 : vector<8x1xf32>
    %637 = vector.broadcast %636 : vector<8x1xf32> to vector<8x16xf32>
    %638 = arith.mulf %633, %637 : vector<8x16xf32>
    %639 = vector.broadcast %16 : vector<1x16xf32> to vector<8x16xf32>
    %640 = arith.mulf %638, %639 : vector<8x16xf32>
    %641 = vector.broadcast %17 : vector<1x16xf32> to vector<8x16xf32>
    %642 = arith.addf %640, %641 : vector<8x16xf32>
    %643 = math.tanh %536 : vector<8x16xf32>
    %cst_138 = arith.constant dense<0.000000e+00> : vector<8x32xf32>
    %644 = tpu.matmul %643, %4, %cst_138 {dimension_numbers = #tpu.dot_dimension_numbers<[1], [0], [0], [1], [0, 0, 1, 1], [], []>} : vector<8x16xf32>, vector<16x32xf32>, vector<8x32xf32> -> vector<8x32xf32>
    %645 = vector.extract_strided_slice %31 {offsets = [32, 0], sizes = [8, 32], strides = [1, 1]} : vector<64x32xf32> to vector<8x32xf32>
    %646 = arith.addf %644, %645 : vector<8x32xf32>
    %647 = vector.extract_strided_slice %646 {offsets = [0, 0], sizes = [8, 16], strides = [1, 1]} : vector<8x32xf32> to vector<8x16xf32>
    %648 = arith.negf %647 : vector<8x16xf32>
    %649 = math.exp %648 : vector<8x16xf32>
    %cst_139 = arith.constant 1.000000e+00 : f32
    %650 = vector.broadcast %cst_139 : f32 to vector<8x16xf32>
    %651 = arith.addf %650, %649 : vector<8x16xf32>
    %652 = arith.divf %650, %651 : vector<8x16xf32>
    %653 = vector.extract_strided_slice %646 {offsets = [0, 16], sizes = [8, 16], strides = [1, 1]} : vector<8x32xf32> to vector<8x16xf32>
    %654 = arith.negf %653 : vector<8x16xf32>
    %655 = math.exp %654 : vector<8x16xf32>
    %cst_140 = arith.constant 1.000000e+00 : f32
    %656 = vector.broadcast %cst_140 : f32 to vector<8x16xf32>
    %657 = arith.addf %656, %655 : vector<8x16xf32>
    %658 = arith.divf %656, %657 : vector<8x16xf32>
    %659 = math.tanh %642 : vector<8x16xf32>
    %660 = arith.mulf %652, %659 : vector<8x16xf32>
    %661 = arith.mulf %658, %536 : vector<8x16xf32>
    %662 = arith.addf %660, %661 : vector<8x16xf32>
    %663 = vector.extract_strided_slice %25 {offsets = [40, 0], sizes = [8, 16], strides = [1, 1]} : vector<64x16xf32> to vector<8x16xf32>
    %cst_141 = arith.constant dense<0.000000e+00> : vector<8x96xf32>
    %664 = tpu.matmul %662, %3, %cst_141 {dimension_numbers = #tpu.dot_dimension_numbers<[1], [0], [0], [1], [0, 0, 1, 1], [], []>} : vector<8x16xf32>, vector<16x96xf32>, vector<8x96xf32> -> vector<8x96xf32>
    %665 = vector.extract_strided_slice %28 {offsets = [40, 0], sizes = [8, 96], strides = [1, 1]} : vector<64x96xf32> to vector<8x96xf32>
    %666 = arith.addf %664, %665 : vector<8x96xf32>
    %cst_142 = arith.constant dense<0.000000e+00> : vector<8xf32>
    %667 = vector.multi_reduction <add>, %666, %cst_142 [1] : vector<8x96xf32> to vector<8xf32>
    %668 = vector.shape_cast %667 : vector<8xf32> to vector<8x1xf32>
    %cst_143 = arith.constant 0.013888889 : f32
    %669 = vector.broadcast %cst_143 : f32 to vector<8x1xf32>
    %670 = arith.mulf %668, %669 : vector<8x1xf32>
    %671 = arith.mulf %666, %666 : vector<8x96xf32>
    %cst_144 = arith.constant dense<0.000000e+00> : vector<8xf32>
    %672 = vector.multi_reduction <add>, %671, %cst_144 [1] : vector<8x96xf32> to vector<8xf32>
    %673 = vector.shape_cast %672 : vector<8xf32> to vector<8x1xf32>
    %cst_145 = arith.constant 0.013888889 : f32
    %674 = vector.broadcast %cst_145 : f32 to vector<8x1xf32>
    %675 = arith.mulf %673, %674 : vector<8x1xf32>
    %676 = arith.mulf %670, %670 : vector<8x1xf32>
    %677 = arith.subf %675, %676 : vector<8x1xf32>
    %678 = vector.broadcast %670 : vector<8x1xf32> to vector<8x96xf32>
    %679 = arith.subf %666, %678 : vector<8x96xf32>
    %cst_146 = arith.constant 9.99999974E-6 : f32
    %680 = vector.broadcast %cst_146 : f32 to vector<8x1xf32>
    %681 = arith.addf %677, %680 : vector<8x1xf32>
    %682 = math.rsqrt %681 : vector<8x1xf32>
    %683 = vector.broadcast %682 : vector<8x1xf32> to vector<8x96xf32>
    %684 = arith.mulf %679, %683 : vector<8x96xf32>
    %685 = vector.broadcast %12 : vector<1x96xf32> to vector<8x96xf32>
    %686 = arith.mulf %684, %685 : vector<8x96xf32>
    %687 = vector.broadcast %15 : vector<1x96xf32> to vector<8x96xf32>
    %688 = arith.addf %686, %687 : vector<8x96xf32>
    %689 = vector.extract_strided_slice %688 {offsets = [0, 0], sizes = [8, 32], strides = [1, 1]} : vector<8x96xf32> to vector<8x32xf32>
    %690 = vector.extract_strided_slice %688 {offsets = [0, 32], sizes = [8, 32], strides = [1, 1]} : vector<8x96xf32> to vector<8x32xf32>
    %691 = vector.extract_strided_slice %688 {offsets = [0, 64], sizes = [8, 32], strides = [1, 1]} : vector<8x96xf32> to vector<8x32xf32>
    %692 = vector.extract_strided_slice %690 {offsets = [0, 16], sizes = [8, 16], strides = [1, 1]} : vector<8x32xf32> to vector<8x16xf32>
    %693 = vector.extract_strided_slice %690 {offsets = [0, 0], sizes = [8, 16], strides = [1, 1]} : vector<8x32xf32> to vector<8x16xf32>
    %694 = tpu.concatenate %692, %693 in 1 : vector<8x16xf32>, vector<8x16xf32> -> vector<8x32xf32>
    %695 = vector.extract_strided_slice %691 {offsets = [0, 16], sizes = [8, 16], strides = [1, 1]} : vector<8x32xf32> to vector<8x16xf32>
    %696 = vector.extract_strided_slice %691 {offsets = [0, 0], sizes = [8, 16], strides = [1, 1]} : vector<8x32xf32> to vector<8x16xf32>
    %697 = tpu.concatenate %695, %696 in 1 : vector<8x16xf32>, vector<8x16xf32> -> vector<8x32xf32>
    %698 = arith.mulf %689, %690 : vector<8x32xf32>
    %cst_147 = arith.constant dense<0.000000e+00> : vector<8x32xf32>
    %699 = tpu.matmul %698, %7, %cst_147 {dimension_numbers = #tpu.dot_dimension_numbers<[1], [0], [0], [1], [0, 0, 1, 1], [], []>} : vector<8x32xf32>, vector<32x32xf32>, vector<8x32xf32> -> vector<8x32xf32>
    %700 = arith.mulf %689, %694 : vector<8x32xf32>
    %cst_148 = arith.constant dense<0.000000e+00> : vector<8x32xf32>
    %701 = tpu.matmul %700, %7, %cst_148 {dimension_numbers = #tpu.dot_dimension_numbers<[1], [0], [0], [1], [0, 0, 1, 1], [], []>} : vector<8x32xf32>, vector<32x32xf32>, vector<8x32xf32> -> vector<8x32xf32>
    %702 = arith.subf %699, %701 : vector<8x32xf32>
    %703 = arith.negf %702 : vector<8x32xf32>
    %704 = math.exp %703 : vector<8x32xf32>
    %cst_149 = arith.constant 1.000000e+00 : f32
    %705 = vector.broadcast %cst_149 : f32 to vector<8x32xf32>
    %706 = arith.addf %705, %704 : vector<8x32xf32>
    %707 = arith.divf %705, %706 : vector<8x32xf32>
    %708 = arith.subf %691, %697 : vector<8x32xf32>
    %709 = arith.mulf %707, %708 : vector<8x32xf32>
    %710 = arith.addf %697, %709 : vector<8x32xf32>
    %711 = tpu.concatenate %662, %663 in 1 : vector<8x16xf32>, vector<8x16xf32> -> vector<8x32xf32>
    %712 = arith.addf %711, %710 : vector<8x32xf32>
    %cst_150 = arith.constant dense<0.000000e+00> : vector<8xf32>
    %713 = vector.multi_reduction <add>, %712, %cst_150 [1] : vector<8x32xf32> to vector<8xf32>
    %714 = vector.shape_cast %713 : vector<8xf32> to vector<8x1xf32>
    %cst_151 = arith.constant 0.0416666679 : f32
    %715 = vector.broadcast %cst_151 : f32 to vector<8x1xf32>
    %716 = arith.mulf %714, %715 : vector<8x1xf32>
    %717 = arith.mulf %712, %712 : vector<8x32xf32>
    %cst_152 = arith.constant dense<0.000000e+00> : vector<8xf32>
    %718 = vector.multi_reduction <add>, %717, %cst_152 [1] : vector<8x32xf32> to vector<8xf32>
    %719 = vector.shape_cast %718 : vector<8xf32> to vector<8x1xf32>
    %cst_153 = arith.constant 0.0416666679 : f32
    %720 = vector.broadcast %cst_153 : f32 to vector<8x1xf32>
    %721 = arith.mulf %719, %720 : vector<8x1xf32>
    %722 = arith.mulf %716, %716 : vector<8x1xf32>
    %723 = arith.subf %721, %722 : vector<8x1xf32>
    %724 = vector.broadcast %716 : vector<8x1xf32> to vector<8x32xf32>
    %725 = arith.subf %712, %724 : vector<8x32xf32>
    %cst_154 = arith.constant 9.99999974E-6 : f32
    %726 = vector.broadcast %cst_154 : f32 to vector<8x1xf32>
    %727 = arith.addf %723, %726 : vector<8x1xf32>
    %728 = math.rsqrt %727 : vector<8x1xf32>
    %729 = vector.broadcast %728 : vector<8x1xf32> to vector<8x32xf32>
    %730 = arith.mulf %725, %729 : vector<8x32xf32>
    %731 = vector.broadcast %18 : vector<1x32xf32> to vector<8x32xf32>
    %732 = arith.mulf %730, %731 : vector<8x32xf32>
    %733 = vector.broadcast %19 : vector<1x32xf32> to vector<8x32xf32>
    %734 = arith.addf %732, %733 : vector<8x32xf32>
    %cst_155 = arith.constant dense<0.000000e+00> : vector<8x32xf32>
    %735 = tpu.matmul %734, %8, %cst_155 {dimension_numbers = #tpu.dot_dimension_numbers<[1], [0], [0], [1], [0, 0, 1, 1], [], []>} : vector<8x32xf32>, vector<32x32xf32>, vector<8x32xf32> -> vector<8x32xf32>
    %736 = vector.broadcast %20 : vector<1x32xf32> to vector<8x32xf32>
    %737 = arith.addf %735, %736 : vector<8x32xf32>
    %cst_156 = arith.constant 0.000000e+00 : f32
    %738 = vector.broadcast %cst_156 : f32 to vector<8x32xf32>
    %739 = arith.maximumf %737, %738 : vector<8x32xf32>
    %cst_157 = arith.constant dense<0.000000e+00> : vector<8x32xf32>
    %740 = tpu.matmul %739, %8, %cst_157 {dimension_numbers = #tpu.dot_dimension_numbers<[1], [0], [0], [1], [0, 0, 1, 1], [], []>} : vector<8x32xf32>, vector<32x32xf32>, vector<8x32xf32> -> vector<8x32xf32>
    %741 = vector.broadcast %20 : vector<1x32xf32> to vector<8x32xf32>
    %742 = arith.addf %740, %741 : vector<8x32xf32>
    %cst_158 = arith.constant 0.000000e+00 : f32
    %743 = vector.broadcast %cst_158 : f32 to vector<8x32xf32>
    %744 = arith.maximumf %742, %743 : vector<8x32xf32>
    %745 = arith.addf %734, %744 : vector<8x32xf32>
    %cst_159 = arith.constant dense<0.000000e+00> : vector<8xf32>
    %746 = vector.multi_reduction <add>, %745, %cst_159 [1] : vector<8x32xf32> to vector<8xf32>
    %747 = vector.shape_cast %746 : vector<8xf32> to vector<8x1xf32>
    %cst_160 = arith.constant 0.0416666679 : f32
    %748 = vector.broadcast %cst_160 : f32 to vector<8x1xf32>
    %749 = arith.mulf %747, %748 : vector<8x1xf32>
    %750 = arith.mulf %745, %745 : vector<8x32xf32>
    %cst_161 = arith.constant dense<0.000000e+00> : vector<8xf32>
    %751 = vector.multi_reduction <add>, %750, %cst_161 [1] : vector<8x32xf32> to vector<8xf32>
    %752 = vector.shape_cast %751 : vector<8xf32> to vector<8x1xf32>
    %cst_162 = arith.constant 0.0416666679 : f32
    %753 = vector.broadcast %cst_162 : f32 to vector<8x1xf32>
    %754 = arith.mulf %752, %753 : vector<8x1xf32>
    %755 = arith.mulf %749, %749 : vector<8x1xf32>
    %756 = arith.subf %754, %755 : vector<8x1xf32>
    %757 = vector.extract_strided_slice %745 {offsets = [0, 0], sizes = [8, 16], strides = [1, 1]} : vector<8x32xf32> to vector<8x16xf32>
    %758 = vector.broadcast %749 : vector<8x1xf32> to vector<8x16xf32>
    %759 = arith.subf %757, %758 : vector<8x16xf32>
    %cst_163 = arith.constant 9.99999974E-6 : f32
    %760 = vector.broadcast %cst_163 : f32 to vector<8x1xf32>
    %761 = arith.addf %756, %760 : vector<8x1xf32>
    %762 = math.rsqrt %761 : vector<8x1xf32>
    %763 = vector.broadcast %762 : vector<8x1xf32> to vector<8x16xf32>
    %764 = arith.mulf %759, %763 : vector<8x16xf32>
    %765 = vector.broadcast %16 : vector<1x16xf32> to vector<8x16xf32>
    %766 = arith.mulf %764, %765 : vector<8x16xf32>
    %767 = vector.broadcast %17 : vector<1x16xf32> to vector<8x16xf32>
    %768 = arith.addf %766, %767 : vector<8x16xf32>
    %769 = math.tanh %662 : vector<8x16xf32>
    %cst_164 = arith.constant dense<0.000000e+00> : vector<8x32xf32>
    %770 = tpu.matmul %769, %4, %cst_164 {dimension_numbers = #tpu.dot_dimension_numbers<[1], [0], [0], [1], [0, 0, 1, 1], [], []>} : vector<8x16xf32>, vector<16x32xf32>, vector<8x32xf32> -> vector<8x32xf32>
    %771 = vector.extract_strided_slice %31 {offsets = [40, 0], sizes = [8, 32], strides = [1, 1]} : vector<64x32xf32> to vector<8x32xf32>
    %772 = arith.addf %770, %771 : vector<8x32xf32>
    %773 = vector.extract_strided_slice %772 {offsets = [0, 0], sizes = [8, 16], strides = [1, 1]} : vector<8x32xf32> to vector<8x16xf32>
    %774 = arith.negf %773 : vector<8x16xf32>
    %775 = math.exp %774 : vector<8x16xf32>
    %cst_165 = arith.constant 1.000000e+00 : f32
    %776 = vector.broadcast %cst_165 : f32 to vector<8x16xf32>
    %777 = arith.addf %776, %775 : vector<8x16xf32>
    %778 = arith.divf %776, %777 : vector<8x16xf32>
    %779 = vector.extract_strided_slice %772 {offsets = [0, 16], sizes = [8, 16], strides = [1, 1]} : vector<8x32xf32> to vector<8x16xf32>
    %780 = arith.negf %779 : vector<8x16xf32>
    %781 = math.exp %780 : vector<8x16xf32>
    %cst_166 = arith.constant 1.000000e+00 : f32
    %782 = vector.broadcast %cst_166 : f32 to vector<8x16xf32>
    %783 = arith.addf %782, %781 : vector<8x16xf32>
    %784 = arith.divf %782, %783 : vector<8x16xf32>
    %785 = math.tanh %768 : vector<8x16xf32>
    %786 = arith.mulf %778, %785 : vector<8x16xf32>
    %787 = arith.mulf %784, %662 : vector<8x16xf32>
    %788 = arith.addf %786, %787 : vector<8x16xf32>
    %789 = vector.extract_strided_slice %25 {offsets = [48, 0], sizes = [8, 16], strides = [1, 1]} : vector<64x16xf32> to vector<8x16xf32>
    %cst_167 = arith.constant dense<0.000000e+00> : vector<8x96xf32>
    %790 = tpu.matmul %788, %3, %cst_167 {dimension_numbers = #tpu.dot_dimension_numbers<[1], [0], [0], [1], [0, 0, 1, 1], [], []>} : vector<8x16xf32>, vector<16x96xf32>, vector<8x96xf32> -> vector<8x96xf32>
    %791 = vector.extract_strided_slice %28 {offsets = [48, 0], sizes = [8, 96], strides = [1, 1]} : vector<64x96xf32> to vector<8x96xf32>
    %792 = arith.addf %790, %791 : vector<8x96xf32>
    %cst_168 = arith.constant dense<0.000000e+00> : vector<8xf32>
    %793 = vector.multi_reduction <add>, %792, %cst_168 [1] : vector<8x96xf32> to vector<8xf32>
    %794 = vector.shape_cast %793 : vector<8xf32> to vector<8x1xf32>
    %cst_169 = arith.constant 0.013888889 : f32
    %795 = vector.broadcast %cst_169 : f32 to vector<8x1xf32>
    %796 = arith.mulf %794, %795 : vector<8x1xf32>
    %797 = arith.mulf %792, %792 : vector<8x96xf32>
    %cst_170 = arith.constant dense<0.000000e+00> : vector<8xf32>
    %798 = vector.multi_reduction <add>, %797, %cst_170 [1] : vector<8x96xf32> to vector<8xf32>
    %799 = vector.shape_cast %798 : vector<8xf32> to vector<8x1xf32>
    %cst_171 = arith.constant 0.013888889 : f32
    %800 = vector.broadcast %cst_171 : f32 to vector<8x1xf32>
    %801 = arith.mulf %799, %800 : vector<8x1xf32>
    %802 = arith.mulf %796, %796 : vector<8x1xf32>
    %803 = arith.subf %801, %802 : vector<8x1xf32>
    %804 = vector.broadcast %796 : vector<8x1xf32> to vector<8x96xf32>
    %805 = arith.subf %792, %804 : vector<8x96xf32>
    %cst_172 = arith.constant 9.99999974E-6 : f32
    %806 = vector.broadcast %cst_172 : f32 to vector<8x1xf32>
    %807 = arith.addf %803, %806 : vector<8x1xf32>
    %808 = math.rsqrt %807 : vector<8x1xf32>
    %809 = vector.broadcast %808 : vector<8x1xf32> to vector<8x96xf32>
    %810 = arith.mulf %805, %809 : vector<8x96xf32>
    %811 = vector.broadcast %12 : vector<1x96xf32> to vector<8x96xf32>
    %812 = arith.mulf %810, %811 : vector<8x96xf32>
    %813 = vector.broadcast %15 : vector<1x96xf32> to vector<8x96xf32>
    %814 = arith.addf %812, %813 : vector<8x96xf32>
    %815 = vector.extract_strided_slice %814 {offsets = [0, 0], sizes = [8, 32], strides = [1, 1]} : vector<8x96xf32> to vector<8x32xf32>
    %816 = vector.extract_strided_slice %814 {offsets = [0, 32], sizes = [8, 32], strides = [1, 1]} : vector<8x96xf32> to vector<8x32xf32>
    %817 = vector.extract_strided_slice %814 {offsets = [0, 64], sizes = [8, 32], strides = [1, 1]} : vector<8x96xf32> to vector<8x32xf32>
    %818 = vector.extract_strided_slice %816 {offsets = [0, 16], sizes = [8, 16], strides = [1, 1]} : vector<8x32xf32> to vector<8x16xf32>
    %819 = vector.extract_strided_slice %816 {offsets = [0, 0], sizes = [8, 16], strides = [1, 1]} : vector<8x32xf32> to vector<8x16xf32>
    %820 = tpu.concatenate %818, %819 in 1 : vector<8x16xf32>, vector<8x16xf32> -> vector<8x32xf32>
    %821 = vector.extract_strided_slice %817 {offsets = [0, 16], sizes = [8, 16], strides = [1, 1]} : vector<8x32xf32> to vector<8x16xf32>
    %822 = vector.extract_strided_slice %817 {offsets = [0, 0], sizes = [8, 16], strides = [1, 1]} : vector<8x32xf32> to vector<8x16xf32>
    %823 = tpu.concatenate %821, %822 in 1 : vector<8x16xf32>, vector<8x16xf32> -> vector<8x32xf32>
    %824 = arith.mulf %815, %816 : vector<8x32xf32>
    %cst_173 = arith.constant dense<0.000000e+00> : vector<8x32xf32>
    %825 = tpu.matmul %824, %7, %cst_173 {dimension_numbers = #tpu.dot_dimension_numbers<[1], [0], [0], [1], [0, 0, 1, 1], [], []>} : vector<8x32xf32>, vector<32x32xf32>, vector<8x32xf32> -> vector<8x32xf32>
    %826 = arith.mulf %815, %820 : vector<8x32xf32>
    %cst_174 = arith.constant dense<0.000000e+00> : vector<8x32xf32>
    %827 = tpu.matmul %826, %7, %cst_174 {dimension_numbers = #tpu.dot_dimension_numbers<[1], [0], [0], [1], [0, 0, 1, 1], [], []>} : vector<8x32xf32>, vector<32x32xf32>, vector<8x32xf32> -> vector<8x32xf32>
    %828 = arith.subf %825, %827 : vector<8x32xf32>
    %829 = arith.negf %828 : vector<8x32xf32>
    %830 = math.exp %829 : vector<8x32xf32>
    %cst_175 = arith.constant 1.000000e+00 : f32
    %831 = vector.broadcast %cst_175 : f32 to vector<8x32xf32>
    %832 = arith.addf %831, %830 : vector<8x32xf32>
    %833 = arith.divf %831, %832 : vector<8x32xf32>
    %834 = arith.subf %817, %823 : vector<8x32xf32>
    %835 = arith.mulf %833, %834 : vector<8x32xf32>
    %836 = arith.addf %823, %835 : vector<8x32xf32>
    %837 = tpu.concatenate %788, %789 in 1 : vector<8x16xf32>, vector<8x16xf32> -> vector<8x32xf32>
    %838 = arith.addf %837, %836 : vector<8x32xf32>
    %cst_176 = arith.constant dense<0.000000e+00> : vector<8xf32>
    %839 = vector.multi_reduction <add>, %838, %cst_176 [1] : vector<8x32xf32> to vector<8xf32>
    %840 = vector.shape_cast %839 : vector<8xf32> to vector<8x1xf32>
    %cst_177 = arith.constant 0.0416666679 : f32
    %841 = vector.broadcast %cst_177 : f32 to vector<8x1xf32>
    %842 = arith.mulf %840, %841 : vector<8x1xf32>
    %843 = arith.mulf %838, %838 : vector<8x32xf32>
    %cst_178 = arith.constant dense<0.000000e+00> : vector<8xf32>
    %844 = vector.multi_reduction <add>, %843, %cst_178 [1] : vector<8x32xf32> to vector<8xf32>
    %845 = vector.shape_cast %844 : vector<8xf32> to vector<8x1xf32>
    %cst_179 = arith.constant 0.0416666679 : f32
    %846 = vector.broadcast %cst_179 : f32 to vector<8x1xf32>
    %847 = arith.mulf %845, %846 : vector<8x1xf32>
    %848 = arith.mulf %842, %842 : vector<8x1xf32>
    %849 = arith.subf %847, %848 : vector<8x1xf32>
    %850 = vector.broadcast %842 : vector<8x1xf32> to vector<8x32xf32>
    %851 = arith.subf %838, %850 : vector<8x32xf32>
    %cst_180 = arith.constant 9.99999974E-6 : f32
    %852 = vector.broadcast %cst_180 : f32 to vector<8x1xf32>
    %853 = arith.addf %849, %852 : vector<8x1xf32>
    %854 = math.rsqrt %853 : vector<8x1xf32>
    %855 = vector.broadcast %854 : vector<8x1xf32> to vector<8x32xf32>
    %856 = arith.mulf %851, %855 : vector<8x32xf32>
    %857 = vector.broadcast %18 : vector<1x32xf32> to vector<8x32xf32>
    %858 = arith.mulf %856, %857 : vector<8x32xf32>
    %859 = vector.broadcast %19 : vector<1x32xf32> to vector<8x32xf32>
    %860 = arith.addf %858, %859 : vector<8x32xf32>
    %cst_181 = arith.constant dense<0.000000e+00> : vector<8x32xf32>
    %861 = tpu.matmul %860, %8, %cst_181 {dimension_numbers = #tpu.dot_dimension_numbers<[1], [0], [0], [1], [0, 0, 1, 1], [], []>} : vector<8x32xf32>, vector<32x32xf32>, vector<8x32xf32> -> vector<8x32xf32>
    %862 = vector.broadcast %20 : vector<1x32xf32> to vector<8x32xf32>
    %863 = arith.addf %861, %862 : vector<8x32xf32>
    %cst_182 = arith.constant 0.000000e+00 : f32
    %864 = vector.broadcast %cst_182 : f32 to vector<8x32xf32>
    %865 = arith.maximumf %863, %864 : vector<8x32xf32>
    %cst_183 = arith.constant dense<0.000000e+00> : vector<8x32xf32>
    %866 = tpu.matmul %865, %8, %cst_183 {dimension_numbers = #tpu.dot_dimension_numbers<[1], [0], [0], [1], [0, 0, 1, 1], [], []>} : vector<8x32xf32>, vector<32x32xf32>, vector<8x32xf32> -> vector<8x32xf32>
    %867 = vector.broadcast %20 : vector<1x32xf32> to vector<8x32xf32>
    %868 = arith.addf %866, %867 : vector<8x32xf32>
    %cst_184 = arith.constant 0.000000e+00 : f32
    %869 = vector.broadcast %cst_184 : f32 to vector<8x32xf32>
    %870 = arith.maximumf %868, %869 : vector<8x32xf32>
    %871 = arith.addf %860, %870 : vector<8x32xf32>
    %cst_185 = arith.constant dense<0.000000e+00> : vector<8xf32>
    %872 = vector.multi_reduction <add>, %871, %cst_185 [1] : vector<8x32xf32> to vector<8xf32>
    %873 = vector.shape_cast %872 : vector<8xf32> to vector<8x1xf32>
    %cst_186 = arith.constant 0.0416666679 : f32
    %874 = vector.broadcast %cst_186 : f32 to vector<8x1xf32>
    %875 = arith.mulf %873, %874 : vector<8x1xf32>
    %876 = arith.mulf %871, %871 : vector<8x32xf32>
    %cst_187 = arith.constant dense<0.000000e+00> : vector<8xf32>
    %877 = vector.multi_reduction <add>, %876, %cst_187 [1] : vector<8x32xf32> to vector<8xf32>
    %878 = vector.shape_cast %877 : vector<8xf32> to vector<8x1xf32>
    %cst_188 = arith.constant 0.0416666679 : f32
    %879 = vector.broadcast %cst_188 : f32 to vector<8x1xf32>
    %880 = arith.mulf %878, %879 : vector<8x1xf32>
    %881 = arith.mulf %875, %875 : vector<8x1xf32>
    %882 = arith.subf %880, %881 : vector<8x1xf32>
    %883 = vector.extract_strided_slice %871 {offsets = [0, 0], sizes = [8, 16], strides = [1, 1]} : vector<8x32xf32> to vector<8x16xf32>
    %884 = vector.broadcast %875 : vector<8x1xf32> to vector<8x16xf32>
    %885 = arith.subf %883, %884 : vector<8x16xf32>
    %cst_189 = arith.constant 9.99999974E-6 : f32
    %886 = vector.broadcast %cst_189 : f32 to vector<8x1xf32>
    %887 = arith.addf %882, %886 : vector<8x1xf32>
    %888 = math.rsqrt %887 : vector<8x1xf32>
    %889 = vector.broadcast %888 : vector<8x1xf32> to vector<8x16xf32>
    %890 = arith.mulf %885, %889 : vector<8x16xf32>
    %891 = vector.broadcast %16 : vector<1x16xf32> to vector<8x16xf32>
    %892 = arith.mulf %890, %891 : vector<8x16xf32>
    %893 = vector.broadcast %17 : vector<1x16xf32> to vector<8x16xf32>
    %894 = arith.addf %892, %893 : vector<8x16xf32>
    %895 = math.tanh %788 : vector<8x16xf32>
    %cst_190 = arith.constant dense<0.000000e+00> : vector<8x32xf32>
    %896 = tpu.matmul %895, %4, %cst_190 {dimension_numbers = #tpu.dot_dimension_numbers<[1], [0], [0], [1], [0, 0, 1, 1], [], []>} : vector<8x16xf32>, vector<16x32xf32>, vector<8x32xf32> -> vector<8x32xf32>
    %897 = vector.extract_strided_slice %31 {offsets = [48, 0], sizes = [8, 32], strides = [1, 1]} : vector<64x32xf32> to vector<8x32xf32>
    %898 = arith.addf %896, %897 : vector<8x32xf32>
    %899 = vector.extract_strided_slice %898 {offsets = [0, 0], sizes = [8, 16], strides = [1, 1]} : vector<8x32xf32> to vector<8x16xf32>
    %900 = arith.negf %899 : vector<8x16xf32>
    %901 = math.exp %900 : vector<8x16xf32>
    %cst_191 = arith.constant 1.000000e+00 : f32
    %902 = vector.broadcast %cst_191 : f32 to vector<8x16xf32>
    %903 = arith.addf %902, %901 : vector<8x16xf32>
    %904 = arith.divf %902, %903 : vector<8x16xf32>
    %905 = vector.extract_strided_slice %898 {offsets = [0, 16], sizes = [8, 16], strides = [1, 1]} : vector<8x32xf32> to vector<8x16xf32>
    %906 = arith.negf %905 : vector<8x16xf32>
    %907 = math.exp %906 : vector<8x16xf32>
    %cst_192 = arith.constant 1.000000e+00 : f32
    %908 = vector.broadcast %cst_192 : f32 to vector<8x16xf32>
    %909 = arith.addf %908, %907 : vector<8x16xf32>
    %910 = arith.divf %908, %909 : vector<8x16xf32>
    %911 = math.tanh %894 : vector<8x16xf32>
    %912 = arith.mulf %904, %911 : vector<8x16xf32>
    %913 = arith.mulf %910, %788 : vector<8x16xf32>
    %914 = arith.addf %912, %913 : vector<8x16xf32>
    %915 = vector.extract_strided_slice %25 {offsets = [56, 0], sizes = [8, 16], strides = [1, 1]} : vector<64x16xf32> to vector<8x16xf32>
    %cst_193 = arith.constant dense<0.000000e+00> : vector<8x96xf32>
    %916 = tpu.matmul %914, %3, %cst_193 {dimension_numbers = #tpu.dot_dimension_numbers<[1], [0], [0], [1], [0, 0, 1, 1], [], []>} : vector<8x16xf32>, vector<16x96xf32>, vector<8x96xf32> -> vector<8x96xf32>
    %917 = vector.extract_strided_slice %28 {offsets = [56, 0], sizes = [8, 96], strides = [1, 1]} : vector<64x96xf32> to vector<8x96xf32>
    %918 = arith.addf %916, %917 : vector<8x96xf32>
    %cst_194 = arith.constant dense<0.000000e+00> : vector<8xf32>
    %919 = vector.multi_reduction <add>, %918, %cst_194 [1] : vector<8x96xf32> to vector<8xf32>
    %920 = vector.shape_cast %919 : vector<8xf32> to vector<8x1xf32>
    %cst_195 = arith.constant 0.013888889 : f32
    %921 = vector.broadcast %cst_195 : f32 to vector<8x1xf32>
    %922 = arith.mulf %920, %921 : vector<8x1xf32>
    %923 = arith.mulf %918, %918 : vector<8x96xf32>
    %cst_196 = arith.constant dense<0.000000e+00> : vector<8xf32>
    %924 = vector.multi_reduction <add>, %923, %cst_196 [1] : vector<8x96xf32> to vector<8xf32>
    %925 = vector.shape_cast %924 : vector<8xf32> to vector<8x1xf32>
    %cst_197 = arith.constant 0.013888889 : f32
    %926 = vector.broadcast %cst_197 : f32 to vector<8x1xf32>
    %927 = arith.mulf %925, %926 : vector<8x1xf32>
    %928 = arith.mulf %922, %922 : vector<8x1xf32>
    %929 = arith.subf %927, %928 : vector<8x1xf32>
    %930 = vector.broadcast %922 : vector<8x1xf32> to vector<8x96xf32>
    %931 = arith.subf %918, %930 : vector<8x96xf32>
    %cst_198 = arith.constant 9.99999974E-6 : f32
    %932 = vector.broadcast %cst_198 : f32 to vector<8x1xf32>
    %933 = arith.addf %929, %932 : vector<8x1xf32>
    %934 = math.rsqrt %933 : vector<8x1xf32>
    %935 = vector.broadcast %934 : vector<8x1xf32> to vector<8x96xf32>
    %936 = arith.mulf %931, %935 : vector<8x96xf32>
    %937 = vector.broadcast %12 : vector<1x96xf32> to vector<8x96xf32>
    %938 = arith.mulf %936, %937 : vector<8x96xf32>
    %939 = vector.broadcast %15 : vector<1x96xf32> to vector<8x96xf32>
    %940 = arith.addf %938, %939 : vector<8x96xf32>
    %941 = vector.extract_strided_slice %940 {offsets = [0, 0], sizes = [8, 32], strides = [1, 1]} : vector<8x96xf32> to vector<8x32xf32>
    %942 = vector.extract_strided_slice %940 {offsets = [0, 32], sizes = [8, 32], strides = [1, 1]} : vector<8x96xf32> to vector<8x32xf32>
    %943 = vector.extract_strided_slice %940 {offsets = [0, 64], sizes = [8, 32], strides = [1, 1]} : vector<8x96xf32> to vector<8x32xf32>
    %944 = vector.extract_strided_slice %942 {offsets = [0, 16], sizes = [8, 16], strides = [1, 1]} : vector<8x32xf32> to vector<8x16xf32>
    %945 = vector.extract_strided_slice %942 {offsets = [0, 0], sizes = [8, 16], strides = [1, 1]} : vector<8x32xf32> to vector<8x16xf32>
    %946 = tpu.concatenate %944, %945 in 1 : vector<8x16xf32>, vector<8x16xf32> -> vector<8x32xf32>
    %947 = vector.extract_strided_slice %943 {offsets = [0, 16], sizes = [8, 16], strides = [1, 1]} : vector<8x32xf32> to vector<8x16xf32>
    %948 = vector.extract_strided_slice %943 {offsets = [0, 0], sizes = [8, 16], strides = [1, 1]} : vector<8x32xf32> to vector<8x16xf32>
    %949 = tpu.concatenate %947, %948 in 1 : vector<8x16xf32>, vector<8x16xf32> -> vector<8x32xf32>
    %950 = arith.mulf %941, %942 : vector<8x32xf32>
    %cst_199 = arith.constant dense<0.000000e+00> : vector<8x32xf32>
    %951 = tpu.matmul %950, %7, %cst_199 {dimension_numbers = #tpu.dot_dimension_numbers<[1], [0], [0], [1], [0, 0, 1, 1], [], []>} : vector<8x32xf32>, vector<32x32xf32>, vector<8x32xf32> -> vector<8x32xf32>
    %952 = arith.mulf %941, %946 : vector<8x32xf32>
    %cst_200 = arith.constant dense<0.000000e+00> : vector<8x32xf32>
    %953 = tpu.matmul %952, %7, %cst_200 {dimension_numbers = #tpu.dot_dimension_numbers<[1], [0], [0], [1], [0, 0, 1, 1], [], []>} : vector<8x32xf32>, vector<32x32xf32>, vector<8x32xf32> -> vector<8x32xf32>
    %954 = arith.subf %951, %953 : vector<8x32xf32>
    %955 = arith.negf %954 : vector<8x32xf32>
    %956 = math.exp %955 : vector<8x32xf32>
    %cst_201 = arith.constant 1.000000e+00 : f32
    %957 = vector.broadcast %cst_201 : f32 to vector<8x32xf32>
    %958 = arith.addf %957, %956 : vector<8x32xf32>
    %959 = arith.divf %957, %958 : vector<8x32xf32>
    %960 = arith.subf %943, %949 : vector<8x32xf32>
    %961 = arith.mulf %959, %960 : vector<8x32xf32>
    %962 = arith.addf %949, %961 : vector<8x32xf32>
    %963 = tpu.concatenate %914, %915 in 1 : vector<8x16xf32>, vector<8x16xf32> -> vector<8x32xf32>
    %964 = arith.addf %963, %962 : vector<8x32xf32>
    %cst_202 = arith.constant dense<0.000000e+00> : vector<8xf32>
    %965 = vector.multi_reduction <add>, %964, %cst_202 [1] : vector<8x32xf32> to vector<8xf32>
    %966 = vector.shape_cast %965 : vector<8xf32> to vector<8x1xf32>
    %cst_203 = arith.constant 0.0416666679 : f32
    %967 = vector.broadcast %cst_203 : f32 to vector<8x1xf32>
    %968 = arith.mulf %966, %967 : vector<8x1xf32>
    %969 = arith.mulf %964, %964 : vector<8x32xf32>
    %cst_204 = arith.constant dense<0.000000e+00> : vector<8xf32>
    %970 = vector.multi_reduction <add>, %969, %cst_204 [1] : vector<8x32xf32> to vector<8xf32>
    %971 = vector.shape_cast %970 : vector<8xf32> to vector<8x1xf32>
    %cst_205 = arith.constant 0.0416666679 : f32
    %972 = vector.broadcast %cst_205 : f32 to vector<8x1xf32>
    %973 = arith.mulf %971, %972 : vector<8x1xf32>
    %974 = arith.mulf %968, %968 : vector<8x1xf32>
    %975 = arith.subf %973, %974 : vector<8x1xf32>
    %976 = vector.broadcast %968 : vector<8x1xf32> to vector<8x32xf32>
    %977 = arith.subf %964, %976 : vector<8x32xf32>
    %cst_206 = arith.constant 9.99999974E-6 : f32
    %978 = vector.broadcast %cst_206 : f32 to vector<8x1xf32>
    %979 = arith.addf %975, %978 : vector<8x1xf32>
    %980 = math.rsqrt %979 : vector<8x1xf32>
    %981 = vector.broadcast %980 : vector<8x1xf32> to vector<8x32xf32>
    %982 = arith.mulf %977, %981 : vector<8x32xf32>
    %983 = vector.broadcast %18 : vector<1x32xf32> to vector<8x32xf32>
    %984 = arith.mulf %982, %983 : vector<8x32xf32>
    %985 = vector.broadcast %19 : vector<1x32xf32> to vector<8x32xf32>
    %986 = arith.addf %984, %985 : vector<8x32xf32>
    %cst_207 = arith.constant dense<0.000000e+00> : vector<8x32xf32>
    %987 = tpu.matmul %986, %8, %cst_207 {dimension_numbers = #tpu.dot_dimension_numbers<[1], [0], [0], [1], [0, 0, 1, 1], [], []>} : vector<8x32xf32>, vector<32x32xf32>, vector<8x32xf32> -> vector<8x32xf32>
    %988 = vector.broadcast %20 : vector<1x32xf32> to vector<8x32xf32>
    %989 = arith.addf %987, %988 : vector<8x32xf32>
    %cst_208 = arith.constant 0.000000e+00 : f32
    %990 = vector.broadcast %cst_208 : f32 to vector<8x32xf32>
    %991 = arith.maximumf %989, %990 : vector<8x32xf32>
    %cst_209 = arith.constant dense<0.000000e+00> : vector<8x32xf32>
    %992 = tpu.matmul %991, %8, %cst_209 {dimension_numbers = #tpu.dot_dimension_numbers<[1], [0], [0], [1], [0, 0, 1, 1], [], []>} : vector<8x32xf32>, vector<32x32xf32>, vector<8x32xf32> -> vector<8x32xf32>
    %993 = vector.broadcast %20 : vector<1x32xf32> to vector<8x32xf32>
    %994 = arith.addf %992, %993 : vector<8x32xf32>
    %cst_210 = arith.constant 0.000000e+00 : f32
    %995 = vector.broadcast %cst_210 : f32 to vector<8x32xf32>
    %996 = arith.maximumf %994, %995 : vector<8x32xf32>
    %997 = arith.addf %986, %996 : vector<8x32xf32>
    %cst_211 = arith.constant dense<0.000000e+00> : vector<8xf32>
    %998 = vector.multi_reduction <add>, %997, %cst_211 [1] : vector<8x32xf32> to vector<8xf32>
    %999 = vector.shape_cast %998 : vector<8xf32> to vector<8x1xf32>
    %cst_212 = arith.constant 0.0416666679 : f32
    %1000 = vector.broadcast %cst_212 : f32 to vector<8x1xf32>
    %1001 = arith.mulf %999, %1000 : vector<8x1xf32>
    %1002 = arith.mulf %997, %997 : vector<8x32xf32>
    %cst_213 = arith.constant dense<0.000000e+00> : vector<8xf32>
    %1003 = vector.multi_reduction <add>, %1002, %cst_213 [1] : vector<8x32xf32> to vector<8xf32>
    %1004 = vector.shape_cast %1003 : vector<8xf32> to vector<8x1xf32>
    %cst_214 = arith.constant 0.0416666679 : f32
    %1005 = vector.broadcast %cst_214 : f32 to vector<8x1xf32>
    %1006 = arith.mulf %1004, %1005 : vector<8x1xf32>
    %1007 = arith.mulf %1001, %1001 : vector<8x1xf32>
    %1008 = arith.subf %1006, %1007 : vector<8x1xf32>
    %1009 = vector.extract_strided_slice %997 {offsets = [0, 0], sizes = [8, 16], strides = [1, 1]} : vector<8x32xf32> to vector<8x16xf32>
    %1010 = vector.broadcast %1001 : vector<8x1xf32> to vector<8x16xf32>
    %1011 = arith.subf %1009, %1010 : vector<8x16xf32>
    %cst_215 = arith.constant 9.99999974E-6 : f32
    %1012 = vector.broadcast %cst_215 : f32 to vector<8x1xf32>
    %1013 = arith.addf %1008, %1012 : vector<8x1xf32>
    %1014 = math.rsqrt %1013 : vector<8x1xf32>
    %1015 = vector.broadcast %1014 : vector<8x1xf32> to vector<8x16xf32>
    %1016 = arith.mulf %1011, %1015 : vector<8x16xf32>
    %1017 = vector.broadcast %16 : vector<1x16xf32> to vector<8x16xf32>
    %1018 = arith.mulf %1016, %1017 : vector<8x16xf32>
    %1019 = vector.broadcast %17 : vector<1x16xf32> to vector<8x16xf32>
    %1020 = arith.addf %1018, %1019 : vector<8x16xf32>
    %1021 = math.tanh %914 : vector<8x16xf32>
    %cst_216 = arith.constant dense<0.000000e+00> : vector<8x32xf32>
    %1022 = tpu.matmul %1021, %4, %cst_216 {dimension_numbers = #tpu.dot_dimension_numbers<[1], [0], [0], [1], [0, 0, 1, 1], [], []>} : vector<8x16xf32>, vector<16x32xf32>, vector<8x32xf32> -> vector<8x32xf32>
    %1023 = vector.extract_strided_slice %31 {offsets = [56, 0], sizes = [8, 32], strides = [1, 1]} : vector<64x32xf32> to vector<8x32xf32>
    %1024 = arith.addf %1022, %1023 : vector<8x32xf32>
    %1025 = vector.extract_strided_slice %1024 {offsets = [0, 0], sizes = [8, 16], strides = [1, 1]} : vector<8x32xf32> to vector<8x16xf32>
    %1026 = arith.negf %1025 : vector<8x16xf32>
    %1027 = math.exp %1026 : vector<8x16xf32>
    %cst_217 = arith.constant 1.000000e+00 : f32
    %1028 = vector.broadcast %cst_217 : f32 to vector<8x16xf32>
    %1029 = arith.addf %1028, %1027 : vector<8x16xf32>
    %1030 = arith.divf %1028, %1029 : vector<8x16xf32>
    %1031 = vector.extract_strided_slice %1024 {offsets = [0, 16], sizes = [8, 16], strides = [1, 1]} : vector<8x32xf32> to vector<8x16xf32>
    %1032 = arith.negf %1031 : vector<8x16xf32>
    %1033 = math.exp %1032 : vector<8x16xf32>
    %cst_218 = arith.constant 1.000000e+00 : f32
    %1034 = vector.broadcast %cst_218 : f32 to vector<8x16xf32>
    %1035 = arith.addf %1034, %1033 : vector<8x16xf32>
    %1036 = arith.divf %1034, %1035 : vector<8x16xf32>
    %1037 = math.tanh %1020 : vector<8x16xf32>
    %1038 = arith.mulf %1030, %1037 : vector<8x16xf32>
    %1039 = arith.mulf %1036, %914 : vector<8x16xf32>
    %1040 = arith.addf %1038, %1039 : vector<8x16xf32>
    %c0_219 = arith.constant 0 : index
    %c0_220 = arith.constant 0 : index
    %1041 = vector.load %arg6[%c0_219, %c0_220] : memref<8x16xf32, #tpu.memory_space<vmem>>, vector<8x16xf32>
    tpu.vector_store %arg6[%c0_219, %c0_220], %1040 {strides = array<i32>} : memref<8x16xf32, #tpu.memory_space<vmem>>, vector<8x16xf32>,
    %1042 = tpu.concatenate %158, %284, %410, %536, %662, %788, %914, %1040 in 0 : vector<8x16xf32>, vector<8x16xf32>, vector<8x16xf32>, vector<8x16xf32>, vector<8x16xf32>, vector<8x16xf32>, vector<8x16xf32>, vector<8x16xf32> -> vector<64x16xf32>
    %1043 = vector.broadcast %14 : vector<1x16xf32> to vector<64x16xf32>
    %1044 = arith.mulf %1042, %1043 : vector<64x16xf32>
    %cst_221 = arith.constant dense<0.000000e+00> : vector<64xf32>
    %1045 = vector.multi_reduction <add>, %1044, %cst_221 [1] : vector<64x16xf32> to vector<64xf32>
    %1046 = vector.shape_cast %1045 : vector<64xf32> to vector<64x1xf32>
    %1047 = vector.broadcast %21 : vector<1x1xf32> to vector<64x1xf32>
    %1048 = arith.addf %1046, %1047 : vector<64x1xf32>
    %cst_222 = arith.constant 0.000000e+00 : f32
    %1049 = vector.broadcast %cst_222 : f32 to vector<64x111xf32>
    %1050 = tpu.concatenate %1042, %1048, %1049 in 1 : vector<64x16xf32>, vector<64x1xf32>, vector<64x111xf32> -> vector<64x128xf32>
    %c0_223 = arith.constant 0 : index
    %c0_224 = arith.constant 0 : index
    %1051 = vector.load %arg5[%c0_223, %c0_224] : memref<64x128xf32, #tpu.memory_space<vmem>>, vector<64x128xf32>
    tpu.vector_store %arg5[%c0_223, %c0_224], %1050 {strides = array<i32>} : memref<64x128xf32, #tpu.memory_space<vmem>>, vector<64x128xf32>,
    return
  }
}

</mosaic_0001>

<bundles_post_ra>
// kernel: tpu_custom_call.1
= control target key start
LH: loop header
LB: loop body
LE: loop exit
PB: predicated region body
PF: predicated region fallthrough
CT: control target
= control target key end

     0   :  { %12 = vsyncpa [#allocation3], 0  ;;  %s7277_s0 = inlined_call_operand.vmem [shape: f32[64,8], index: 0, kind: input, shape index: {}]   ;;  %s7278_s1 = inlined_call_operand.vmem [shape: f32[8,16], index: 1, kind: input, shape index: {}]   ;;  %s7279_s2 = inlined_call_operand.vmem [shape: f32[16,128], index: 2, kind: input, shape index: {}]   ;;  %s7280_s3 = inlined_call_operand.vmem [shape: f32[48,128], index: 3, kind: input, shape index: {}]   ;;  %s7281_s4 = inlined_call_operand.hbm [shape: f32[8,128], index: 4, kind: input, shape index: {}]   ;;  %s7282_s5 = inlined_call_operand.hbm [shape: f32[64,128], index: 5, kind: output, shape index: {0}]   ;;  %s7283_s6 = inlined_call_operand.hbm [shape: f32[8,16], index: 6, kind: output, shape index: {1}]  }
   0x1   :  { %13 = vsyncpa [#allocation4], 0 }
   0x2   :  { %14 = vsyncpa [#allocation7], 0  ;;  %s6097_s21 = smov [#allocation2]  }
   0x3   :  { %s29_s22 = sshll.u32 %s6097_s21, 4  ;;  %s30_s22 = int_to_ptr.vmem [resolvable:$true] %s29_s22 }
   0x4   :  { %s6039_s23 = scalar_lea.vmem %s30_s22, 128  ;;  %p6044_p1 = scmp.lt.s32.totalorder %s30_s22, %s30_s22 }
   0x5   :  { %p6040_p0 = scmp.ne.s32.totalorder %s30_s22, %s6039_s23  ;;  %p6045_p2 = scmp.lt.s32.totalorder %s6039_s23, %s6039_s23 }
   0x7   :  { %p6046_p3 = por %p6045_p2, %p6044_p1 }
   0x9   :  { %p6047_p4 = pnand %p6046_p3, %p6040_p0 }
   0xb   :  { %6050 = shalt.err (!%p6047_p4)
}
   0xc   :  { %32 = dma.hbm_to_vmem [thread:$0]  %s7281_s4, 128, %s30_s22, [#allocation3]  }
   0xd   :  { %6091 = dma.done.wait [#allocation3], 128  }
   0xe   :  { %6092 = vsyncadd [#allocation3], 4294967168  ;;  %vm65_vm0 = vcmask 64512   ;;  %v6152_v0 = vld [vmem:[%s7280_s3 + $0x10] sm:$0xff]  ;;  %v45_v1 = vld [vmem:[%s7277_s0] sm:$0xff]  ;;  %s6098_s30 = smov 64   ;;  %v53_v2 = vlaneseq }
   0xf   :  { %58 = vrot.lane.b32.xlu0 %v6152_v0, %s6098_s30  ;;  %5353 = vmatprep.mubr.msk.f32.mxu0 %vm65_vm0, %v45_v1  ;;  %v6162_v4 = vld [vmem:[#allocation2] sm:$0xff]  ;;  %s6099_s4 = smov 32   ;;  %v46_v8 = vld [vmem:[%s7277_s0 + $0x8] sm:$0xff]  ;;  %v47_v9 = vld [vmem:[%s7277_s0 + $0x10] sm:$0xff]  ;;  %v6100_v17 = vmov 0.0   ;;  %vm199_vm1 = vcmask 130048  }
  0x10   :  { %v6160_v3 = vshrl.u32 %v53_v2, 7  ;;  %v48_v10 = vld [vmem:[%s7277_s0 + $0x18] sm:$0xff]  ;;  %v49_v11 = vld [vmem:[%s7277_s0 + $0x20] sm:$0xff]  ;;  %v50_v12 = vld [vmem:[%s7277_s0 + $0x28] sm:$0xff]  ;;  %vm6101_vm2 = vmmov 0   ;;  %vm520_vm3 = vcmask 785408  }
  0x11   :  { %v51_v13 = vld [vmem:[%s7277_s0 + $0x30] sm:$0xff]  ;;  %v52_v14 = vld [vmem:[%s7277_s0 + $0x38] sm:$0xff]  ;;  %v39_v15 = vld [vmem:[%s7280_s3 + $0x8] sm:$0xff]  ;;  %s6102_s12 = smov 80   ;;  %s6103_s13 = smov 112   ;;  %vm558_vm4 = vcmask 261120  }
  0x12   :  { %v55_v5 = vsub.s32 1, %v6160_v3  ;;  %5365 = vmatprep.subr.mxu1 %v39_v15  ;;  %v6205_v16 = vld [vmem:[%s7280_s3] sm:$0xff]  ;;  %v6217_v24 = vld [vmem:[%s7279_s2 + $0x8] sm:$0xff]  ;;  %v197_v43 = vsub.s32 0, %v6160_v3  ;;  %s6104_s14 = smov 96   ;;  %s6105_s15 = smov 48  }
  0x13   :  { %5366 = vmatpush3.msra.mxu1 %v39_v15  ;;  %v6228_v26 = vld [vmem:[%s7279_s2] sm:$0xff]  ;;  %v6304_v1 = vld [vmem:[%s7280_s3 + $0x28] sm:$0xff]  ;;  %s6106_s16 = smov 16   ;;  %vm4978_vm5 = vcmask 138240  }
  0x14   :  { %v6166_v6 = vrot.slane %v6162_v4, %v55_v5  ;;  %5367 = vmatprep.subr.mxu1 %v6205_v16  ;;  %v6263_v37 = vld [vmem:[%s7278_s1] sm:$0xff]  ;;  %v6283_v46 = vrot.slane %v6162_v4, %v197_v43  ;;  %v539_v5 = vsub.s32 2, %v6160_v3 }
  0x15   :  { %5368 = vmatpush3.msra.mxu1 %v6205_v16  ;;  %v6309_v2 = vld [vmem:[%s7280_s3 + $0x20] sm:$0xff] }
  0x16   :  { %62 = vrot.lane.b32.xlu0 %v6166_v6, %s6099_s4  ;;  %5397 = vmatprep.subr.mxu1 %v6100_v17 }
  0x1a   :  { %333 = vrot.lane.b32.xlu0 %v39_v15, %s6099_s4 }
  0x81   :  { %v59_v7 = vpop.permute.xlu0 %58 }
  0x82   :  { %5351 = vmatprep.subr.mxu0 %v59_v7 }
  0x83   :  { %5352 = vmatpush3.msra.mxu0 %v59_v7  ;;  %v6325_v7 = vld [vmem:[%s7280_s3 + $0x18] sm:$0xff] }
  0x84   :  { %5354 = vmatmul.mubr.msk.f32.vlgmr.msra.gmra.mxu0 %vm65_vm0, %v46_v8 }
  0x85   :  { %5356 = vmatprep.mubr.msk.f32.mxu0 %vm65_vm0, %v47_v9 }
  0x88   :  { %5357 = vmatmul.mubr.msk.f32.gmra.mxu0 %vm65_vm0, %v48_v10  ;;  %v63_v19 = vpop.permute.xlu0 %62  ;;  %v6335_v10 = vrot.slane %v6162_v4, %v539_v5 }
  0x89   :  { %5359 = vmatprep.mubr.msk.f32.mxu0 %vm65_vm0, %v49_v11 }
  0x8c   :  { %5360 = vmatmul.mubr.msk.f32.gmra.mxu0 %vm65_vm0, %v50_v12  ;;  %v334_v55 = vpop.permute.xlu0 %333 }
  0x8d   :  { %5362 = vmatprep.mubr.msk.f32.mxu0 %vm65_vm0, %v51_v13  ;;  %5381 = vmatprep.subr.mxu0 %v334_v55 }
  0x8e   :  { %5382 = vmatpush3.msra.mxu0 %v334_v55 }
  0x90   :  { %5363 = vmatmul.mubr.msk.f32.gmra.mxu0 %vm65_vm0, %v52_v14 }
 0x144   :  { %v5355_v18 = vpop.f32.mrf.mxu0 }
 0x145   :  { %v6212_v23 = vadd.f32 %v5355_v18, %v63_v19 }
 0x146   :  { %v156_v20 = vpop.f32.mrf.mxu0 }
 0x147   :  { %v6210_v21 = vadd.f32 %v156_v20, %v63_v19 }
 0x148   :  { %v5358_v22 = vpop.f32.mrf.mxu0 }
 0x149   :  { %5369 = vmatprep.mubr.msk.f32.mxu1 %vm199_vm1, %v6210_v21  ;;  %5385 = vmatprep.mubr.msk.f32.mxu0 %vm199_vm1, %v6210_v21  ;;  %v6233_v28 = vadd.f32 %v5358_v22, %v63_v19 }
 0x14a   :  { %v166_v25 = vpop.f32.mrf.mxu0  ;;  %5370 = vmatmul.mubr.msk.f32.vlgmr.msra.gmra.mxu1 %vm199_vm1, %v6212_v23 }
 0x14b   :  { %v6230_v27 = vadd.f32 %v166_v25, %v63_v19  ;;  %5398 = vmatpush3.msra.mxu1 %v6217_v24 }
 0x14c   :  { %v5361_v29 = vpop.f32.mrf.mxu0  ;;  %5399 = vmatprep.subr.mxu1 %v6100_v17 }
 0x14d   :  { %5372 = vmatprep.mubr.msk.f32.mxu1 %vm199_vm1, %v6230_v27  ;;  %5400 = vmatpush3.msra.mxu1 %v6228_v26  ;;  %v6244_v32 = vadd.f32 %v5361_v29, %v63_v19 }
 0x14e   :  { %v176_v30 = vpop.f32.mrf.mxu0  ;;  %5373 = vmatmul.mubr.msk.f32.gmra.mxu1 %vm199_vm1, %v6233_v28  ;;  %5404 = vmatprep.subr.mxu1 %v6100_v17 }
 0x14f   :  { %v6242_v31 = vadd.f32 %v176_v30, %v63_v19 }
 0x150   :  { %v5364_v33 = vpop.f32.mrf.mxu0 }
 0x151   :  { %5375 = vmatprep.mubr.msk.f32.mxu1 %vm199_vm1, %v6242_v31  ;;  %v6252_v36 = vadd.f32 %v5364_v33, %v63_v19 }
 0x152   :  { %v186_v34 = vpop.f32.mrf.mxu0  ;;  %5376 = vmatmul.mubr.msk.f32.gmra.mxu1 %vm199_vm1, %v6244_v32 }
 0x153   :  { %v6250_v35 = vadd.f32 %v186_v34, %v63_v19 }
 0x155   :  { %5378 = vmatprep.mubr.msk.f32.mxu1 %vm199_vm1, %v6250_v35 }
 0x156   :  { %5379 = vmatmul.mubr.msk.f32.gmra.mxu1 %vm199_vm1, %v6252_v36 }
 0x157   :  { %5401 = vmatprep.mubr.msk.f32.mxu1 %vm6101_vm2, %v6100_v17 }
 0x15a   :  { %5402 = vmatmul.mubr.msk.f32.vlgmr.msra.gmra.mxu1 %vm199_vm1, %v6263_v37 }
 0x15b   :  { %5412 = vmatprep.mubr.msk.f32.mxu1 %vm6101_vm2, %v6100_v17  ;;  %5405 = vmatpush3.msra.mxu1 %v6304_v1 }
 0x15c   :  { %5406 = vmatprep.subr.mxu1 %v6100_v17 }
 0x15d   :  { %5407 = vmatpush3.msra.mxu1 %v6309_v2 }
 0x15e   :  { %5408 = vmatprep.subr.mxu1 %v6100_v17 }
 0x15f   :  { %5409 = vmatpush3.msra.mxu1 %v6325_v7 }
 0x160   :  { %5410 = vmatprep.subr.mxu1 %v6100_v17 }
 0x161   :  { %5411 = vmatpush3.msra.mxu1 %v6152_v0 }
 0x162   :  { %5426 = vmatprep.subr.mxu1 %v6100_v17 }
 0x20a   :  { %v6269_v38 = vpop.f32.mrf.mxu1 }
 0x20c   :  { %v290_v39 = vpop.f32.mrf.mxu1 }
 0x20d   :  { %v291_v48 = vadd.f32 %v290_v39, %v6283_v46 }
 0x20e   :  { %v6271_v40 = vpop.f32.mrf.mxu1 }
 0x210   :  { %v6273_v41 = vpop.f32.mrf.mxu1 }
 0x212   :  { %v6275_v42 = vpop.f32.mrf.mxu1 }
 0x214   :  { %v6278_v44 = vpop.f32.mrf.mxu1 }
 0x216   :  { %v6280_v45 = vpop.f32.mrf.mxu1 }
 0x218   :  { %v6285_v47 = vpop.f32.mrf.mxu1 }
 0x21a   :  { %v516_v49 = vpop.f32.mrf.mxu1 }
 0x21b   :  { %v517_v50 = vadd.f32 %v516_v49, %v291_v48 }
 0x21c   :  { %v5403_v51 = vpop.f32.mrf.mxu1 }
 0x21d   :  { %v521_v52 = vsel %vm520_vm3, %v517_v50, 0.0  ;;  %v525_v53 = vmul.f32 %v517_v50, %v517_v50 }
 0x21e   :  { %522 = vadd.xlane.f32.xlu1 %v521_v52 }
 0x21f   :  { %v526_v54 = vsel %vm520_vm3, %v525_v53, 0.0 }
 0x222   :  { %527 = vadd.xlane.f32.xlu1 %v526_v54 }
 0x233   :  { %331 = vrot.lane.b32.xlu1 %v6205_v16, %s6099_s4 }
 0x2a7   :  { %v523_v56 = vpop.xlane.xlu1 %522 }
 0x2a8   :  { %v524_v57 = vmul.f32 0.013888889, %v523_v56 }
 0x2aa   :  { %v530_v59 = vmul.f32 %v524_v57, %v524_v57  ;;  %v532_v8 = vsub.f32 %v517_v50, %v524_v57 }
 0x2ab   :  { %v528_v58 = vpop.xlane.xlu1 %527 }
 0x2ac   :  { %v529_v60 = vmul.f32 0.013888889, %v528_v58 }
 0x2ae   :  { %v531_v61 = vsub.f32 %v529_v60, %v530_v59 }
 0x2af   :  { %v332_v62 = vpop.permute.xlu1 %331 }
 0x2b0   :  { %v533_v63 = vadd.f32 1e-05, %v531_v61  ;;  %5383 = vmatprep.subr.mxu0 %v332_v62 }
 0x2b1   :  { %5384 = vmatpush3.msra.mxu0 %v332_v62 }
 0x2b2   :  { %5875 = vrsqrt.f32 %v533_v63  ;;  %5386 = vmatmul.mubr.msk.f32.vlgmr.msra.gmra.mxu0 %vm199_vm1, %v6212_v23  ;;  %5415 = vmatprep.subr.mxu0 %v6100_v17 }
 0x2b3   :  { %5388 = vmatprep.mubr.msk.f32.mxu0 %vm199_vm1, %v6230_v27  ;;  %5416 = vmatpush3.msra.mxu0 %v6304_v1 }
 0x2b4   :  { %5417 = vmatprep.subr.mxu0 %v6100_v17 }
 0x2b5   :  { %5418 = vmatpush3.msra.mxu0 %v6309_v2 }
 0x2b6   :  { %5389 = vmatmul.mubr.msk.f32.gmra.mxu0 %vm199_vm1, %v6233_v28  ;;  %5419 = vmatprep.subr.mxu0 %v6100_v17 }
 0x2b7   :  { %5391 = vmatprep.mubr.msk.f32.mxu0 %vm199_vm1, %v6242_v31  ;;  %5420 = vmatpush3.msra.mxu0 %v6325_v7 }
 0x2b8   :  { %5421 = vmatprep.subr.mxu0 %v6100_v17 }
 0x2b9   :  { %5422 = vmatpush3.msra.mxu0 %v6152_v0 }
 0x2ba   :  { %5392 = vmatmul.mubr.msk.f32.gmra.mxu0 %vm199_vm1, %v6244_v32  ;;  %5437 = vmatprep.subr.mxu0 %v6100_v17 }
 0x2bb   :  { %5394 = vmatprep.mubr.msk.f32.mxu0 %vm199_vm1, %v6250_v35 }
 0x2be   :  { %5395 = vmatmul.mubr.msk.f32.gmra.mxu0 %vm199_vm1, %v6252_v36 }
 0x2bf   :  { %v5876_v9 = vpop.eup %5875  ;;  %5423 = vmatprep.mubr.msk.f32.mxu0 %vm6101_vm2, %v6100_v17 }
 0x2c0   :  { %v535_v11 = vmul.f32 %v5876_v9, %v532_v8 }
 0x2c2   :  { %v536_v12 = vmul.f32 %v535_v11, %v6166_v6 }
 0x2c4   :  { %v541_v13 = vadd.f32 %v6335_v10, %v536_v12 }
 0x2c6   :  { %543 = vrot.lane.b32.xlu0 %v541_v13, %s6102_s12 }
 0x2ca   :  { %546 = vrot.lane.b32.xlu0 %v541_v13, %s6103_s13 }
 0x2ce   :  { %554 = vrot.lane.b32.xlu0 %v541_v13, %s6104_s14 }
 0x2d2   :  { %550 = vrot.lane.b32.xlu0 %v541_v13, %s6105_s15 }
 0x338   :  { %v544_v14 = vpop.permute.xlu0 %543 }
 0x33c   :  { %v547_v15 = vpop.permute.xlu0 %546 }
 0x33d   :  { %v549_v16 = vsel %vm199_vm1, %v544_v14, %v547_v15 }
 0x33e   :  { %v632_v18 = vmul.f32 %v549_v16, %v541_v13 }
 0x340   :  { %v555_v19 = vpop.permute.xlu0 %554  ;;  %5424 = vmatmul.mubr.msk.f32.vlgmr.msra.gmra.mxu0 %vm558_vm4, %v632_v18 }
 0x341   :  { %v557_v20 = vmul.f32 %v555_v19, %v541_v13  ;;  %5445 = vmatprep.mubr.msk.f32.mxu0 %vm6101_vm2, %v6100_v17 }
 0x343   :  { %5413 = vmatmul.mubr.msk.f32.vlgmr.msra.gmra.mxu1 %vm558_vm4, %v557_v20 }
 0x344   :  { %v551_v22 = vpop.permute.xlu0 %550  ;;  %5434 = vmatprep.mubr.msk.f32.mxu1 %vm6101_vm2, %v6100_v17 }
 0x345   :  { %v553_v25 = vsel %vm199_vm1, %v551_v22, %v544_v14 }
 0x346   :  { %714 = vrot.lane.b32.xlu1 %v553_v25, %s6098_s30 }
 0x34a   :  { %724 = vrot.lane.b32.xlu1 %v6210_v21, %s6106_s16 }
 0x34e   :  { %761 = vrot.lane.b32.xlu1 %v6309_v2, %s6104_s14 }
 0x372   :  { %v6364_v33 = vpop.f32.mrf.mxu0 }
 0x374   :  { %v6366_v34 = vpop.f32.mrf.mxu0 }
 0x376   :  { %v6368_v39 = vpop.f32.mrf.mxu0 }
 0x378   :  { %v6370_v43 = vpop.f32.mrf.mxu0 }
 0x37a   :  { %v6372_v48 = vpop.f32.mrf.mxu0 }
 0x37c   :  { %v6374_v49 = vpop.f32.mrf.mxu0 }
 0x37e   :  { %v6376_v21 = vpop.f32.mrf.mxu0 }
 0x380   :  { %v6378_v50 = vpop.f32.mrf.mxu0 }
 0x3b8   :  { %v715_v29 = vpop.permute.xlu1 %714 }
 0x3b9   :  { %v717_v30 = vsub.f32 %v541_v13, %v715_v29  ;;  %v746_v13 = vsub.s32 3, %v6160_v3 }
 0x3bb   :  { %719 = vrot.lane.b32.xlu0 %v717_v30, %s6098_s30  ;;  %v6386_v14 = vrot.slane %v6162_v4, %v746_v13 }
 0x3bc   :  { %v725_v61 = vpop.permute.xlu1 %724 }
 0x3bd   :  { %v727_v5 = vsel %vm199_vm1, %v6263_v37, %v725_v61 }
 0x3c0   :  { %v6406_v3 = vpop.permute.xlu1 %761 }
 0x400   :  { %v702_v51 = vpop.f32.mrf.mxu0 }
 0x402   :  { %v5425_v52 = vpop.f32.mrf.mxu0 }
 0x403   :  { %v628_v53 = vpop.f32.mrf.mxu1 }
 0x404   :  { %v706_v54 = vsub.f32 %v628_v53, %v702_v51 }
 0x405   :  { %v5414_v55 = vpop.f32.mrf.mxu1 }
 0x406   :  { %v5053_v56 = vmul.f32 -1.442695, %v706_v54 }
 0x408   :  { %5877 = vpow2.f32 %v5053_v56 }
 0x415   :  { %v5878_v57 = vpop.eup %5877 }
 0x416   :  { %v710_v58 = vadd.f32 1.0, %v5878_v57 }
 0x418   :  { %5879 = vrcp.f32 %v710_v58 }
 0x425   :  { %v5880_v59 = vpop.eup %5879 }
 0x42d   :  { %v720_v60 = vpop.permute.xlu0 %719 }
 0x42e   :  { %v722_v62 = vmul.f32 %v5880_v59, %v720_v60 }
 0x430   :  { %v723_v63 = vadd.f32 %v722_v62, %v553_v25 }
 0x432   :  { %v728_v8 = vadd.f32 %v727_v5, %v723_v63 }
 0x434   :  { %v729_v9 = vsel %vm558_vm4, %v728_v8, 0.0  ;;  %v733_v11 = vmul.f32 %v728_v8, %v728_v8 }
 0x435   :  { %730 = vadd.xlane.f32.xlu0 %v729_v9 }
 0x436   :  { %v734_v12 = vsel %vm558_vm4, %v733_v11, 0.0 }
 0x437   :  { %735 = vadd.xlane.f32.xlu1 %v734_v12 }
 0x448   :  { %750 = vrot.lane.b32.xlu1 %v6386_v14, %s6104_s14 }
 0x44b   :  { %763 = vrot.lane.b32.xlu0 %v6304_v1, %s6104_s14 }
 0x44c   :  { %769 = vrot.lane.b32.xlu1 %v6386_v14, %s6098_s30 }
 0x44f   :  { %759 = vrot.lane.b32.xlu0 %v6325_v7, %s6104_s14 }
 0x450   :  { %948 = vrot.lane.b32.xlu1 %v6228_v26, %s6099_s4 }
 0x453   :  { %757 = vrot.lane.b32.xlu0 %v6152_v0, %s6104_s14 }
 0x454   :  { %1035 = vrot.lane.b32.xlu1 %v6263_v37, %s6106_s16 }
 0x457   :  { %950 = vrot.lane.b32.xlu0 %v6217_v24, %s6099_s4 }
 0x45b   :  { %338 = vrot.lane.b32.xlu0 %v6283_v46, %s6099_s4 }
 0x4be   :  { %v731_v4 = vpop.xlane.xlu0 %730 }
 0x4bf   :  { %v732_v15 = vmul.f32 0.041666668, %v731_v4 }
 0x4c0   :  { %v736_v16 = vpop.xlane.xlu1 %735 }
 0x4c1   :  { %v738_v18 = vmul.f32 %v732_v15, %v732_v15  ;;  %v737_v19 = vmul.f32 0.041666668, %v736_v16  ;;  %v740_v52 = vsub.f32 %v728_v8, %v732_v15 }
 0x4c2   :  { %v6408_v20 = vpop.permute.xlu0 %763 }
 0x4c3   :  { %v739_v22 = vsub.f32 %v737_v19, %v738_v18  ;;  %5427 = vmatpush3.msra.mxu1 %v6408_v20  ;;  %5438 = vmatpush3.msra.mxu0 %v6408_v20 }
 0x4c4   :  { %5428 = vmatprep.subr.mxu1 %v6100_v17  ;;  %5439 = vmatprep.subr.mxu0 %v6100_v17  ;;  %v6431_v51 = vpop.permute.xlu1 %750 }
 0x4c5   :  { %v741_v25 = vadd.f32 1e-05, %v739_v22  ;;  %5429 = vmatpush3.msra.mxu1 %v6406_v3  ;;  %5440 = vmatpush3.msra.mxu0 %v6406_v3 }
 0x4c6   :  { %v6416_v29 = vpop.permute.xlu0 %759  ;;  %5430 = vmatprep.subr.mxu1 %v6100_v17  ;;  %5441 = vmatprep.subr.mxu0 %v6100_v17 }
 0x4c7   :  { %5881 = vrsqrt.f32 %v741_v25  ;;  %5431 = vmatpush3.msra.mxu1 %v6416_v29  ;;  %5442 = vmatpush3.msra.mxu0 %v6416_v29 }
 0x4c8   :  { %5432 = vmatprep.subr.mxu1 %v6100_v17  ;;  %5443 = vmatprep.subr.mxu0 %v6100_v17  ;;  %5883 = vtanh.f32 %v6263_v37  ;;  %v6433_v54 = vpop.permute.xlu1 %769 }
 0x4ca   :  { %v6424_v30 = vpop.permute.xlu0 %757 }
 0x4cb   :  { %5433 = vmatpush3.msra.mxu1 %v6424_v30  ;;  %5444 = vmatpush3.msra.mxu0 %v6424_v30 }
 0x4cc   :  { %5448 = vmatprep.subr.mxu1 %v6100_v17  ;;  %5462 = vmatprep.subr.mxu0 %v6100_v17  ;;  %v6440_v59 = vpop.permute.xlu1 %948 }
 0x4ce   :  { %v6437_v58 = vpop.permute.xlu0 %950 }
 0x4d2   :  { %v6467_v9 = vpop.permute.xlu0 %338 }
 0x4d3   :  { %v408_v11 = vadd.f32 %v6366_v34, %v6467_v9 }
 0x4d4   :  { %v5882_v53 = vpop.eup %5881 }
 0x4d5   :  { %v743_v55 = vmul.f32 %v5882_v53, %v740_v52  ;;  %v5884_v60 = vpop.eup %5883 }
 0x4d7   :  { %v748_v56 = vmul.f32 %v6386_v14, %v743_v55 }
 0x4d9   :  { %v753_v57 = vadd.f32 %v6431_v51, %v748_v56  ;;  %v1036_v56 = vpop.permute.xlu1 %1035 }
 0x4db   :  { %5435 = vmatmul.mubr.msk.f32.vlgmr.msra.gmra.mxu1 %vm558_vm4, %v753_v57 }
 0x4dc   :  { %5449 = vmatpush3.msra.mxu1 %v6437_v58  ;;  %5452 = vmatprep.mubr.msk.f32.mxu1 %vm6101_vm2, %v6100_v17 }
 0x4dd   :  { %5450 = vmatprep.subr.mxu1 %v6100_v17 }
 0x4de   :  { %5451 = vmatpush3.msra.mxu1 %v6440_v59 }
 0x4df   :  { %5453 = vmatmul.mubr.msk.f32.vlgmr.msra.gmra.mxu1 %vm199_vm1, %v5884_v60  ;;  %5455 = vmatprep.subr.mxu1 %v6100_v17 }
 0x4e0   :  { %5456 = vmatpush3.msra.mxu1 %v6217_v24  ;;  %5459 = vmatprep.mubr.msk.f32.mxu1 %vm6101_vm2, %v6100_v17 }
 0x4e1   :  { %5457 = vmatprep.subr.mxu1 %v6100_v17 }
 0x4e2   :  { %5458 = vmatpush3.msra.mxu1 %v6228_v26 }
 0x4e3   :  { %5473 = vmatprep.subr.mxu1 %v6100_v17 }
 0x59b   :  { %v841_v37 = vpop.f32.mrf.mxu1 }
 0x59c   :  { %v842_v61 = vadd.f32 %v841_v37, %v6433_v54 }
 0x59d   :  { %v5436_v62 = vpop.f32.mrf.mxu1 }
 0x59e   :  { %v845_v63 = vmax.f32 %v842_v61, 0.0 }
 0x59f   :  { %v1023_v5 = vpop.f32.mrf.mxu1 }
 0x5a0   :  { %5446 = vmatmul.mubr.msk.f32.vlgmr.msra.gmra.mxu0 %vm558_vm4, %v845_v63  ;;  %v1024_v12 = vadd.f32 %v1023_v5, %v408_v11 }
 0x5a1   :  { %v5454_v8 = vpop.f32.mrf.mxu1  ;;  %5463 = vmatpush3.msra.mxu0 %v6304_v1  ;;  %5470 = vmatprep.mubr.msk.f32.mxu0 %vm6101_vm2, %v6100_v17 }
 0x5a2   :  { %5464 = vmatprep.subr.mxu0 %v6100_v17  ;;  %v5057_v13 = vmul.f32 -1.442695, %v1024_v12 }
 0x5a3   :  { %5465 = vmatpush3.msra.mxu0 %v6309_v2 }
 0x5a4   :  { %5466 = vmatprep.subr.mxu0 %v6100_v17  ;;  %5885 = vpow2.f32 %v5057_v13 }
 0x5a5   :  { %5467 = vmatpush3.msra.mxu0 %v6325_v7 }
 0x5a6   :  { %5468 = vmatprep.subr.mxu0 %v6100_v17 }
 0x5a7   :  { %5469 = vmatpush3.msra.mxu0 %v6152_v0 }
 0x5a8   :  { %5484 = vmatprep.subr.mxu0 %v6100_v17 }
 0x5b1   :  { %v5886_v52 = vpop.eup %5885 }
 0x5b2   :  { %v1030_v55 = vadd.f32 1.0, %v5886_v52 }
 0x5b4   :  { %5887 = vrcp.f32 %v1030_v55 }
 0x5c1   :  { %v5888_v34 = vpop.eup %5887 }
 0x5c2   :  { %v1038_v60 = vmul.f32 %v5888_v34, %v1036_v56 }
 0x660   :  { %v915_v4 = vpop.f32.mrf.mxu0 }
 0x661   :  { %v916_v15 = vadd.f32 %v915_v4, %v6433_v54 }
 0x662   :  { %v5447_v16 = vpop.f32.mrf.mxu0 }
 0x663   :  { %v919_v18 = vmax.f32 %v916_v15, 0.0 }
 0x665   :  { %v920_v19 = vadd.f32 %v919_v18, %v753_v57 }
 0x667   :  { %v921_v22 = vsel %vm558_vm4, %v920_v19, 0.0  ;;  %v925_v25 = vmul.f32 %v920_v19, %v920_v19 }
 0x668   :  { %922 = vadd.xlane.f32.xlu0 %v921_v22 }
 0x669   :  { %v926_v53 = vsel %vm558_vm4, %v925_v25, 0.0 }
 0x66a   :  { %927 = vadd.xlane.f32.xlu1 %v926_v53 }
 0x67b   :  { %941 = vrot.lane.b32.xlu1 %v6335_v10, %s6106_s16 }
 0x67e   :  { %937 = vrot.lane.b32.xlu0 %v6335_v10, %s6099_s4 }
 0x682   :  { %1040 = vrot.lane.b32.xlu0 %v1038_v60, %s6103_s13 }
 0x6f1   :  { %v923_v57 = vpop.xlane.xlu0 %922 }
 0x6f2   :  { %v924_v37 = vmul.f32 0.041666668, %v923_v57 }
 0x6f3   :  { %v928_v61 = vpop.xlane.xlu1 %927 }
 0x6f4   :  { %v930_v62 = vmul.f32 %v924_v37, %v924_v37  ;;  %v929_v63 = vmul.f32 0.041666668, %v928_v61  ;;  %v932_v11 = vsub.f32 %v920_v19, %v924_v37  ;;  %v296_v19 = vadd.f32 %v6269_v38, %v6283_v46 }
 0x6f5   :  { %v6479_v4 = vpop.permute.xlu0 %937 }
 0x6f6   :  { %v931_v5 = vsub.f32 %v929_v63, %v930_v62 }
 0x6f7   :  { %v6481_v15 = vpop.permute.xlu1 %941 }
 0x6f8   :  { %v933_v8 = vadd.f32 1e-05, %v931_v5 }
 0x6f9   :  { %v1041_v52 = vpop.permute.xlu0 %1040 }
 0x6fa   :  { %5889 = vrsqrt.f32 %v933_v8 }
 0x707   :  { %v5890_v12 = vpop.eup %5889 }
 0x708   :  { %v935_v13 = vmul.f32 %v5890_v12, %v932_v11 }
 0x70a   :  { %v940_v16 = vmul.f32 %v6479_v4, %v935_v13 }
 0x70c   :  { %v944_v18 = vadd.f32 %v6481_v15, %v940_v16 }
 0x70e   :  { %5891 = vtanh.f32 %v944_v18 }
 0x71b   :  { %v5892_v22 = vpop.eup %5891 }
 0x71c   :  { %v1034_v25 = vmul.f32 %v5892_v22, %v5888_v34 }
 0x71e   :  { %v6485_v53 = vadd.f32 %v1041_v52, %v1034_v25 }
 0x720   :  { %5460 = vmatmul.mubr.msk.f32.vlgmr.msra.gmra.mxu1 %vm199_vm1, %v6485_v53 }
 0x721   :  { %5474 = vmatpush3.msra.mxu1 %v6304_v1  ;;  %5481 = vmatprep.mubr.msk.f32.mxu1 %vm6101_vm2, %v6100_v17 }
 0x722   :  { %5475 = vmatprep.subr.mxu1 %v6100_v17 }
 0x723   :  { %5476 = vmatpush3.msra.mxu1 %v6309_v2 }
 0x724   :  { %5477 = vmatprep.subr.mxu1 %v6100_v17 }
 0x725   :  { %5478 = vmatpush3.msra.mxu1 %v6325_v7 }
 0x726   :  { %5479 = vmatprep.subr.mxu1 %v6100_v17 }
 0x727   :  { %5480 = vmatpush3.msra.mxu1 %v6152_v0 }
 0x728   :  { %5495 = vmatprep.subr.mxu1 %v6100_v17 }
 0x7e0   :  { %v1113_v55 = vpop.f32.mrf.mxu1 }
 0x7e1   :  { %v1114_v34 = vadd.f32 %v1113_v55, %v296_v19 }
 0x7e2   :  { %v5461_v56 = vpop.f32.mrf.mxu1 }
 0x7e3   :  { %v1117_v60 = vsel %vm520_vm3, %v1114_v34, 0.0  ;;  %v1121_v57 = vmul.f32 %v1114_v34, %v1114_v34 }
 0x7e4   :  { %1118 = vadd.xlane.f32.xlu1 %v1117_v60 }
 0x7e5   :  { %v1122_v37 = vsel %vm520_vm3, %v1121_v57, 0.0 }
 0x7e6   :  { %1123 = vadd.xlane.f32.xlu0 %v1122_v37 }
 0x86d   :  { %v1119_v61 = vpop.xlane.xlu1 %1118 }
 0x86e   :  { %v1120_v62 = vmul.f32 0.013888889, %v1119_v61 }
 0x86f   :  { %v1124_v63 = vpop.xlane.xlu0 %1123 }
 0x870   :  { %v1126_v5 = vmul.f32 %v1120_v62, %v1120_v62  ;;  %v1125_v8 = vmul.f32 0.013888889, %v1124_v63  ;;  %v1128_v13 = vsub.f32 %v1114_v34, %v1120_v62 }
 0x872   :  { %v1127_v11 = vsub.f32 %v1125_v8, %v1126_v5 }
 0x874   :  { %v1129_v12 = vadd.f32 1e-05, %v1127_v11 }
 0x876   :  { %5893 = vrsqrt.f32 %v1129_v12 }
 0x883   :  { %v5894_v38 = vpop.eup %5893 }
 0x884   :  { %v1131_v16 = vmul.f32 %v5894_v38, %v1128_v13 }
 0x886   :  { %v1132_v18 = vmul.f32 %v1131_v16, %v6166_v6 }
 0x888   :  { %v1133_v22 = vadd.f32 %v1132_v18, %v6335_v10 }
 0x88a   :  { %1138 = vrot.lane.b32.xlu1 %v1133_v22, %s6103_s13  ;;  %1135 = vrot.lane.b32.xlu0 %v1133_v22, %s6102_s12 }
 0x88e   :  { %1146 = vrot.lane.b32.xlu1 %v1133_v22, %s6104_s14  ;;  %1142 = vrot.lane.b32.xlu0 %v1133_v22, %s6105_s15 }
 0x8fc   :  { %v1139_v25 = vpop.permute.xlu1 %1138  ;;  %v1136_v52 = vpop.permute.xlu0 %1135 }
 0x8fd   :  { %v1141_v19 = vsel %vm199_vm1, %v1136_v52, %v1139_v25 }
 0x8fe   :  { %v1223_v55 = vmul.f32 %v1141_v19, %v1133_v22 }
 0x900   :  { %v1147_v34 = vpop.permute.xlu1 %1146  ;;  %5482 = vmatmul.mubr.msk.f32.vlgmr.msra.gmra.mxu1 %vm558_vm4, %v1223_v55  ;;  %v1143_v56 = vpop.permute.xlu0 %1142 }
 0x901   :  { %v1149_v60 = vmul.f32 %v1147_v34, %v1133_v22  ;;  %5496 = vmatpush3.msra.mxu1 %v6408_v20  ;;  %v1145_v57 = vsel %vm199_vm1, %v1143_v56, %v1136_v52  ;;  %5503 = vmatprep.mubr.msk.f32.mxu1 %vm6101_vm2, %v6100_v17 }
 0x902   :  { %5497 = vmatprep.subr.mxu1 %v6100_v17  ;;  %1305 = vrot.lane.b32.xlu1 %v1145_v57, %s6098_s30 }
 0x903   :  { %5498 = vmatpush3.msra.mxu1 %v6406_v3  ;;  %5471 = vmatmul.mubr.msk.f32.vlgmr.msra.gmra.mxu0 %vm558_vm4, %v1149_v60 }
 0x904   :  { %5485 = vmatpush3.msra.mxu0 %v6408_v20  ;;  %5499 = vmatprep.subr.mxu1 %v6100_v17 }
 0x905   :  { %5486 = vmatprep.subr.mxu0 %v6100_v17  ;;  %5500 = vmatpush3.msra.mxu1 %v6416_v29 }
 0x906   :  { %5487 = vmatpush3.msra.mxu0 %v6406_v3  ;;  %5501 = vmatprep.subr.mxu1 %v6100_v17 }
 0x907   :  { %5488 = vmatprep.subr.mxu0 %v6100_v17  ;;  %5502 = vmatpush3.msra.mxu1 %v6424_v30 }
 0x908   :  { %1315 = vrot.lane.b32.xlu1 %v6212_v23, %s6106_s16  ;;  %5489 = vmatpush3.msra.mxu0 %v6416_v29 }
 0x909   :  { %5490 = vmatprep.subr.mxu0 %v6100_v17  ;;  %5492 = vmatprep.mubr.msk.f32.mxu0 %vm6101_vm2, %v6100_v17 }
 0x90a   :  { %5491 = vmatpush3.msra.mxu0 %v6424_v30  ;;  %5513 = vmatprep.subr.mxu1 %v6100_v17 }
 0x90b   :  { %5506 = vmatprep.subr.mxu0 %v6100_v17 }
 0x974   :  { %v1306_v37 = vpop.permute.xlu1 %1305 }
 0x975   :  { %v1308_v61 = vsub.f32 %v1133_v22, %v1306_v37 }
 0x977   :  { %1310 = vrot.lane.b32.xlu0 %v1308_v61, %s6098_s30 }
 0x97a   :  { %v1316_v18 = vpop.permute.xlu1 %1315 }
 0x97b   :  { %v1318_v22 = vsel %vm199_vm1, %v6485_v53, %v1316_v18 }
 0x9c0   :  { %v1293_v62 = vpop.f32.mrf.mxu1 }
 0x9c2   :  { %v5483_v63 = vpop.f32.mrf.mxu1 }
 0x9c3   :  { %v1219_v23 = vpop.f32.mrf.mxu0 }
 0x9c4   :  { %v1297_v5 = vsub.f32 %v1219_v23, %v1293_v62 }
 0x9c5   :  { %v5472_v8 = vpop.f32.mrf.mxu0 }
 0x9c6   :  { %v5061_v11 = vmul.f32 -1.442695, %v1297_v5 }
 0x9c8   :  { %5895 = vpow2.f32 %v5061_v11 }
 0x9d5   :  { %v5896_v12 = vpop.eup %5895 }
 0x9d6   :  { %v1301_v13 = vadd.f32 1.0, %v5896_v12 }
 0x9d8   :  { %5897 = vrcp.f32 %v1301_v13 }
 0x9e5   :  { %v5898_v38 = vpop.eup %5897 }
 0x9e9   :  { %v1311_v16 = vpop.permute.xlu0 %1310 }
 0x9ea   :  { %v1313_v25 = vmul.f32 %v5898_v38, %v1311_v16 }
 0x9ec   :  { %v1314_v52 = vadd.f32 %v1313_v25, %v1145_v57 }
 0x9ee   :  { %v1319_v19 = vadd.f32 %v1318_v22, %v1314_v52 }
 0x9f0   :  { %v1320_v55 = vsel %vm558_vm4, %v1319_v19, 0.0  ;;  %v1324_v34 = vmul.f32 %v1319_v19, %v1319_v19 }
 0x9f1   :  { %1321 = vadd.xlane.f32.xlu0 %v1320_v55  ;;  %v413_v55 = vadd.f32 %v6364_v33, %v6467_v9 }
 0x9f2   :  { %v1325_v56 = vsel %vm558_vm4, %v1324_v34, 0.0 }
 0x9f3   :  { %1326 = vadd.xlane.f32.xlu1 %v1325_v56 }
 0xa07   :  { %1585 = vrot.lane.b32.xlu0 %v6485_v53, %s6106_s16 }
 0xa7a   :  { %v1322_v60 = vpop.xlane.xlu0 %1321 }
 0xa7b   :  { %v1323_v37 = vmul.f32 0.041666668, %v1322_v60 }
 0xa7c   :  { %v1327_v61 = vpop.xlane.xlu1 %1326 }
 0xa7d   :  { %v1329_v62 = vmul.f32 %v1323_v37, %v1323_v37  ;;  %v1328_v63 = vmul.f32 0.041666668, %v1327_v61  ;;  %v1331_v5 = vsub.f32 %v1319_v19, %v1323_v37 }
 0xa7f   :  { %v1330_v57 = vsub.f32 %v1328_v63, %v1329_v62 }
 0xa81   :  { %v1332_v23 = vadd.f32 1e-05, %v1330_v57 }
 0xa83   :  { %5899 = vrsqrt.f32 %v1332_v23 }
 0xa84   :  { %5901 = vtanh.f32 %v6485_v53 }
 0xa90   :  { %v5900_v8 = vpop.eup %5899 }
 0xa91   :  { %v1334_v11 = vmul.f32 %v5900_v8, %v1331_v5  ;;  %v5902_v38 = vpop.eup %5901  ;;  %v1586_v8 = vpop.permute.xlu0 %1585 }
 0xa93   :  { %v1335_v12 = vmul.f32 %v1334_v11, %v6386_v14 }
 0xa95   :  { %v1336_v13 = vadd.f32 %v1335_v12, %v6431_v51 }
 0xa97   :  { %5493 = vmatmul.mubr.msk.f32.vlgmr.msra.gmra.mxu0 %vm558_vm4, %v1336_v13 }
 0xa98   :  { %5507 = vmatpush3.msra.mxu0 %v6437_v58  ;;  %5510 = vmatprep.mubr.msk.f32.mxu0 %vm6101_vm2, %v6100_v17 }
 0xa99   :  { %5508 = vmatprep.subr.mxu0 %v6100_v17 }
 0xa9a   :  { %5509 = vmatpush3.msra.mxu0 %v6440_v59 }
 0xa9b   :  { %5511 = vmatmul.mubr.msk.f32.vlgmr.msra.gmra.mxu0 %vm199_vm1, %v5902_v38  ;;  %5520 = vmatprep.subr.mxu0 %v6100_v17 }
 0xa9c   :  { %5521 = vmatpush3.msra.mxu0 %v6304_v1  ;;  %5528 = vmatprep.mubr.msk.f32.mxu0 %vm6101_vm2, %v6100_v17 }
 0xa9d   :  { %5522 = vmatprep.subr.mxu0 %v6100_v17 }
 0xa9e   :  { %5523 = vmatpush3.msra.mxu0 %v6309_v2 }
 0xa9f   :  { %5524 = vmatprep.subr.mxu0 %v6100_v17 }
 0xaa0   :  { %5525 = vmatpush3.msra.mxu0 %v6325_v7 }
 0xaa1   :  { %5526 = vmatprep.subr.mxu0 %v6100_v17 }
 0xaa2   :  { %5527 = vmatpush3.msra.mxu0 %v6152_v0 }
 0xaa3   :  { %5542 = vmatprep.subr.mxu0 %v6100_v17 }
 0xb57   :  { %v1406_v16 = vpop.f32.mrf.mxu0 }
 0xb58   :  { %v1407_v18 = vadd.f32 %v1406_v16, %v6433_v54 }
 0xb59   :  { %v5494_v25 = vpop.f32.mrf.mxu0 }
 0xb5a   :  { %v1410_v52 = vmax.f32 %v1407_v18, 0.0 }
 0xb5b   :  { %v1573_v22 = vpop.f32.mrf.mxu0 }
 0xb5c   :  { %5504 = vmatmul.mubr.msk.f32.vlgmr.msra.gmra.mxu1 %vm558_vm4, %v1410_v52  ;;  %v1574_v34 = vadd.f32 %v1573_v22, %v413_v55 }
 0xb5d   :  { %v5512_v19 = vpop.f32.mrf.mxu0  ;;  %5514 = vmatpush3.msra.mxu1 %v6217_v24  ;;  %5517 = vmatprep.mubr.msk.f32.mxu1 %vm6101_vm2, %v6100_v17 }
 0xb5e   :  { %5515 = vmatprep.subr.mxu1 %v6100_v17  ;;  %v5065_v56 = vmul.f32 -1.442695, %v1574_v34 }
 0xb5f   :  { %5516 = vmatpush3.msra.mxu1 %v6228_v26 }
 0xb60   :  { %5531 = vmatprep.subr.mxu1 %v6100_v17  ;;  %5903 = vpow2.f32 %v5065_v56 }
 0xb6d   :  { %v5904_v62 = vpop.eup %5903 }
 0xb6e   :  { %v1580_v57 = vadd.f32 1.0, %v5904_v62  ;;  %v301_v62 = vadd.f32 %v6273_v41, %v6283_v46 }
 0xb70   :  { %5905 = vrcp.f32 %v1580_v57 }
 0xb7d   :  { %v5906_v33 = vpop.eup %5905 }
 0xb7e   :  { %v1588_v11 = vmul.f32 %v5906_v33, %v1586_v8 }
 0xc1c   :  { %v1480_v60 = vpop.f32.mrf.mxu1 }
 0xc1d   :  { %v1481_v37 = vadd.f32 %v1480_v60, %v6433_v54 }
 0xc1e   :  { %v5505_v61 = vpop.f32.mrf.mxu1 }
 0xc1f   :  { %v1484_v24 = vmax.f32 %v1481_v37, 0.0 }
 0xc21   :  { %v1485_v63 = vadd.f32 %v1484_v24, %v1336_v13 }
 0xc23   :  { %v1486_v23 = vsel %vm558_vm4, %v1485_v63, 0.0  ;;  %v1490_v5 = vmul.f32 %v1485_v63, %v1485_v63 }
 0xc24   :  { %1487 = vadd.xlane.f32.xlu1 %v1486_v23 }
 0xc25   :  { %v1491_v26 = vsel %vm558_vm4, %v1490_v5, 0.0 }
 0xc28   :  { %1492 = vadd.xlane.f32.xlu1 %v1491_v26 }
 0xc39   :  { %1590 = vrot.lane.b32.xlu1 %v1588_v11, %s6103_s13 }
 0xcad   :  { %v1488_v12 = vpop.xlane.xlu1 %1487 }
 0xcae   :  { %v1489_v38 = vmul.f32 0.041666668, %v1488_v12 }
 0xcb0   :  { %v1495_v18 = vmul.f32 %v1489_v38, %v1489_v38  ;;  %v1497_v22 = vsub.f32 %v1485_v63, %v1489_v38 }
 0xcb1   :  { %v1493_v16 = vpop.xlane.xlu1 %1492 }
 0xcb2   :  { %v1494_v25 = vmul.f32 0.041666668, %v1493_v16 }
 0xcb4   :  { %v1496_v13 = vsub.f32 %v1494_v25, %v1495_v18 }
 0xcb5   :  { %v1591_v61 = vpop.permute.xlu1 %1590 }
 0xcb6   :  { %v1498_v52 = vadd.f32 1e-05, %v1496_v13 }
 0xcb8   :  { %5907 = vrsqrt.f32 %v1498_v52 }
 0xcc5   :  { %v5908_v19 = vpop.eup %5907 }
 0xcc6   :  { %v1500_v55 = vmul.f32 %v5908_v19, %v1497_v22 }
 0xcc8   :  { %v1501_v34 = vmul.f32 %v1500_v55, %v6479_v4 }
 0xcca   :  { %v1502_v56 = vadd.f32 %v1501_v34, %v6481_v15 }
 0xccc   :  { %5909 = vtanh.f32 %v1502_v56 }
 0xcd9   :  { %v5910_v60 = vpop.eup %5909 }
 0xcda   :  { %v1584_v37 = vmul.f32 %v5910_v60, %v5906_v33 }
 0xcdc   :  { %v6580_v24 = vadd.f32 %v1591_v61, %v1584_v37 }
 0xcde   :  { %5518 = vmatmul.mubr.msk.f32.vlgmr.msra.gmra.mxu1 %vm199_vm1, %v6580_v24 }
 0xcdf   :  { %5532 = vmatpush3.msra.mxu1 %v6304_v1  ;;  %5539 = vmatprep.mubr.msk.f32.mxu1 %vm6101_vm2, %v6100_v17 }
 0xce0   :  { %5533 = vmatprep.subr.mxu1 %v6100_v17 }
 0xce1   :  { %5534 = vmatpush3.msra.mxu1 %v6309_v2 }
 0xce2   :  { %5535 = vmatprep.subr.mxu1 %v6100_v17 }
 0xce3   :  { %5536 = vmatpush3.msra.mxu1 %v6325_v7 }
 0xce4   :  { %5537 = vmatprep.subr.mxu1 %v6100_v17 }
 0xce5   :  { %5538 = vmatpush3.msra.mxu1 %v6152_v0 }
 0xce6   :  { %5553 = vmatprep.subr.mxu1 %v6100_v17 }
 0xd9e   :  { %v1663_v63 = vpop.f32.mrf.mxu1 }
 0xd9f   :  { %v1664_v57 = vadd.f32 %v1663_v63, %v301_v62 }
 0xda0   :  { %v5519_v23 = vpop.f32.mrf.mxu1 }
 0xda1   :  { %v1667_v5 = vsel %vm520_vm3, %v1664_v57, 0.0  ;;  %v1671_v26 = vmul.f32 %v1664_v57, %v1664_v57 }
 0xda2   :  { %1668 = vadd.xlane.f32.xlu0 %v1667_v5 }
 0xda3   :  { %v1672_v33 = vsel %vm520_vm3, %v1671_v26, 0.0 }
 0xda4   :  { %1673 = vadd.xlane.f32.xlu1 %v1672_v33 }
 0xe2b   :  { %v1669_v8 = vpop.xlane.xlu0 %1668 }
 0xe2c   :  { %v1670_v11 = vmul.f32 0.013888889, %v1669_v8 }
 0xe2d   :  { %v1674_v12 = vpop.xlane.xlu1 %1673 }
 0xe2e   :  { %v1676_v38 = vmul.f32 %v1670_v11, %v1670_v11  ;;  %v1675_v0 = vmul.f32 0.013888889, %v1674_v12  ;;  %v1678_v25 = vsub.f32 %v1664_v57, %v1670_v11 }
 0xe30   :  { %v1677_v16 = vsub.f32 %v1675_v0, %v1676_v38 }
 0xe32   :  { %v1679_v18 = vadd.f32 1e-05, %v1677_v16 }
 0xe34   :  { %5911 = vrsqrt.f32 %v1679_v18 }
 0xe41   :  { %v5912_v41 = vpop.eup %5911 }
 0xe42   :  { %v1681_v13 = vmul.f32 %v5912_v41, %v1678_v25 }
 0xe44   :  { %v1682_v52 = vmul.f32 %v1681_v13, %v6166_v6 }
 0xe46   :  { %v1683_v22 = vadd.f32 %v1682_v52, %v6335_v10 }
 0xe48   :  { %1688 = vrot.lane.b32.xlu1 %v1683_v22, %s6103_s13  ;;  %1685 = vrot.lane.b32.xlu0 %v1683_v22, %s6102_s12 }
 0xe4c   :  { %1696 = vrot.lane.b32.xlu0 %v1683_v22, %s6104_s14 }
 0xe50   :  { %1692 = vrot.lane.b32.xlu0 %v1683_v22, %s6105_s15 }
 0xeba   :  { %v1689_v19 = vpop.permute.xlu1 %1688  ;;  %v1686_v55 = vpop.permute.xlu0 %1685 }
 0xebb   :  { %v1691_v34 = vsel %vm199_vm1, %v1686_v55, %v1689_v19 }
 0xebc   :  { %v1773_v56 = vmul.f32 %v1691_v34, %v1683_v22 }
 0xebe   :  { %5540 = vmatmul.mubr.msk.f32.vlgmr.msra.gmra.mxu1 %vm558_vm4, %v1773_v56  ;;  %v1697_v60 = vpop.permute.xlu0 %1696 }
 0xebf   :  { %5554 = vmatpush3.msra.mxu1 %v6408_v20  ;;  %v1699_v37 = vmul.f32 %v1697_v60, %v1683_v22  ;;  %5561 = vmatprep.mubr.msk.f32.mxu1 %vm6101_vm2, %v6100_v17 }
 0xec0   :  { %5555 = vmatprep.subr.mxu1 %v6100_v17 }
 0xec1   :  { %5556 = vmatpush3.msra.mxu1 %v6406_v3  ;;  %5529 = vmatmul.mubr.msk.f32.vlgmr.msra.gmra.mxu0 %vm558_vm4, %v1699_v37 }
 0xec2   :  { %5543 = vmatpush3.msra.mxu0 %v6408_v20  ;;  %5557 = vmatprep.subr.mxu1 %v6100_v17  ;;  %v1693_v61 = vpop.permute.xlu0 %1692 }
 0xec3   :  { %5544 = vmatprep.subr.mxu0 %v6100_v17  ;;  %5558 = vmatpush3.msra.mxu1 %v6416_v29  ;;  %v1695_v62 = vsel %vm199_vm1, %v1693_v61, %v1686_v55 }
 0xec4   :  { %5545 = vmatpush3.msra.mxu0 %v6406_v3  ;;  %5559 = vmatprep.subr.mxu1 %v6100_v17 }
 0xec5   :  { %5546 = vmatprep.subr.mxu0 %v6100_v17  ;;  %5560 = vmatpush3.msra.mxu1 %v6424_v30 }
 0xec6   :  { %1855 = vrot.lane.b32.xlu0 %v1695_v62, %s6098_s30  ;;  %5547 = vmatpush3.msra.mxu0 %v6416_v29 }
 0xec7   :  { %5548 = vmatprep.subr.mxu0 %v6100_v17  ;;  %5550 = vmatprep.mubr.msk.f32.mxu0 %vm6101_vm2, %v6100_v17 }
 0xec8   :  { %5549 = vmatpush3.msra.mxu0 %v6424_v30  ;;  %5571 = vmatprep.subr.mxu1 %v6100_v17 }
 0xec9   :  { %5564 = vmatprep.subr.mxu0 %v6100_v17 }
 0xeca   :  { %1865 = vrot.lane.b32.xlu0 %v6230_v27, %s6106_s16 }
 0xf38   :  { %v1856_v63 = vpop.permute.xlu0 %1855 }
 0xf39   :  { %v1858_v57 = vsub.f32 %v1683_v22, %v1856_v63 }
 0xf3b   :  { %1860 = vrot.lane.b32.xlu1 %v1858_v57, %s6098_s30 }
 0xf3c   :  { %v1866_v18 = vpop.permute.xlu0 %1865 }
 0xf3d   :  { %v1868_v27 = vsel %vm199_vm1, %v6580_v24, %v1866_v18  ;;  %v418_v18 = vadd.f32 %v6370_v43, %v6467_v9 }
 0xf7e   :  { %v1843_v23 = vpop.f32.mrf.mxu1 }
 0xf80   :  { %v5541_v5 = vpop.f32.mrf.mxu1 }
 0xf81   :  { %v1769_v26 = vpop.f32.mrf.mxu0 }
 0xf82   :  { %v1847_v8 = vsub.f32 %v1769_v26, %v1843_v23 }
 0xf83   :  { %v5530_v33 = vpop.f32.mrf.mxu0 }
 0xf84   :  { %v5069_v11 = vmul.f32 -1.442695, %v1847_v8  ;;  %v6660_v8 = vld [vmem:[%s7280_s3 + $0x10] sm:$0xff] }
 0xf86   :  { %5913 = vpow2.f32 %v5069_v11 }
 0xf93   :  { %v5914_v12 = vpop.eup %5913 }
 0xf94   :  { %v1851_v38 = vadd.f32 1.0, %v5914_v12 }
 0xf96   :  { %5915 = vrcp.f32 %v1851_v38 }
 0xfa3   :  { %v5916_v0 = vpop.eup %5915 }
 0xfad   :  { %v1861_v16 = vpop.permute.xlu1 %1860 }
 0xfae   :  { %v1863_v25 = vmul.f32 %v5916_v0, %v1861_v16  ;;  %v6669_v0 = vld [vmem:[%s7279_s2 + $0x8] sm:$0xff]  ;;  %v6678_v16 = vld [vmem:[%s7279_s2] sm:$0xff] }
 0xfb0   :  { %v1864_v41 = vadd.f32 %v1863_v25, %v1695_v62 }
 0xfb2   :  { %v1869_v13 = vadd.f32 %v1868_v27, %v1864_v41 }
 0xfb4   :  { %v1870_v52 = vsel %vm558_vm4, %v1869_v13, 0.0  ;;  %v1874_v22 = vmul.f32 %v1869_v13, %v1869_v13 }
 0xfb5   :  { %1871 = vadd.xlane.f32.xlu1 %v1870_v52 }
 0xfb6   :  { %v1875_v19 = vsel %vm558_vm4, %v1874_v22, 0.0 }
 0xfb7   :  { %1876 = vadd.xlane.f32.xlu0 %v1875_v19 }
 0xfcd   :  { %2135 = vrot.lane.b32.xlu0 %v6580_v24, %s6106_s16 }
0x103e   :  { %v1872_v55 = vpop.xlane.xlu1 %1871 }
0x103f   :  { %v1873_v34 = vmul.f32 0.041666668, %v1872_v55 }
0x1040   :  { %v1877_v56 = vpop.xlane.xlu0 %1876 }
0x1041   :  { %v1879_v60 = vmul.f32 %v1873_v34, %v1873_v34  ;;  %v1878_v37 = vmul.f32 0.041666668, %v1877_v56  ;;  %v1881_v63 = vsub.f32 %v1869_v13, %v1873_v34 }
0x1043   :  { %v1880_v61 = vsub.f32 %v1878_v37, %v1879_v60 }
0x1045   :  { %v1882_v62 = vadd.f32 1e-05, %v1880_v61  ;;  %v2136_v61 = vpop.permute.xlu0 %2135 }
0x1047   :  { %5917 = vrsqrt.f32 %v1882_v62 }
0x1048   :  { %5919 = vtanh.f32 %v6580_v24 }
0x1054   :  { %v5918_v57 = vpop.eup %5917 }
0x1055   :  { %v1884_v23 = vmul.f32 %v5918_v57, %v1881_v63  ;;  %v5920_v33 = vpop.eup %5919 }
0x1057   :  { %v1885_v5 = vmul.f32 %v1884_v23, %v6386_v14 }
0x1059   :  { %v1886_v26 = vadd.f32 %v1885_v5, %v6431_v51 }
0x105b   :  { %5551 = vmatmul.mubr.msk.f32.vlgmr.msra.gmra.mxu0 %vm558_vm4, %v1886_v26 }
0x105c   :  { %5565 = vmatpush3.msra.mxu0 %v6437_v58  ;;  %5568 = vmatprep.mubr.msk.f32.mxu0 %vm6101_vm2, %v6100_v17 }
0x105d   :  { %5566 = vmatprep.subr.mxu0 %v6100_v17 }
0x105e   :  { %5567 = vmatpush3.msra.mxu0 %v6440_v59 }
0x105f   :  { %5569 = vmatmul.mubr.msk.f32.vlgmr.msra.gmra.mxu0 %vm199_vm1, %v5920_v33  ;;  %5578 = vmatprep.subr.mxu0 %v6100_v17 }
0x1060   :  { %5579 = vmatpush3.msra.mxu0 %v6304_v1  ;;  %5586 = vmatprep.mubr.msk.f32.mxu0 %vm6101_vm2, %v6100_v17 }
0x1061   :  { %5580 = vmatprep.subr.mxu0 %v6100_v17 }
0x1062   :  { %5581 = vmatpush3.msra.mxu0 %v6309_v2 }
0x1063   :  { %5582 = vmatprep.subr.mxu0 %v6100_v17 }
0x1064   :  { %5583 = vmatpush3.msra.mxu0 %v6325_v7 }
0x1065   :  { %5584 = vmatprep.subr.mxu0 %v6100_v17 }
0x1066   :  { %5585 = vmatpush3.msra.mxu0 %v6660_v8 }
0x1067   :  { %5600 = vmatprep.subr.mxu0 %v6100_v17 }
0x111b   :  { %v1956_v1 = vpop.f32.mrf.mxu0 }
0x111c   :  { %v1957_v11 = vadd.f32 %v1956_v1, %v6433_v54 }
0x111d   :  { %v5552_v12 = vpop.f32.mrf.mxu0 }
0x111e   :  { %v1960_v2 = vmax.f32 %v1957_v11, 0.0 }
0x111f   :  { %v2123_v38 = vpop.f32.mrf.mxu0 }
0x1120   :  { %5562 = vmatmul.mubr.msk.f32.vlgmr.msra.gmra.mxu1 %vm558_vm4, %v1960_v2  ;;  %v2124_v25 = vadd.f32 %v2123_v38, %v418_v18 }
0x1121   :  { %v5570_v7 = vpop.f32.mrf.mxu0  ;;  %5572 = vmatpush3.msra.mxu1 %v6669_v0  ;;  %5575 = vmatprep.mubr.msk.f32.mxu1 %vm6101_vm2, %v6100_v17 }
0x1122   :  { %5573 = vmatprep.subr.mxu1 %v6100_v17  ;;  %v5073_v41 = vmul.f32 -1.442695, %v2124_v25 }
0x1123   :  { %5574 = vmatpush3.msra.mxu1 %v6678_v16 }
0x1124   :  { %5589 = vmatprep.subr.mxu1 %v6100_v17  ;;  %5921 = vpow2.f32 %v5073_v41 }
0x1131   :  { %v5922_v19 = vpop.eup %5921 }
0x1132   :  { %v2130_v34 = vadd.f32 1.0, %v5922_v19  ;;  %v306_v19 = vadd.f32 %v6271_v40, %v6283_v46 }
0x1134   :  { %5923 = vrcp.f32 %v2130_v34 }
0x1141   :  { %v5924_v43 = vpop.eup %5923 }
0x1142   :  { %v2138_v62 = vmul.f32 %v5924_v43, %v2136_v61 }
0x11e0   :  { %v2030_v27 = vpop.f32.mrf.mxu1 }
0x11e1   :  { %v2031_v13 = vadd.f32 %v2030_v27, %v6433_v54 }
0x11e2   :  { %v5563_v52 = vpop.f32.mrf.mxu1 }
0x11e3   :  { %v2034_v22 = vmax.f32 %v2031_v13, 0.0  ;;  %v6697_v13 = vld [vmem:[%s7280_s3 + $0x28] sm:$0xff]  ;;  %v6706_v52 = vld [vmem:[%s7280_s3 + $0x20] sm:$0xff] }
0x11e5   :  { %v2035_v55 = vadd.f32 %v2034_v22, %v1886_v26  ;;  %v6713_v22 = vld [vmem:[%s7280_s3 + $0x18] sm:$0xff] }
0x11e7   :  { %v2036_v56 = vsel %vm558_vm4, %v2035_v55, 0.0  ;;  %v2040_v60 = vmul.f32 %v2035_v55, %v2035_v55 }
0x11e8   :  { %2037 = vadd.xlane.f32.xlu1 %v2036_v56 }
0x11e9   :  { %v2041_v37 = vsel %vm558_vm4, %v2040_v60, 0.0 }
0x11ec   :  { %2042 = vadd.xlane.f32.xlu1 %v2041_v37 }
0x11fd   :  { %2140 = vrot.lane.b32.xlu1 %v2138_v62, %s6103_s13 }
0x1271   :  { %v2038_v63 = vpop.xlane.xlu1 %2037 }
0x1272   :  { %v2039_v57 = vmul.f32 0.041666668, %v2038_v63 }
0x1274   :  { %v2045_v5 = vmul.f32 %v2039_v57, %v2039_v57  ;;  %v2047_v11 = vsub.f32 %v2035_v55, %v2039_v57 }
0x1275   :  { %v2043_v23 = vpop.xlane.xlu1 %2042 }
0x1276   :  { %v2044_v33 = vmul.f32 0.041666668, %v2043_v23 }
0x1278   :  { %v2046_v26 = vsub.f32 %v2044_v33, %v2045_v5 }
0x1279   :  { %v2141_v41 = vpop.permute.xlu1 %2140 }
0x127a   :  { %v2048_v1 = vadd.f32 1e-05, %v2046_v26 }
0x127c   :  { %5925 = vrsqrt.f32 %v2048_v1 }
0x1289   :  { %v5926_v12 = vpop.eup %5925 }
0x128a   :  { %v2050_v2 = vmul.f32 %v5926_v12, %v2047_v11 }
0x128c   :  { %v2051_v38 = vmul.f32 %v2050_v2, %v6479_v4 }
0x128e   :  { %v2052_v7 = vadd.f32 %v2051_v38, %v6481_v15 }
0x1290   :  { %5927 = vtanh.f32 %v2052_v7 }
0x129d   :  { %v5928_v18 = vpop.eup %5927 }
0x129e   :  { %v2134_v25 = vmul.f32 %v5928_v18, %v5924_v43 }
0x12a0   :  { %v6690_v27 = vadd.f32 %v2141_v41, %v2134_v25 }
0x12a2   :  { %5576 = vmatmul.mubr.msk.f32.vlgmr.msra.gmra.mxu1 %vm199_vm1, %v6690_v27 }
0x12a3   :  { %5590 = vmatpush3.msra.mxu1 %v6697_v13  ;;  %5597 = vmatprep.mubr.msk.f32.mxu1 %vm6101_vm2, %v6100_v17 }
0x12a4   :  { %5591 = vmatprep.subr.mxu1 %v6100_v17 }
0x12a5   :  { %5592 = vmatpush3.msra.mxu1 %v6706_v52 }
0x12a6   :  { %5593 = vmatprep.subr.mxu1 %v6100_v17 }
0x12a7   :  { %5594 = vmatpush3.msra.mxu1 %v6713_v22 }
0x12a8   :  { %5595 = vmatprep.subr.mxu1 %v6100_v17 }
0x12a9   :  { %5596 = vmatpush3.msra.mxu1 %v6660_v8 }
0x12aa   :  { %5611 = vmatprep.subr.mxu1 %v6100_v17 }
0x1362   :  { %v2213_v55 = vpop.f32.mrf.mxu1 }
0x1363   :  { %v2214_v34 = vadd.f32 %v2213_v55, %v306_v19 }
0x1364   :  { %v5577_v56 = vpop.f32.mrf.mxu1 }
0x1365   :  { %v2217_v60 = vsel %vm520_vm3, %v2214_v34, 0.0  ;;  %v2221_v37 = vmul.f32 %v2214_v34, %v2214_v34 }
0x1366   :  { %2218 = vadd.xlane.f32.xlu0 %v2217_v60 }
0x1367   :  { %v2222_v43 = vsel %vm520_vm3, %v2221_v37, 0.0 }
0x1368   :  { %2223 = vadd.xlane.f32.xlu1 %v2222_v43 }
0x13ef   :  { %v2219_v61 = vpop.xlane.xlu0 %2218 }
0x13f0   :  { %v2220_v62 = vmul.f32 0.013888889, %v2219_v61 }
0x13f1   :  { %v2224_v63 = vpop.xlane.xlu1 %2223 }
0x13f2   :  { %v2226_v57 = vmul.f32 %v2220_v62, %v2220_v62  ;;  %v2225_v23 = vmul.f32 0.013888889, %v2224_v63  ;;  %v2228_v26 = vsub.f32 %v2214_v34, %v2220_v62 }
0x13f4   :  { %v2227_v5 = vsub.f32 %v2225_v23, %v2226_v57 }
0x13f6   :  { %v2229_v33 = vadd.f32 1e-05, %v2227_v5 }
0x13f8   :  { %5929 = vrsqrt.f32 %v2229_v33 }
0x1405   :  { %v5930_v40 = vpop.eup %5929 }
0x1406   :  { %v2231_v1 = vmul.f32 %v5930_v40, %v2228_v26 }
0x1408   :  { %v2232_v11 = vmul.f32 %v2231_v1, %v6166_v6 }
0x140a   :  { %v2233_v12 = vadd.f32 %v2232_v11, %v6335_v10 }
0x140c   :  { %2238 = vrot.lane.b32.xlu1 %v2233_v12, %s6103_s13  ;;  %2235 = vrot.lane.b32.xlu0 %v2233_v12, %s6102_s12 }
0x1410   :  { %2246 = vrot.lane.b32.xlu0 %v2233_v12, %s6104_s14 }
0x1414   :  { %2242 = vrot.lane.b32.xlu0 %v2233_v12, %s6105_s15 }
0x147e   :  { %v2239_v2 = vpop.permute.xlu1 %2238  ;;  %v2236_v38 = vpop.permute.xlu0 %2235 }
0x147f   :  { %v2241_v7 = vsel %vm199_vm1, %v2236_v38, %v2239_v2 }
0x1480   :  { %v2323_v18 = vmul.f32 %v2241_v7, %v2233_v12 }
0x1482   :  { %5598 = vmatmul.mubr.msk.f32.vlgmr.msra.gmra.mxu1 %vm558_vm4, %v2323_v18  ;;  %v2247_v25 = vpop.permute.xlu0 %2246 }
0x1483   :  { %5612 = vmatpush3.msra.mxu1 %v6408_v20  ;;  %v2249_v41 = vmul.f32 %v2247_v25, %v2233_v12  ;;  %5619 = vmatprep.mubr.msk.f32.mxu1 %vm6101_vm2, %v6100_v17 }
0x1484   :  { %5613 = vmatprep.subr.mxu1 %v6100_v17 }
0x1485   :  { %5614 = vmatpush3.msra.mxu1 %v6406_v3  ;;  %5587 = vmatmul.mubr.msk.f32.vlgmr.msra.gmra.mxu0 %vm558_vm4, %v2249_v41 }
0x1486   :  { %5601 = vmatpush3.msra.mxu0 %v6408_v20  ;;  %5615 = vmatprep.subr.mxu1 %v6100_v17  ;;  %v2243_v19 = vpop.permute.xlu0 %2242 }
0x1487   :  { %5602 = vmatprep.subr.mxu0 %v6100_v17  ;;  %5616 = vmatpush3.msra.mxu1 %v6416_v29  ;;  %v2245_v55 = vsel %vm199_vm1, %v2243_v19, %v2236_v38 }
0x1488   :  { %5603 = vmatpush3.msra.mxu0 %v6406_v3  ;;  %5617 = vmatprep.subr.mxu1 %v6100_v17 }
0x1489   :  { %5604 = vmatprep.subr.mxu0 %v6100_v17  ;;  %5618 = vmatpush3.msra.mxu1 %v6424_v30 }
0x148a   :  { %2405 = vrot.lane.b32.xlu1 %v2245_v55, %s6098_s30  ;;  %5605 = vmatpush3.msra.mxu0 %v6416_v29 }
0x148b   :  { %5606 = vmatprep.subr.mxu0 %v6100_v17  ;;  %5608 = vmatprep.mubr.msk.f32.mxu0 %vm6101_vm2, %v6100_v17 }
0x148c   :  { %5607 = vmatpush3.msra.mxu0 %v6424_v30  ;;  %5629 = vmatprep.subr.mxu1 %v6100_v17 }
0x148d   :  { %5622 = vmatprep.subr.mxu0 %v6100_v17 }
0x148e   :  { %2415 = vrot.lane.b32.xlu1 %v6233_v28, %s6106_s16 }
0x14fc   :  { %v2406_v34 = vpop.permute.xlu1 %2405 }
0x14fd   :  { %v2408_v56 = vsub.f32 %v2233_v12, %v2406_v34 }
0x14ff   :  { %2410 = vrot.lane.b32.xlu0 %v2408_v56, %s6098_s30 }
0x1500   :  { %v2416_v26 = vpop.permute.xlu1 %2415 }
0x1501   :  { %v2418_v28 = vsel %vm199_vm1, %v6690_v27, %v2416_v26 }
0x1542   :  { %v2393_v60 = vpop.f32.mrf.mxu1 }
0x1544   :  { %v5599_v37 = vpop.f32.mrf.mxu1 }
0x1545   :  { %v2319_v43 = vpop.f32.mrf.mxu0 }
0x1546   :  { %v2397_v62 = vsub.f32 %v2319_v43, %v2393_v60 }
0x1547   :  { %v5588_v61 = vpop.f32.mrf.mxu0 }
0x1548   :  { %v5077_v63 = vmul.f32 -1.442695, %v2397_v62 }
0x154a   :  { %5931 = vpow2.f32 %v5077_v63 }
0x1557   :  { %v5932_v57 = vpop.eup %5931 }
0x1558   :  { %v2401_v23 = vadd.f32 1.0, %v5932_v57 }
0x155a   :  { %5933 = vrcp.f32 %v2401_v23 }
0x1567   :  { %v5934_v5 = vpop.eup %5933 }
0x1571   :  { %v2411_v33 = vpop.permute.xlu0 %2410 }
0x1572   :  { %v2413_v40 = vmul.f32 %v5934_v5, %v2411_v33 }
0x1574   :  { %v2414_v1 = vadd.f32 %v2413_v40, %v2245_v55  ;;  %v423_v40 = vadd.f32 %v6368_v39, %v6467_v9 }
0x1576   :  { %v2419_v11 = vadd.f32 %v2418_v28, %v2414_v1 }
0x1578   :  { %v2420_v12 = vsel %vm558_vm4, %v2419_v11, 0.0  ;;  %v2424_v2 = vmul.f32 %v2419_v11, %v2419_v11 }
0x1579   :  { %2421 = vadd.xlane.f32.xlu0 %v2420_v12 }
0x157a   :  { %v2425_v38 = vsel %vm558_vm4, %v2424_v2, 0.0 }
0x157b   :  { %2426 = vadd.xlane.f32.xlu1 %v2425_v38 }
0x158f   :  { %2685 = vrot.lane.b32.xlu0 %v6690_v27, %s6106_s16 }
0x1602   :  { %v2422_v7 = vpop.xlane.xlu0 %2421 }
0x1603   :  { %v2423_v18 = vmul.f32 0.041666668, %v2422_v7 }
0x1604   :  { %v2427_v25 = vpop.xlane.xlu1 %2426 }
0x1605   :  { %v2429_v41 = vmul.f32 %v2423_v18, %v2423_v18  ;;  %v2428_v19 = vmul.f32 0.041666668, %v2427_v25  ;;  %v2431_v56 = vsub.f32 %v2419_v11, %v2423_v18 }
0x1607   :  { %v2430_v55 = vsub.f32 %v2428_v19, %v2429_v41 }
0x1609   :  { %v2432_v34 = vadd.f32 1e-05, %v2430_v55 }
0x160b   :  { %5935 = vrsqrt.f32 %v2432_v34  ;;  %v2686_v34 = vpop.permute.xlu0 %2685 }
0x160c   :  { %5937 = vtanh.f32 %v6690_v27 }
0x1618   :  { %v5936_v60 = vpop.eup %5935 }
0x1619   :  { %v2434_v37 = vmul.f32 %v5936_v60, %v2431_v56  ;;  %v5938_v62 = vpop.eup %5937 }
0x161b   :  { %v2435_v43 = vmul.f32 %v2434_v37, %v6386_v14 }
0x161d   :  { %v2436_v61 = vadd.f32 %v2435_v43, %v6431_v51 }
0x161f   :  { %5609 = vmatmul.mubr.msk.f32.vlgmr.msra.gmra.mxu0 %vm558_vm4, %v2436_v61 }
0x1620   :  { %5623 = vmatpush3.msra.mxu0 %v6437_v58  ;;  %5626 = vmatprep.mubr.msk.f32.mxu0 %vm6101_vm2, %v6100_v17 }
0x1621   :  { %5624 = vmatprep.subr.mxu0 %v6100_v17 }
0x1622   :  { %5625 = vmatpush3.msra.mxu0 %v6440_v59 }
0x1623   :  { %5627 = vmatmul.mubr.msk.f32.vlgmr.msra.gmra.mxu0 %vm199_vm1, %v5938_v62  ;;  %5636 = vmatprep.subr.mxu0 %v6100_v17 }
0x1624   :  { %5637 = vmatpush3.msra.mxu0 %v6697_v13  ;;  %5644 = vmatprep.mubr.msk.f32.mxu0 %vm6101_vm2, %v6100_v17 }
0x1625   :  { %5638 = vmatprep.subr.mxu0 %v6100_v17 }
0x1626   :  { %5639 = vmatpush3.msra.mxu0 %v6706_v52 }
0x1627   :  { %5640 = vmatprep.subr.mxu0 %v6100_v17 }
0x1628   :  { %5641 = vmatpush3.msra.mxu0 %v6713_v22 }
0x1629   :  { %5642 = vmatprep.subr.mxu0 %v6100_v17 }
0x162a   :  { %5643 = vmatpush3.msra.mxu0 %v6660_v8 }
0x162b   :  { %5658 = vmatprep.subr.mxu0 %v6100_v17 }
0x16df   :  { %v2506_v63 = vpop.f32.mrf.mxu0 }
0x16e0   :  { %v2507_v57 = vadd.f32 %v2506_v63, %v6433_v54 }
0x16e1   :  { %v5610_v23 = vpop.f32.mrf.mxu0 }
0x16e2   :  { %v2510_v5 = vmax.f32 %v2507_v57, 0.0 }
0x16e3   :  { %v2673_v33 = vpop.f32.mrf.mxu0 }
0x16e4   :  { %5620 = vmatmul.mubr.msk.f32.vlgmr.msra.gmra.mxu1 %vm558_vm4, %v2510_v5  ;;  %v2674_v1 = vadd.f32 %v2673_v33, %v423_v40 }
0x16e5   :  { %v5628_v26 = vpop.f32.mrf.mxu0  ;;  %5630 = vmatpush3.msra.mxu1 %v6669_v0  ;;  %5633 = vmatprep.mubr.msk.f32.mxu1 %vm6101_vm2, %v6100_v17 }
0x16e6   :  { %5631 = vmatprep.subr.mxu1 %v6100_v17  ;;  %v5081_v28 = vmul.f32 -1.442695, %v2674_v1 }
0x16e7   :  { %5632 = vmatpush3.msra.mxu1 %v6678_v16 }
0x16e8   :  { %5647 = vmatprep.subr.mxu1 %v6100_v17  ;;  %5939 = vpow2.f32 %v5081_v28 }
0x16f5   :  { %v5940_v7 = vpop.eup %5939 }
0x16f6   :  { %v2680_v25 = vadd.f32 1.0, %v5940_v7 }
0x16f8   :  { %5941 = vrcp.f32 %v2680_v25 }
0x1705   :  { %v5942_v39 = vpop.eup %5941 }
0x1706   :  { %v2688_v56 = vmul.f32 %v5942_v39, %v2686_v34 }
0x17a4   :  { %v2580_v11 = vpop.f32.mrf.mxu1 }
0x17a5   :  { %v2581_v12 = vadd.f32 %v2580_v11, %v6433_v54 }
0x17a6   :  { %v5621_v2 = vpop.f32.mrf.mxu1 }
0x17a7   :  { %v2584_v38 = vmax.f32 %v2581_v12, 0.0  ;;  %v311_v2 = vadd.f32 %v6278_v44, %v6283_v46 }
0x17a9   :  { %v2585_v18 = vadd.f32 %v2584_v38, %v2436_v61 }
0x17ab   :  { %v2586_v41 = vsel %vm558_vm4, %v2585_v18, 0.0  ;;  %v2590_v19 = vmul.f32 %v2585_v18, %v2585_v18 }
0x17ac   :  { %2587 = vadd.xlane.f32.xlu1 %v2586_v41 }
0x17ad   :  { %v2591_v55 = vsel %vm558_vm4, %v2590_v19, 0.0 }
0x17b0   :  { %2592 = vadd.xlane.f32.xlu1 %v2591_v55 }
0x17c1   :  { %2690 = vrot.lane.b32.xlu1 %v2688_v56, %s6103_s13 }
0x1835   :  { %v2588_v60 = vpop.xlane.xlu1 %2587 }
0x1836   :  { %v2589_v37 = vmul.f32 0.041666668, %v2588_v60 }
0x1838   :  { %v2595_v62 = vmul.f32 %v2589_v37, %v2589_v37  ;;  %v2597_v23 = vsub.f32 %v2585_v18, %v2589_v37 }
0x1839   :  { %v2593_v43 = vpop.xlane.xlu1 %2592 }
0x183a   :  { %v2594_v63 = vmul.f32 0.041666668, %v2593_v43 }
0x183c   :  { %v2596_v61 = vsub.f32 %v2594_v63, %v2595_v62 }
0x183d   :  { %v2691_v11 = vpop.permute.xlu1 %2690 }
0x183e   :  { %v2598_v57 = vadd.f32 1e-05, %v2596_v61 }
0x1840   :  { %5943 = vrsqrt.f32 %v2598_v57 }
0x184d   :  { %v5944_v5 = vpop.eup %5943 }
0x184e   :  { %v2600_v33 = vmul.f32 %v5944_v5, %v2597_v23 }
0x1850   :  { %v2601_v26 = vmul.f32 %v2600_v33, %v6479_v4 }
0x1852   :  { %v2602_v40 = vadd.f32 %v2601_v26, %v6481_v15 }
0x1854   :  { %5945 = vtanh.f32 %v2602_v40 }
0x1861   :  { %v5946_v1 = vpop.eup %5945 }
0x1862   :  { %v2684_v28 = vmul.f32 %v5946_v1, %v5942_v39 }
0x1864   :  { %v6800_v12 = vadd.f32 %v2691_v11, %v2684_v28 }
0x1866   :  { %5634 = vmatmul.mubr.msk.f32.vlgmr.msra.gmra.mxu1 %vm199_vm1, %v6800_v12 }
0x1867   :  { %5648 = vmatpush3.msra.mxu1 %v6697_v13  ;;  %5655 = vmatprep.mubr.msk.f32.mxu1 %vm6101_vm2, %v6100_v17 }
0x1868   :  { %5649 = vmatprep.subr.mxu1 %v6100_v17 }
0x1869   :  { %5650 = vmatpush3.msra.mxu1 %v6706_v52 }
0x186a   :  { %5651 = vmatprep.subr.mxu1 %v6100_v17 }
0x186b   :  { %5652 = vmatpush3.msra.mxu1 %v6713_v22 }
0x186c   :  { %5653 = vmatprep.subr.mxu1 %v6100_v17 }
0x186d   :  { %5654 = vmatpush3.msra.mxu1 %v6660_v8 }
0x186e   :  { %5669 = vmatprep.subr.mxu1 %v6100_v17 }
0x1926   :  { %v2763_v38 = vpop.f32.mrf.mxu1 }
0x1927   :  { %v2764_v7 = vadd.f32 %v2763_v38, %v311_v2 }
0x1928   :  { %v5635_v18 = vpop.f32.mrf.mxu1 }
0x1929   :  { %v2767_v25 = vsel %vm520_vm3, %v2764_v7, 0.0  ;;  %v2771_v41 = vmul.f32 %v2764_v7, %v2764_v7 }
0x192a   :  { %2768 = vadd.xlane.f32.xlu0 %v2767_v25 }
0x192b   :  { %v2772_v19 = vsel %vm520_vm3, %v2771_v41, 0.0 }
0x192c   :  { %2773 = vadd.xlane.f32.xlu1 %v2772_v19 }
0x19b3   :  { %v2769_v55 = vpop.xlane.xlu0 %2768 }
0x19b4   :  { %v2770_v39 = vmul.f32 0.013888889, %v2769_v55 }
0x19b5   :  { %v2774_v34 = vpop.xlane.xlu1 %2773 }
0x19b6   :  { %v2776_v56 = vmul.f32 %v2770_v39, %v2770_v39  ;;  %v2775_v60 = vmul.f32 0.013888889, %v2774_v34  ;;  %v2778_v62 = vsub.f32 %v2764_v7, %v2770_v39 }
0x19b8   :  { %v2777_v37 = vsub.f32 %v2775_v60, %v2776_v56 }
0x19ba   :  { %v2779_v43 = vadd.f32 1e-05, %v2777_v37 }
0x19bc   :  { %5947 = vrsqrt.f32 %v2779_v43 }
0x19c9   :  { %v5948_v44 = vpop.eup %5947 }
0x19ca   :  { %v2781_v63 = vmul.f32 %v5948_v44, %v2778_v62 }
0x19cc   :  { %v2782_v61 = vmul.f32 %v2781_v63, %v6166_v6 }
0x19ce   :  { %v2783_v57 = vadd.f32 %v2782_v61, %v6335_v10 }
0x19d0   :  { %2788 = vrot.lane.b32.xlu1 %v2783_v57, %s6103_s13  ;;  %2785 = vrot.lane.b32.xlu0 %v2783_v57, %s6102_s12 }
0x19d4   :  { %2796 = vrot.lane.b32.xlu0 %v2783_v57, %s6104_s14 }
0x19d8   :  { %2792 = vrot.lane.b32.xlu0 %v2783_v57, %s6105_s15 }
0x1a42   :  { %v2789_v23 = vpop.permute.xlu1 %2788  ;;  %v2786_v5 = vpop.permute.xlu0 %2785 }
0x1a43   :  { %v2791_v33 = vsel %vm199_vm1, %v2786_v5, %v2789_v23 }
0x1a44   :  { %v2873_v26 = vmul.f32 %v2791_v33, %v2783_v57 }
0x1a46   :  { %5656 = vmatmul.mubr.msk.f32.vlgmr.msra.gmra.mxu1 %vm558_vm4, %v2873_v26  ;;  %v2797_v40 = vpop.permute.xlu0 %2796 }
0x1a47   :  { %5670 = vmatpush3.msra.mxu1 %v6408_v20  ;;  %v2799_v1 = vmul.f32 %v2797_v40, %v2783_v57  ;;  %5677 = vmatprep.mubr.msk.f32.mxu1 %vm6101_vm2, %v6100_v17 }
0x1a48   :  { %5671 = vmatprep.subr.mxu1 %v6100_v17 }
0x1a49   :  { %5672 = vmatpush3.msra.mxu1 %v6406_v3  ;;  %5645 = vmatmul.mubr.msk.f32.vlgmr.msra.gmra.mxu0 %vm558_vm4, %v2799_v1 }
0x1a4a   :  { %5659 = vmatpush3.msra.mxu0 %v6408_v20  ;;  %5673 = vmatprep.subr.mxu1 %v6100_v17  ;;  %v2793_v28 = vpop.permute.xlu0 %2792 }
0x1a4b   :  { %5660 = vmatprep.subr.mxu0 %v6100_v17  ;;  %5674 = vmatpush3.msra.mxu1 %v6416_v29  ;;  %v2795_v11 = vsel %vm199_vm1, %v2793_v28, %v2786_v5 }
0x1a4c   :  { %5661 = vmatpush3.msra.mxu0 %v6406_v3  ;;  %5675 = vmatprep.subr.mxu1 %v6100_v17 }
0x1a4d   :  { %5662 = vmatprep.subr.mxu0 %v6100_v17  ;;  %5676 = vmatpush3.msra.mxu1 %v6424_v30 }
0x1a4e   :  { %2955 = vrot.lane.b32.xlu0 %v2795_v11, %s6098_s30  ;;  %5663 = vmatpush3.msra.mxu0 %v6416_v29 }
0x1a4f   :  { %5664 = vmatprep.subr.mxu0 %v6100_v17  ;;  %5666 = vmatprep.mubr.msk.f32.mxu0 %vm6101_vm2, %v6100_v17 }
0x1a50   :  { %5665 = vmatpush3.msra.mxu0 %v6424_v30  ;;  %5687 = vmatprep.subr.mxu1 %v6100_v17 }
0x1a51   :  { %5680 = vmatprep.subr.mxu0 %v6100_v17 }
0x1a52   :  { %2965 = vrot.lane.b32.xlu0 %v6242_v31, %s6106_s16 }
0x1ac0   :  { %v2956_v2 = vpop.permute.xlu0 %2955 }
0x1ac1   :  { %v2958_v38 = vsub.f32 %v2783_v57, %v2956_v2 }
0x1ac3   :  { %2960 = vrot.lane.b32.xlu1 %v2958_v38, %s6098_s30 }
0x1ac4   :  { %v2966_v37 = vpop.permute.xlu0 %2965 }
0x1ac5   :  { %v2968_v31 = vsel %vm199_vm1, %v6800_v12, %v2966_v37 }
0x1b06   :  { %v2943_v7 = vpop.f32.mrf.mxu1 }
0x1b08   :  { %v5657_v18 = vpop.f32.mrf.mxu1 }
0x1b09   :  { %v2869_v25 = vpop.f32.mrf.mxu0 }
0x1b0a   :  { %v2947_v19 = vsub.f32 %v2869_v25, %v2943_v7 }
0x1b0b   :  { %v5646_v41 = vpop.f32.mrf.mxu0 }
0x1b0c   :  { %v5085_v55 = vmul.f32 -1.442695, %v2947_v19 }
0x1b0e   :  { %5949 = vpow2.f32 %v5085_v55 }
0x1b1b   :  { %v5950_v39 = vpop.eup %5949 }
0x1b1c   :  { %v2951_v34 = vadd.f32 1.0, %v5950_v39 }
0x1b1e   :  { %5951 = vrcp.f32 %v2951_v34 }
0x1b2b   :  { %v5952_v56 = vpop.eup %5951 }
0x1b35   :  { %v2961_v60 = vpop.permute.xlu1 %2960 }
0x1b36   :  { %v2963_v43 = vmul.f32 %v5952_v56, %v2961_v60  ;;  %v428_v60 = vadd.f32 %v6374_v49, %v6467_v9 }
0x1b38   :  { %v2964_v62 = vadd.f32 %v2963_v43, %v2795_v11 }
0x1b3a   :  { %v2969_v44 = vadd.f32 %v2968_v31, %v2964_v62 }
0x1b3c   :  { %v2970_v63 = vsel %vm558_vm4, %v2969_v44, 0.0  ;;  %v2974_v61 = vmul.f32 %v2969_v44, %v2969_v44 }
0x1b3d   :  { %2971 = vadd.xlane.f32.xlu1 %v2970_v63 }
0x1b3e   :  { %v2975_v57 = vsel %vm558_vm4, %v2974_v61, 0.0 }
0x1b3f   :  { %2976 = vadd.xlane.f32.xlu0 %v2975_v57 }
0x1b55   :  { %3235 = vrot.lane.b32.xlu0 %v6800_v12, %s6106_s16 }
0x1bc6   :  { %v2972_v23 = vpop.xlane.xlu1 %2971 }
0x1bc7   :  { %v2973_v5 = vmul.f32 0.041666668, %v2972_v23 }
0x1bc8   :  { %v2977_v33 = vpop.xlane.xlu0 %2976 }
0x1bc9   :  { %v2979_v26 = vmul.f32 %v2973_v5, %v2973_v5  ;;  %v2978_v40 = vmul.f32 0.041666668, %v2977_v33  ;;  %v2981_v11 = vsub.f32 %v2969_v44, %v2973_v5 }
0x1bcb   :  { %v2980_v1 = vsub.f32 %v2978_v40, %v2979_v26 }
0x1bcc   :  { %v3236_v33 = vpop.permute.xlu0 %3235 }
0x1bcd   :  { %v2982_v28 = vadd.f32 1e-05, %v2980_v1 }
0x1bcf   :  { %5953 = vrsqrt.f32 %v2982_v28 }
0x1bd0   :  { %5955 = vtanh.f32 %v6800_v12 }
0x1bdc   :  { %v5954_v2 = vpop.eup %5953 }
0x1bdd   :  { %v2984_v38 = vmul.f32 %v5954_v2, %v2981_v11  ;;  %v5956_v25 = vpop.eup %5955 }
0x1bdf   :  { %v2985_v7 = vmul.f32 %v2984_v38, %v6386_v14 }
0x1be1   :  { %v2986_v18 = vadd.f32 %v2985_v7, %v6431_v51 }
0x1be3   :  { %5667 = vmatmul.mubr.msk.f32.vlgmr.msra.gmra.mxu0 %vm558_vm4, %v2986_v18 }
0x1be4   :  { %5681 = vmatpush3.msra.mxu0 %v6437_v58  ;;  %5684 = vmatprep.mubr.msk.f32.mxu0 %vm6101_vm2, %v6100_v17 }
0x1be5   :  { %5682 = vmatprep.subr.mxu0 %v6100_v17 }
0x1be6   :  { %5683 = vmatpush3.msra.mxu0 %v6440_v59 }
0x1be7   :  { %5685 = vmatmul.mubr.msk.f32.vlgmr.msra.gmra.mxu0 %vm199_vm1, %v5956_v25  ;;  %5694 = vmatprep.subr.mxu0 %v6100_v17 }
0x1be8   :  { %5695 = vmatpush3.msra.mxu0 %v6697_v13  ;;  %5702 = vmatprep.mubr.msk.f32.mxu0 %vm6101_vm2, %v6100_v17 }
0x1be9   :  { %5696 = vmatprep.subr.mxu0 %v6100_v17 }
0x1bea   :  { %5697 = vmatpush3.msra.mxu0 %v6706_v52 }
0x1beb   :  { %5698 = vmatprep.subr.mxu0 %v6100_v17 }
0x1bec   :  { %5699 = vmatpush3.msra.mxu0 %v6713_v22 }
0x1bed   :  { %5700 = vmatprep.subr.mxu0 %v6100_v17 }
0x1bee   :  { %5701 = vmatpush3.msra.mxu0 %v6660_v8 }
0x1bef   :  { %5716 = vmatprep.subr.mxu0 %v6100_v17 }
0x1ca3   :  { %v3056_v41 = vpop.f32.mrf.mxu0 }
0x1ca4   :  { %v3057_v19 = vadd.f32 %v3056_v41, %v6433_v54 }
0x1ca5   :  { %v5668_v55 = vpop.f32.mrf.mxu0 }
0x1ca6   :  { %v3060_v39 = vmax.f32 %v3057_v19, 0.0 }
0x1ca7   :  { %v3223_v34 = vpop.f32.mrf.mxu0 }
0x1ca8   :  { %5678 = vmatmul.mubr.msk.f32.vlgmr.msra.gmra.mxu1 %vm558_vm4, %v3060_v39  ;;  %v3224_v37 = vadd.f32 %v3223_v34, %v428_v60 }
0x1ca9   :  { %v5686_v56 = vpop.f32.mrf.mxu0  ;;  %5688 = vmatpush3.msra.mxu1 %v6669_v0  ;;  %5691 = vmatprep.mubr.msk.f32.mxu1 %vm6101_vm2, %v6100_v17 }
0x1caa   :  { %5689 = vmatprep.subr.mxu1 %v6100_v17  ;;  %v5089_v43 = vmul.f32 -1.442695, %v3224_v37  ;;  %v316_v37 = vadd.f32 %v6275_v42, %v6283_v46 }
0x1cab   :  { %5690 = vmatpush3.msra.mxu1 %v6678_v16 }
0x1cac   :  { %5705 = vmatprep.subr.mxu1 %v6100_v17  ;;  %5957 = vpow2.f32 %v5089_v43 }
0x1cb9   :  { %v5958_v63 = vpop.eup %5957 }
0x1cba   :  { %v3230_v57 = vadd.f32 1.0, %v5958_v63 }
0x1cbc   :  { %5959 = vrcp.f32 %v3230_v57 }
0x1cc9   :  { %v5960_v49 = vpop.eup %5959 }
0x1cca   :  { %v3238_v26 = vmul.f32 %v5960_v49, %v3236_v33 }
0x1d68   :  { %v3130_v62 = vpop.f32.mrf.mxu1 }
0x1d69   :  { %v3131_v31 = vadd.f32 %v3130_v62, %v6433_v54 }
0x1d6a   :  { %v5679_v44 = vpop.f32.mrf.mxu1 }
0x1d6b   :  { %v3134_v0 = vmax.f32 %v3131_v31, 0.0 }
0x1d6d   :  { %v3135_v61 = vadd.f32 %v3134_v0, %v2986_v18 }
0x1d6f   :  { %v3136_v23 = vsel %vm558_vm4, %v3135_v61, 0.0  ;;  %v3140_v5 = vmul.f32 %v3135_v61, %v3135_v61 }
0x1d70   :  { %3137 = vadd.xlane.f32.xlu1 %v3136_v23 }
0x1d71   :  { %v3141_v16 = vsel %vm558_vm4, %v3140_v5, 0.0 }
0x1d74   :  { %3142 = vadd.xlane.f32.xlu1 %v3141_v16 }
0x1d85   :  { %3240 = vrot.lane.b32.xlu1 %v3238_v26, %s6103_s13 }
0x1df9   :  { %v3138_v40 = vpop.xlane.xlu1 %3137 }
0x1dfa   :  { %v3139_v1 = vmul.f32 0.041666668, %v3138_v40 }
0x1dfc   :  { %v3145_v11 = vmul.f32 %v3139_v1, %v3139_v1  ;;  %v3147_v18 = vsub.f32 %v3135_v61, %v3139_v1 }
0x1dfd   :  { %v3143_v28 = vpop.xlane.xlu1 %3142 }
0x1dfe   :  { %v3144_v2 = vmul.f32 0.041666668, %v3143_v28 }
0x1e00   :  { %v3146_v38 = vsub.f32 %v3144_v2, %v3145_v11 }
0x1e01   :  { %v3241_v56 = vpop.permute.xlu1 %3240 }
0x1e02   :  { %v3148_v7 = vadd.f32 1e-05, %v3146_v38 }
0x1e04   :  { %5961 = vrsqrt.f32 %v3148_v7 }
0x1e11   :  { %v5962_v25 = vpop.eup %5961 }
0x1e12   :  { %v3150_v41 = vmul.f32 %v5962_v25, %v3147_v18 }
0x1e14   :  { %v3151_v19 = vmul.f32 %v3150_v41, %v6479_v4 }
0x1e16   :  { %v3152_v55 = vadd.f32 %v3151_v19, %v6481_v15 }
0x1e18   :  { %5963 = vtanh.f32 %v3152_v55 }
0x1e25   :  { %v5964_v39 = vpop.eup %5963 }
0x1e26   :  { %v3234_v34 = vmul.f32 %v5964_v39, %v5960_v49 }
0x1e28   :  { %v6895_v60 = vadd.f32 %v3241_v56, %v3234_v34 }
0x1e2a   :  { %5692 = vmatmul.mubr.msk.f32.vlgmr.msra.gmra.mxu1 %vm199_vm1, %v6895_v60 }
0x1e2b   :  { %5706 = vmatpush3.msra.mxu1 %v6697_v13  ;;  %5713 = vmatprep.mubr.msk.f32.mxu1 %vm6101_vm2, %v6100_v17 }
0x1e2c   :  { %5707 = vmatprep.subr.mxu1 %v6100_v17 }
0x1e2d   :  { %5708 = vmatpush3.msra.mxu1 %v6706_v52 }
0x1e2e   :  { %5709 = vmatprep.subr.mxu1 %v6100_v17 }
0x1e2f   :  { %5710 = vmatpush3.msra.mxu1 %v6713_v22 }
0x1e30   :  { %5711 = vmatprep.subr.mxu1 %v6100_v17 }
0x1e31   :  { %5712 = vmatpush3.msra.mxu1 %v6660_v8 }
0x1e32   :  { %5727 = vmatprep.subr.mxu1 %v6100_v17 }
0x1eea   :  { %v3313_v43 = vpop.f32.mrf.mxu1 }
0x1eeb   :  { %v3314_v62 = vadd.f32 %v3313_v43, %v316_v37 }
0x1eec   :  { %v5693_v31 = vpop.f32.mrf.mxu1 }
0x1eed   :  { %v3317_v44 = vsel %vm520_vm3, %v3314_v62, 0.0  ;;  %v3321_v0 = vmul.f32 %v3314_v62, %v3314_v62 }
0x1eee   :  { %3318 = vadd.xlane.f32.xlu0 %v3317_v44 }
0x1eef   :  { %v3322_v63 = vsel %vm520_vm3, %v3321_v0, 0.0 }
0x1ef0   :  { %3323 = vadd.xlane.f32.xlu1 %v3322_v63 }
0x1f77   :  { %v3319_v61 = vpop.xlane.xlu0 %3318 }
0x1f78   :  { %v3320_v57 = vmul.f32 0.013888889, %v3319_v61 }
0x1f79   :  { %v3324_v23 = vpop.xlane.xlu1 %3323 }
0x1f7a   :  { %v3326_v5 = vmul.f32 %v3320_v57, %v3320_v57  ;;  %v3325_v8 = vmul.f32 0.013888889, %v3324_v23  ;;  %v3328_v33 = vsub.f32 %v3314_v62, %v3320_v57 }
0x1f7c   :  { %v3327_v16 = vsub.f32 %v3325_v8, %v3326_v5 }
0x1f7e   :  { %v3329_v49 = vadd.f32 1e-05, %v3327_v16 }
0x1f80   :  { %5965 = vrsqrt.f32 %v3329_v49 }
0x1f8d   :  { %v5966_v42 = vpop.eup %5965 }
0x1f8e   :  { %v3331_v26 = vmul.f32 %v5966_v42, %v3328_v33 }
0x1f90   :  { %v3332_v40 = vmul.f32 %v3331_v26, %v6166_v6 }
0x1f92   :  { %v3333_v1 = vadd.f32 %v3332_v40, %v6335_v10 }
0x1f94   :  { %3338 = vrot.lane.b32.xlu1 %v3333_v1, %s6103_s13  ;;  %3335 = vrot.lane.b32.xlu0 %v3333_v1, %s6102_s12 }
0x1f98   :  { %3346 = vrot.lane.b32.xlu0 %v3333_v1, %s6104_s14 }
0x1f9c   :  { %3342 = vrot.lane.b32.xlu0 %v3333_v1, %s6105_s15 }
0x2006   :  { %v3339_v28 = vpop.permute.xlu1 %3338  ;;  %v3336_v11 = vpop.permute.xlu0 %3335 }
0x2007   :  { %v3341_v2 = vsel %vm199_vm1, %v3336_v11, %v3339_v28 }
0x2008   :  { %v3423_v38 = vmul.f32 %v3341_v2, %v3333_v1 }
0x200a   :  { %5714 = vmatmul.mubr.msk.f32.vlgmr.msra.gmra.mxu1 %vm558_vm4, %v3423_v38  ;;  %v3347_v7 = vpop.permute.xlu0 %3346 }
0x200b   :  { %5728 = vmatpush3.msra.mxu1 %v6408_v20  ;;  %v3349_v18 = vmul.f32 %v3347_v7, %v3333_v1  ;;  %5735 = vmatprep.mubr.msk.f32.mxu1 %vm6101_vm2, %v6100_v17 }
0x200c   :  { %5729 = vmatprep.subr.mxu1 %v6100_v17 }
0x200d   :  { %5730 = vmatpush3.msra.mxu1 %v6406_v3  ;;  %5703 = vmatmul.mubr.msk.f32.vlgmr.msra.gmra.mxu0 %vm558_vm4, %v3349_v18 }
0x200e   :  { %5717 = vmatpush3.msra.mxu0 %v6408_v20  ;;  %5731 = vmatprep.subr.mxu1 %v6100_v17  ;;  %v3343_v25 = vpop.permute.xlu0 %3342 }
0x200f   :  { %5718 = vmatprep.subr.mxu0 %v6100_v17  ;;  %5732 = vmatpush3.msra.mxu1 %v6416_v29  ;;  %v3345_v41 = vsel %vm199_vm1, %v3343_v25, %v3336_v11 }
0x2010   :  { %5719 = vmatpush3.msra.mxu0 %v6406_v3  ;;  %5733 = vmatprep.subr.mxu1 %v6100_v17 }
0x2011   :  { %5720 = vmatprep.subr.mxu0 %v6100_v17  ;;  %5734 = vmatpush3.msra.mxu1 %v6424_v30 }
0x2012   :  { %3505 = vrot.lane.b32.xlu1 %v3345_v41, %s6098_s30  ;;  %5721 = vmatpush3.msra.mxu0 %v6416_v29 }
0x2013   :  { %5722 = vmatprep.subr.mxu0 %v6100_v17  ;;  %5724 = vmatprep.mubr.msk.f32.mxu0 %vm6101_vm2, %v6100_v17 }
0x2014   :  { %5723 = vmatpush3.msra.mxu0 %v6424_v30  ;;  %5745 = vmatprep.subr.mxu1 %v6100_v17 }
0x2015   :  { %5738 = vmatprep.subr.mxu0 %v6100_v17 }
0x2016   :  { %3515 = vrot.lane.b32.xlu1 %v6244_v32, %s6106_s16 }
0x2084   :  { %v3506_v19 = vpop.permute.xlu1 %3505 }
0x2085   :  { %v3508_v55 = vsub.f32 %v3333_v1, %v3506_v19  ;;  %v6975_v19 = vld [vmem:[%s7280_s3 + $0x10] sm:$0xff] }
0x2087   :  { %3510 = vrot.lane.b32.xlu0 %v3508_v55, %s6098_s30 }
0x2088   :  { %v3516_v61 = vpop.permute.xlu1 %3515 }
0x2089   :  { %v3518_v32 = vsel %vm199_vm1, %v6895_v60, %v3516_v61 }
0x20ca   :  { %v3493_v39 = vpop.f32.mrf.mxu1 }
0x20cc   :  { %v5715_v34 = vpop.f32.mrf.mxu1 }
0x20cd   :  { %v3419_v56 = vpop.f32.mrf.mxu0 }
0x20ce   :  { %v3497_v43 = vsub.f32 %v3419_v56, %v3493_v39  ;;  %v6984_v56 = vld [vmem:[%s7279_s2 + $0x8] sm:$0xff] }
0x20cf   :  { %v5704_v37 = vpop.f32.mrf.mxu0 }
0x20d0   :  { %v5093_v62 = vmul.f32 -1.442695, %v3497_v43  ;;  %v6993_v37 = vld [vmem:[%s7279_s2] sm:$0xff]  ;;  %v433_v43 = vadd.f32 %v6372_v48, %v6467_v9 }
0x20d2   :  { %5967 = vpow2.f32 %v5093_v62 }
0x20df   :  { %v5968_v31 = vpop.eup %5967 }
0x20e0   :  { %v3501_v44 = vadd.f32 1.0, %v5968_v31 }
0x20e2   :  { %5969 = vrcp.f32 %v3501_v44 }
0x20ef   :  { %v5970_v0 = vpop.eup %5969 }
0x20f9   :  { %v3511_v63 = vpop.permute.xlu0 %3510 }
0x20fa   :  { %v3513_v57 = vmul.f32 %v5970_v0, %v3511_v63 }
0x20fc   :  { %v3514_v23 = vadd.f32 %v3513_v57, %v3345_v41 }
0x20fe   :  { %v3519_v5 = vadd.f32 %v3518_v32, %v3514_v23 }
0x2100   :  { %v3520_v8 = vsel %vm558_vm4, %v3519_v5, 0.0  ;;  %v3524_v16 = vmul.f32 %v3519_v5, %v3519_v5 }
0x2101   :  { %3521 = vadd.xlane.f32.xlu0 %v3520_v8 }
0x2102   :  { %v3525_v49 = vsel %vm558_vm4, %v3524_v16, 0.0 }
0x2103   :  { %3526 = vadd.xlane.f32.xlu1 %v3525_v49 }
0x2117   :  { %3785 = vrot.lane.b32.xlu0 %v6895_v60, %s6106_s16 }
0x218a   :  { %v3522_v33 = vpop.xlane.xlu0 %3521 }
0x218b   :  { %v3523_v42 = vmul.f32 0.041666668, %v3522_v33 }
0x218c   :  { %v3527_v26 = vpop.xlane.xlu1 %3526 }
0x218d   :  { %v3529_v40 = vmul.f32 %v3523_v42, %v3523_v42  ;;  %v3528_v1 = vmul.f32 0.041666668, %v3527_v26  ;;  %v3531_v2 = vsub.f32 %v3519_v5, %v3523_v42 }
0x218e   :  { %v3786_v49 = vpop.permute.xlu0 %3785 }
0x218f   :  { %v3530_v28 = vsub.f32 %v3528_v1, %v3529_v40 }
0x2191   :  { %v3532_v11 = vadd.f32 1e-05, %v3530_v28 }
0x2193   :  { %5971 = vrsqrt.f32 %v3532_v11 }
0x2194   :  { %5973 = vtanh.f32 %v6895_v60 }
0x21a0   :  { %v5972_v38 = vpop.eup %5971 }
0x21a1   :  { %v3534_v7 = vmul.f32 %v5972_v38, %v3531_v2  ;;  %v5974_v41 = vpop.eup %5973 }
0x21a3   :  { %v3535_v18 = vmul.f32 %v3534_v7, %v6386_v14 }
0x21a5   :  { %v3536_v25 = vadd.f32 %v3535_v18, %v6431_v51 }
0x21a7   :  { %5725 = vmatmul.mubr.msk.f32.vlgmr.msra.gmra.mxu0 %vm558_vm4, %v3536_v25 }
0x21a8   :  { %5739 = vmatpush3.msra.mxu0 %v6437_v58  ;;  %5742 = vmatprep.mubr.msk.f32.mxu0 %vm6101_vm2, %v6100_v17 }
0x21a9   :  { %5740 = vmatprep.subr.mxu0 %v6100_v17 }
0x21aa   :  { %5741 = vmatpush3.msra.mxu0 %v6440_v59 }
0x21ab   :  { %5743 = vmatmul.mubr.msk.f32.vlgmr.msra.gmra.mxu0 %vm199_vm1, %v5974_v41  ;;  %5752 = vmatprep.subr.mxu0 %v6100_v17 }
0x21ac   :  { %5753 = vmatpush3.msra.mxu0 %v6697_v13  ;;  %5760 = vmatprep.mubr.msk.f32.mxu0 %vm6101_vm2, %v6100_v17 }
0x21ad   :  { %5754 = vmatprep.subr.mxu0 %v6100_v17 }
0x21ae   :  { %5755 = vmatpush3.msra.mxu0 %v6706_v52 }
0x21af   :  { %5756 = vmatprep.subr.mxu0 %v6100_v17 }
0x21b0   :  { %5757 = vmatpush3.msra.mxu0 %v6713_v22 }
0x21b1   :  { %5758 = vmatprep.subr.mxu0 %v6100_v17 }
0x21b2   :  { %5759 = vmatpush3.msra.mxu0 %v6975_v19 }
0x21b3   :  { %5774 = vmatprep.subr.mxu0 %v6100_v17 }
0x2267   :  { %v3606_v13 = vpop.f32.mrf.mxu0 }
0x2268   :  { %v3607_v55 = vadd.f32 %v3606_v13, %v6433_v54 }
0x2269   :  { %v5726_v39 = vpop.f32.mrf.mxu0 }
0x226a   :  { %v3610_v52 = vmax.f32 %v3607_v55, 0.0 }
0x226b   :  { %v3773_v34 = vpop.f32.mrf.mxu0 }
0x226c   :  { %5736 = vmatmul.mubr.msk.f32.vlgmr.msra.gmra.mxu1 %vm558_vm4, %v3610_v52  ;;  %v3774_v62 = vadd.f32 %v3773_v34, %v433_v43  ;;  %v7012_v34 = vld [vmem:[%s7280_s3 + $0x28] sm:$0xff]  ;;  %v7028_v43 = vld [vmem:[%s7280_s3 + $0x18] sm:$0xff] }
0x226d   :  { %v5744_v22 = vpop.f32.mrf.mxu0  ;;  %5746 = vmatpush3.msra.mxu1 %v6984_v56  ;;  %5749 = vmatprep.mubr.msk.f32.mxu1 %vm6101_vm2, %v6100_v17 }
0x226e   :  { %5747 = vmatprep.subr.mxu1 %v6100_v17  ;;  %v5097_v31 = vmul.f32 -1.442695, %v3774_v62  ;;  %v7021_v22 = vld [vmem:[%s7280_s3 + $0x20] sm:$0xff]  ;;  %v321_v62 = vadd.f32 %v6285_v47, %v6283_v46  ;;  %s6107_s3 = smov [#allocation6]  }
0x226f   :  { %5748 = vmatpush3.msra.mxu1 %v6993_v37 }
0x2270   :  { %5763 = vmatprep.subr.mxu1 %v6100_v17  ;;  %5975 = vpow2.f32 %v5097_v31 }
0x227d   :  { %v5976_v57 = vpop.eup %5975 }
0x227e   :  { %v3780_v32 = vadd.f32 1.0, %v5976_v57 }
0x2280   :  { %5977 = vrcp.f32 %v3780_v32 }
0x228d   :  { %v5978_v48 = vpop.eup %5977 }
0x228e   :  { %v3788_v33 = vmul.f32 %v5978_v48, %v3786_v49 }
0x232c   :  { %v3680_v44 = vpop.f32.mrf.mxu1 }
0x232d   :  { %v3681_v0 = vadd.f32 %v3680_v44, %v6433_v54 }
0x232e   :  { %v5737_v63 = vpop.f32.mrf.mxu1 }
0x232f   :  { %v3684_v61 = vmax.f32 %v3681_v0, 0.0 }
0x2331   :  { %v3685_v23 = vadd.f32 %v3684_v61, %v3536_v25 }
0x2333   :  { %v3686_v5 = vsel %vm558_vm4, %v3685_v23, 0.0  ;;  %v3690_v8 = vmul.f32 %v3685_v23, %v3685_v23 }
0x2334   :  { %3687 = vadd.xlane.f32.xlu1 %v3686_v5 }
0x2335   :  { %v3691_v16 = vsel %vm558_vm4, %v3690_v8, 0.0 }
0x2338   :  { %3692 = vadd.xlane.f32.xlu1 %v3691_v16 }
0x2349   :  { %3790 = vrot.lane.b32.xlu1 %v3788_v33, %s6103_s13 }
0x23bd   :  { %v3688_v42 = vpop.xlane.xlu1 %3687 }
0x23be   :  { %v3689_v26 = vmul.f32 0.041666668, %v3688_v42 }
0x23c0   :  { %v3695_v1 = vmul.f32 %v3689_v26, %v3689_v26  ;;  %v3697_v38 = vsub.f32 %v3685_v23, %v3689_v26 }
0x23c1   :  { %v3693_v40 = vpop.xlane.xlu1 %3692 }
0x23c2   :  { %v3694_v28 = vmul.f32 0.041666668, %v3693_v40 }
0x23c4   :  { %v3696_v11 = vsub.f32 %v3694_v28, %v3695_v1 }
0x23c5   :  { %v3791_v39 = vpop.permute.xlu1 %3790 }
0x23c6   :  { %v3698_v2 = vadd.f32 1e-05, %v3696_v11 }
0x23c8   :  { %5979 = vrsqrt.f32 %v3698_v2 }
0x23d5   :  { %v5980_v7 = vpop.eup %5979 }
0x23d6   :  { %v3700_v18 = vmul.f32 %v5980_v7, %v3697_v38 }
0x23d8   :  { %v3701_v25 = vmul.f32 %v3700_v18, %v6479_v4 }
0x23da   :  { %v3702_v41 = vadd.f32 %v3701_v25, %v6481_v15 }
0x23dc   :  { %5981 = vtanh.f32 %v3702_v41 }
0x23e9   :  { %v5982_v13 = vpop.eup %5981 }
0x23ea   :  { %v3784_v55 = vmul.f32 %v5982_v13, %v5978_v48 }
0x23ec   :  { %v7005_v52 = vadd.f32 %v3791_v39, %v3784_v55 }
0x23ee   :  { %5750 = vmatmul.mubr.msk.f32.vlgmr.msra.gmra.mxu1 %vm199_vm1, %v7005_v52 }
0x23ef   :  { %5764 = vmatpush3.msra.mxu1 %v7012_v34  ;;  %5771 = vmatprep.mubr.msk.f32.mxu1 %vm6101_vm2, %v6100_v17 }
0x23f0   :  { %5765 = vmatprep.subr.mxu1 %v6100_v17 }
0x23f1   :  { %5766 = vmatpush3.msra.mxu1 %v7021_v22 }
0x23f2   :  { %5767 = vmatprep.subr.mxu1 %v6100_v17 }
0x23f3   :  { %5768 = vmatpush3.msra.mxu1 %v7028_v43 }
0x23f4   :  { %5769 = vmatprep.subr.mxu1 %v6100_v17 }
0x23f5   :  { %5770 = vmatpush3.msra.mxu1 %v6975_v19 }
0x23f6   :  { %5785 = vmatprep.subr.mxu1 %v6100_v17 }
0x24ae   :  { %v3863_v31 = vpop.f32.mrf.mxu1 }
0x24af   :  { %v3864_v44 = vadd.f32 %v3863_v31, %v321_v62 }
0x24b0   :  { %v5751_v0 = vpop.f32.mrf.mxu1 }
0x24b1   :  { %v3867_v63 = vsel %vm520_vm3, %v3864_v44, 0.0  ;;  %v3871_v61 = vmul.f32 %v3864_v44, %v3864_v44 }
0x24b2   :  { %3868 = vadd.xlane.f32.xlu0 %v3867_v63 }
0x24b3   :  { %v3872_v57 = vsel %vm520_vm3, %v3871_v61, 0.0 }
0x24b4   :  { %3873 = vadd.xlane.f32.xlu1 %v3872_v57 }
0x253b   :  { %v3869_v23 = vpop.xlane.xlu0 %3868 }
0x253c   :  { %v3870_v32 = vmul.f32 0.013888889, %v3869_v23 }
0x253d   :  { %v3874_v5 = vpop.xlane.xlu1 %3873 }
0x253e   :  { %v3876_v8 = vmul.f32 %v3870_v32, %v3870_v32  ;;  %v3875_v16 = vmul.f32 0.013888889, %v3874_v5  ;;  %v3878_v33 = vsub.f32 %v3864_v44, %v3870_v32 }
0x2540   :  { %v3877_v48 = vsub.f32 %v3875_v16, %v3876_v8 }
0x2542   :  { %v3879_v49 = vadd.f32 1e-05, %v3877_v48 }
0x2544   :  { %5983 = vrsqrt.f32 %v3879_v49 }
0x2551   :  { %v5984_v47 = vpop.eup %5983 }
0x2552   :  { %v3881_v42 = vmul.f32 %v5984_v47, %v3878_v33 }
0x2554   :  { %v3882_v26 = vmul.f32 %v3881_v42, %v6166_v6 }
0x2556   :  { %v3883_v40 = vadd.f32 %v3882_v26, %v6335_v10 }
0x2558   :  { %3888 = vrot.lane.b32.xlu1 %v3883_v40, %s6103_s13  ;;  %3885 = vrot.lane.b32.xlu0 %v3883_v40, %s6102_s12 }
0x255c   :  { %3896 = vrot.lane.b32.xlu0 %v3883_v40, %s6104_s14 }
0x2560   :  { %3892 = vrot.lane.b32.xlu0 %v3883_v40, %s6105_s15 }
0x25ca   :  { %v3889_v1 = vpop.permute.xlu1 %3888  ;;  %v3886_v28 = vpop.permute.xlu0 %3885 }
0x25cb   :  { %v3891_v11 = vsel %vm199_vm1, %v3886_v28, %v3889_v1 }
0x25cc   :  { %v3973_v2 = vmul.f32 %v3891_v11, %v3883_v40 }
0x25ce   :  { %5772 = vmatmul.mubr.msk.f32.vlgmr.msra.gmra.mxu1 %vm558_vm4, %v3973_v2  ;;  %v3897_v38 = vpop.permute.xlu0 %3896 }
0x25cf   :  { %5786 = vmatpush3.msra.mxu1 %v6408_v20  ;;  %v3899_v7 = vmul.f32 %v3897_v38, %v3883_v40  ;;  %5793 = vmatprep.mubr.msk.f32.mxu1 %vm6101_vm2, %v6100_v17 }
0x25d0   :  { %5787 = vmatprep.subr.mxu1 %v6100_v17 }
0x25d1   :  { %5788 = vmatpush3.msra.mxu1 %v6406_v3  ;;  %5761 = vmatmul.mubr.msk.f32.vlgmr.msra.gmra.mxu0 %vm558_vm4, %v3899_v7 }
0x25d2   :  { %5775 = vmatpush3.msra.mxu0 %v6408_v20  ;;  %5789 = vmatprep.subr.mxu1 %v6100_v17  ;;  %v3893_v18 = vpop.permute.xlu0 %3892 }
0x25d3   :  { %5776 = vmatprep.subr.mxu0 %v6100_v17  ;;  %5790 = vmatpush3.msra.mxu1 %v6416_v29  ;;  %v3895_v25 = vsel %vm199_vm1, %v3893_v18, %v3886_v28 }
0x25d4   :  { %5777 = vmatpush3.msra.mxu0 %v6406_v3  ;;  %5791 = vmatprep.subr.mxu1 %v6100_v17 }
0x25d5   :  { %5778 = vmatprep.subr.mxu0 %v6100_v17  ;;  %5792 = vmatpush3.msra.mxu1 %v6424_v30 }
0x25d6   :  { %4055 = vrot.lane.b32.xlu0 %v3895_v25, %s6098_s30  ;;  %5779 = vmatpush3.msra.mxu0 %v6416_v29 }
0x25d7   :  { %5780 = vmatprep.subr.mxu0 %v6100_v17  ;;  %5782 = vmatprep.mubr.msk.f32.mxu0 %vm6101_vm2, %v6100_v17 }
0x25d8   :  { %5781 = vmatpush3.msra.mxu0 %v6424_v30  ;;  %5803 = vmatprep.subr.mxu1 %v6100_v17 }
0x25d9   :  { %5796 = vmatprep.subr.mxu0 %v6100_v17 }
0x25da   :  { %4065 = vrot.lane.b32.xlu0 %v6250_v35, %s6106_s16 }
0x2648   :  { %v4056_v41 = vpop.permute.xlu0 %4055 }
0x2649   :  { %v4058_v13 = vsub.f32 %v3883_v40, %v4056_v41 }
0x264b   :  { %4060 = vrot.lane.b32.xlu1 %v4058_v13, %s6098_s30 }
0x264c   :  { %v4066_v32 = vpop.permute.xlu0 %4065 }
0x264d   :  { %v4068_v35 = vsel %vm199_vm1, %v7005_v52, %v4066_v32 }
0x268e   :  { %v4043_v55 = vpop.f32.mrf.mxu1 }
0x2690   :  { %v5773_v39 = vpop.f32.mrf.mxu1 }
0x2691   :  { %v3969_v62 = vpop.f32.mrf.mxu0 }
0x2692   :  { %v4047_v44 = vsub.f32 %v3969_v62, %v4043_v55 }
0x2693   :  { %v5762_v31 = vpop.f32.mrf.mxu0 }
0x2694   :  { %v5101_v0 = vmul.f32 -1.442695, %v4047_v44 }
0x2696   :  { %5985 = vpow2.f32 %v5101_v0  ;;  %v438_v0 = vadd.f32 %v6378_v50, %v6467_v9 }
0x26a3   :  { %v5986_v63 = vpop.eup %5985 }
0x26a4   :  { %v4051_v61 = vadd.f32 1.0, %v5986_v63 }
0x26a6   :  { %5987 = vrcp.f32 %v4051_v61 }
0x26b3   :  { %v5988_v57 = vpop.eup %5987 }
0x26bd   :  { %v4061_v23 = vpop.permute.xlu1 %4060 }
0x26be   :  { %v4063_v5 = vmul.f32 %v5988_v57, %v4061_v23 }
0x26c0   :  { %v4064_v8 = vadd.f32 %v4063_v5, %v3895_v25 }
0x26c2   :  { %v4069_v16 = vadd.f32 %v4068_v35, %v4064_v8 }
0x26c4   :  { %v4070_v48 = vsel %vm558_vm4, %v4069_v16, 0.0  ;;  %v4074_v49 = vmul.f32 %v4069_v16, %v4069_v16 }
0x26c5   :  { %4071 = vadd.xlane.f32.xlu1 %v4070_v48 }
0x26c6   :  { %v4075_v33 = vsel %vm558_vm4, %v4074_v49, 0.0 }
0x26c7   :  { %4076 = vadd.xlane.f32.xlu0 %v4075_v33 }
0x26dd   :  { %4335 = vrot.lane.b32.xlu0 %v7005_v52, %s6106_s16 }
0x274e   :  { %v4072_v47 = vpop.xlane.xlu1 %4071 }
0x274f   :  { %v4073_v42 = vmul.f32 0.041666668, %v4072_v47 }
0x2750   :  { %v4077_v26 = vpop.xlane.xlu0 %4076 }
0x2751   :  { %v4079_v40 = vmul.f32 %v4073_v42, %v4073_v42  ;;  %v4078_v1 = vmul.f32 0.041666668, %v4077_v26  ;;  %v4081_v2 = vsub.f32 %v4069_v16, %v4073_v42 }
0x2753   :  { %v4080_v28 = vsub.f32 %v4078_v1, %v4079_v40 }
0x2754   :  { %v4336_v49 = vpop.permute.xlu0 %4335 }
0x2755   :  { %v4082_v11 = vadd.f32 1e-05, %v4080_v28 }
0x2757   :  { %5989 = vrsqrt.f32 %v4082_v11 }
0x2758   :  { %5991 = vtanh.f32 %v7005_v52 }
0x2764   :  { %v5990_v38 = vpop.eup %5989 }
0x2765   :  { %v4084_v7 = vmul.f32 %v5990_v38, %v4081_v2  ;;  %v5992_v41 = vpop.eup %5991 }
0x2767   :  { %v4085_v18 = vmul.f32 %v4084_v7, %v6386_v14 }
0x2769   :  { %v4086_v25 = vadd.f32 %v4085_v18, %v6431_v51 }
0x276b   :  { %5783 = vmatmul.mubr.msk.f32.vlgmr.msra.gmra.mxu0 %vm558_vm4, %v4086_v25 }
0x276c   :  { %5797 = vmatpush3.msra.mxu0 %v6437_v58  ;;  %5800 = vmatprep.mubr.msk.f32.mxu0 %vm6101_vm2, %v6100_v17 }
0x276d   :  { %5798 = vmatprep.subr.mxu0 %v6100_v17 }
0x276e   :  { %5799 = vmatpush3.msra.mxu0 %v6440_v59 }
0x276f   :  { %5801 = vmatmul.mubr.msk.f32.vlgmr.msra.gmra.mxu0 %vm199_vm1, %v5992_v41  ;;  %5810 = vmatprep.subr.mxu0 %v6100_v17 }
0x2770   :  { %5811 = vmatpush3.msra.mxu0 %v7012_v34  ;;  %5818 = vmatprep.mubr.msk.f32.mxu0 %vm6101_vm2, %v6100_v17 }
0x2771   :  { %5812 = vmatprep.subr.mxu0 %v6100_v17 }
0x2772   :  { %5813 = vmatpush3.msra.mxu0 %v7021_v22 }
0x2773   :  { %5814 = vmatprep.subr.mxu0 %v6100_v17 }
0x2774   :  { %5815 = vmatpush3.msra.mxu0 %v7028_v43 }
0x2775   :  { %5816 = vmatprep.subr.mxu0 %v6100_v17 }
0x2776   :  { %5817 = vmatpush3.msra.mxu0 %v6975_v19 }
0x2777   :  { %5832 = vmatprep.subr.mxu0 %v6100_v17 }
0x282b   :  { %v4156_v13 = vpop.f32.mrf.mxu0 }
0x282c   :  { %v4157_v55 = vadd.f32 %v4156_v13, %v6433_v54 }
0x282d   :  { %v5784_v39 = vpop.f32.mrf.mxu0 }
0x282e   :  { %v4160_v62 = vmax.f32 %v4157_v55, 0.0 }
0x282f   :  { %v4323_v31 = vpop.f32.mrf.mxu0 }
0x2830   :  { %5794 = vmatmul.mubr.msk.f32.vlgmr.msra.gmra.mxu1 %vm558_vm4, %v4160_v62  ;;  %v4324_v63 = vadd.f32 %v4323_v31, %v438_v0 }
0x2831   :  { %v5802_v44 = vpop.f32.mrf.mxu0  ;;  %5804 = vmatpush3.msra.mxu1 %v6984_v56  ;;  %5807 = vmatprep.mubr.msk.f32.mxu1 %vm6101_vm2, %v6100_v17 }
0x2832   :  { %5805 = vmatprep.subr.mxu1 %v6100_v17  ;;  %v5105_v61 = vmul.f32 -1.442695, %v4324_v63 }
0x2833   :  { %5806 = vmatpush3.msra.mxu1 %v6993_v37 }
0x2834   :  { %5821 = vmatprep.subr.mxu1 %v6100_v17  ;;  %5993 = vpow2.f32 %v5105_v61 }
0x2841   :  { %v5994_v5 = vpop.eup %5993 }
0x2842   :  { %v4330_v35 = vadd.f32 1.0, %v5994_v5 }
0x2844   :  { %5995 = vrcp.f32 %v4330_v35 }
0x2851   :  { %v5996_v50 = vpop.eup %5995 }
0x2852   :  { %v4338_v33 = vmul.f32 %v5996_v50, %v4336_v49 }
0x28f0   :  { %v4230_v57 = vpop.f32.mrf.mxu1 }
0x28f1   :  { %v4231_v23 = vadd.f32 %v4230_v57, %v6433_v54 }
0x28f2   :  { %v5795_v32 = vpop.f32.mrf.mxu1 }
0x28f3   :  { %v4234_v56 = vmax.f32 %v4231_v23, 0.0 }
0x28f5   :  { %v4235_v8 = vadd.f32 %v4234_v56, %v4086_v25 }
0x28f7   :  { %v4236_v16 = vsel %vm558_vm4, %v4235_v8, 0.0  ;;  %v4240_v48 = vmul.f32 %v4235_v8, %v4235_v8 }
0x28f8   :  { %4237 = vadd.xlane.f32.xlu1 %v4236_v16 }
0x28f9   :  { %v4241_v37 = vsel %vm558_vm4, %v4240_v48, 0.0 }
0x28fc   :  { %4242 = vadd.xlane.f32.xlu1 %v4241_v37 }
0x290d   :  { %4340 = vrot.lane.b32.xlu1 %v4338_v33, %s6103_s13 }
0x2981   :  { %v4238_v47 = vpop.xlane.xlu1 %4237 }
0x2982   :  { %v4239_v42 = vmul.f32 0.041666668, %v4238_v47 }
0x2984   :  { %v4245_v40 = vmul.f32 %v4239_v42, %v4239_v42  ;;  %v4247_v2 = vsub.f32 %v4235_v8, %v4239_v42 }
0x2985   :  { %v4243_v26 = vpop.xlane.xlu1 %4242 }
0x2986   :  { %v4244_v1 = vmul.f32 0.041666668, %v4243_v26 }
0x2988   :  { %v4246_v28 = vsub.f32 %v4244_v1, %v4245_v40 }
0x2989   :  { %v4341_v55 = vpop.permute.xlu1 %4340 }
0x298a   :  { %v4248_v11 = vadd.f32 1e-05, %v4246_v28 }
0x298c   :  { %5997 = vrsqrt.f32 %v4248_v11 }
0x2999   :  { %v5998_v38 = vpop.eup %5997 }
0x299a   :  { %v4250_v7 = vmul.f32 %v5998_v38, %v4247_v2 }
0x299c   :  { %v4251_v18 = vmul.f32 %v4250_v7, %v6479_v4 }
0x299e   :  { %v4252_v25 = vadd.f32 %v4251_v18, %v6481_v15 }
0x29a0   :  { %5999 = vtanh.f32 %v4252_v25 }
0x29ad   :  { %v6000_v41 = vpop.eup %5999 }
0x29ae   :  { %v4334_v13 = vmul.f32 %v6000_v41, %v5996_v50 }
0x29b0   :  { %v7115_v39 = vadd.f32 %v4341_v55, %v4334_v13 }
0x29b2   :  { %5808 = vmatmul.mubr.msk.f32.vlgmr.msra.gmra.mxu1 %vm199_vm1, %v7115_v39 }
0x29b3   :  { %5822 = vmatpush3.msra.mxu1 %v7012_v34  ;;  %5829 = vmatprep.mubr.msk.f32.mxu1 %vm6101_vm2, %v6100_v17  ;;  %v326_v34 = vadd.f32 %v6280_v45, %v6283_v46 }
0x29b4   :  { %5823 = vmatprep.subr.mxu1 %v6100_v17 }
0x29b5   :  { %5824 = vmatpush3.msra.mxu1 %v7021_v22 }
0x29b6   :  { %5825 = vmatprep.subr.mxu1 %v6100_v17 }
0x29b7   :  { %5826 = vmatpush3.msra.mxu1 %v7028_v43 }
0x29b8   :  { %5827 = vmatprep.subr.mxu1 %v6100_v17 }
0x29b9   :  { %5828 = vmatpush3.msra.mxu1 %v6975_v19 }
0x29ba   :  { %5843 = vmatprep.subr.mxu1 %v6100_v17 }
0x2a72   :  { %v4413_v62 = vpop.f32.mrf.mxu1 }
0x2a73   :  { %v4414_v31 = vadd.f32 %v4413_v62, %v326_v34 }
0x2a74   :  { %v5809_v44 = vpop.f32.mrf.mxu1 }
0x2a75   :  { %v4417_v0 = vsel %vm520_vm3, %v4414_v31, 0.0  ;;  %v4421_v63 = vmul.f32 %v4414_v31, %v4414_v31 }
0x2a76   :  { %4418 = vadd.xlane.f32.xlu0 %v4417_v0 }
0x2a77   :  { %v4422_v22 = vsel %vm520_vm3, %v4421_v63, 0.0 }
0x2a78   :  { %4423 = vadd.xlane.f32.xlu1 %v4422_v22 }
0x2aff   :  { %v4419_v43 = vpop.xlane.xlu0 %4418 }
0x2b00   :  { %v4420_v61 = vmul.f32 0.013888889, %v4419_v43 }
0x2b01   :  { %v4424_v57 = vpop.xlane.xlu1 %4423 }
0x2b02   :  { %v4426_v23 = vmul.f32 %v4420_v61, %v4420_v61  ;;  %v4425_v19 = vmul.f32 0.013888889, %v4424_v57  ;;  %v4428_v5 = vsub.f32 %v4414_v31, %v4420_v61 }
0x2b04   :  { %v4427_v32 = vsub.f32 %v4425_v19, %v4426_v23 }
0x2b06   :  { %v4429_v56 = vadd.f32 1e-05, %v4427_v32 }
0x2b08   :  { %6001 = vrsqrt.f32 %v4429_v56 }
0x2b15   :  { %v6002_v45 = vpop.eup %6001 }
0x2b16   :  { %v4431_v46 = vmul.f32 %v6002_v45, %v4428_v5 }
0x2b18   :  { %v4432_v8 = vmul.f32 %v4431_v46, %v6166_v6 }
0x2b1a   :  { %v4433_v35 = vadd.f32 %v4432_v8, %v6335_v10 }
0x2b1c   :  { %4438 = vrot.lane.b32.xlu1 %v4433_v35, %s6103_s13  ;;  %4435 = vrot.lane.b32.xlu0 %v4433_v35, %s6102_s12 }
0x2b20   :  { %4446 = vrot.lane.b32.xlu0 %v4433_v35, %s6104_s14 }
0x2b24   :  { %4442 = vrot.lane.b32.xlu0 %v4433_v35, %s6105_s15 }
0x2b8e   :  { %v4439_v16 = vpop.permute.xlu1 %4438  ;;  %v4436_v48 = vpop.permute.xlu0 %4435 }
0x2b8f   :  { %v4441_v37 = vsel %vm199_vm1, %v4436_v48, %v4439_v16 }
0x2b90   :  { %v4523_v50 = vmul.f32 %v4441_v37, %v4433_v35 }
0x2b92   :  { %5830 = vmatmul.mubr.msk.f32.vlgmr.msra.gmra.mxu1 %vm558_vm4, %v4523_v50  ;;  %v4447_v49 = vpop.permute.xlu0 %4446 }
0x2b93   :  { %5844 = vmatpush3.msra.mxu1 %v6408_v20  ;;  %v4449_v33 = vmul.f32 %v4447_v49, %v4433_v35  ;;  %5851 = vmatprep.mubr.msk.f32.mxu1 %vm6101_vm2, %v6100_v17 }
0x2b94   :  { %5845 = vmatprep.subr.mxu1 %v6100_v17 }
0x2b95   :  { %5846 = vmatpush3.msra.mxu1 %v6406_v3  ;;  %5819 = vmatmul.mubr.msk.f32.vlgmr.msra.gmra.mxu0 %vm558_vm4, %v4449_v33 }
0x2b96   :  { %5833 = vmatpush3.msra.mxu0 %v6408_v20  ;;  %5847 = vmatprep.subr.mxu1 %v6100_v17  ;;  %v4443_v10 = vpop.permute.xlu0 %4442 }
0x2b97   :  { %5834 = vmatprep.subr.mxu0 %v6100_v17  ;;  %5848 = vmatpush3.msra.mxu1 %v6416_v29  ;;  %v4445_v47 = vsel %vm199_vm1, %v4443_v10, %v4436_v48 }
0x2b98   :  { %5835 = vmatpush3.msra.mxu0 %v6406_v3  ;;  %5849 = vmatprep.subr.mxu1 %v6100_v17 }
0x2b99   :  { %5836 = vmatprep.subr.mxu0 %v6100_v17  ;;  %5850 = vmatpush3.msra.mxu1 %v6424_v30 }
0x2b9a   :  { %4605 = vrot.lane.b32.xlu1 %v4445_v47, %s6098_s30  ;;  %5837 = vmatpush3.msra.mxu0 %v6416_v29 }
0x2b9b   :  { %5838 = vmatprep.subr.mxu0 %v6100_v17  ;;  %5840 = vmatprep.mubr.msk.f32.mxu0 %vm6101_vm2, %v6100_v17 }
0x2b9c   :  { %5839 = vmatpush3.msra.mxu0 %v6424_v30 }
0x2b9d   :  { %5854 = vmatprep.subr.mxu0 %v6100_v17 }
0x2b9e   :  { %4615 = vrot.lane.b32.xlu1 %v6252_v36, %s6106_s16 }
0x2c0c   :  { %v4606_v3 = vpop.permute.xlu1 %4605 }
0x2c0d   :  { %v4608_v20 = vsub.f32 %v4433_v35, %v4606_v3 }
0x2c0f   :  { %4610 = vrot.lane.b32.xlu0 %v4608_v20, %s6098_s30  ;;  %s5013_s30 = sshll.u32 %s6107_s3, 4  ;;  %s5014_s30 = int_to_ptr.vmem [resolvable:$true] %s5013_s30 }
0x2c10   :  { %v4616_v7 = vpop.permute.xlu1 %4615  ;;  %s6051_s12 = scalar_lea.vmem %s5014_s30, 128  ;;  %p6056_p6 = scmp.lt.s32.totalorder %s5014_s30, %s5014_s30 }
0x2c11   :  { %v4618_v36 = vsel %vm199_vm1, %v7115_v39, %v4616_v7  ;;  %p6052_p5 = scmp.ne.s32.totalorder %s5014_s30, %s6051_s12  ;;  %p6057_p7 = scmp.lt.s32.totalorder %s6051_s12, %s6051_s12 }
0x2c13   :  { %p6058_p8 = por %p6057_p7, %p6056_p6 }
0x2c15   :  { %p6059_p9 = pnand %p6058_p8, %p6052_p5 }
0x2c52   :  { %v4593_v42 = vpop.f32.mrf.mxu1 }
0x2c54   :  { %v5831_v26 = vpop.f32.mrf.mxu1 }
0x2c55   :  { %v4519_v40 = vpop.f32.mrf.mxu0 }
0x2c56   :  { %v4597_v1 = vsub.f32 %v4519_v40, %v4593_v42 }
0x2c57   :  { %v5820_v29 = vpop.f32.mrf.mxu0 }
0x2c58   :  { %v5109_v28 = vmul.f32 -1.442695, %v4597_v1 }
0x2c5a   :  { %6003 = vpow2.f32 %v5109_v28 }
0x2c67   :  { %v6004_v11 = vpop.eup %6003 }
0x2c68   :  { %v4601_v2 = vadd.f32 1.0, %v6004_v11 }
0x2c6a   :  { %6005 = vrcp.f32 %v4601_v2 }
0x2c77   :  { %v6006_v30 = vpop.eup %6005 }
0x2c81   :  { %v4611_v38 = vpop.permute.xlu0 %4610 }
0x2c82   :  { %v4613_v18 = vmul.f32 %v6006_v30, %v4611_v38 }
0x2c84   :  { %v4614_v25 = vadd.f32 %v4613_v18, %v4445_v47  ;;  %v443_v18 = vadd.f32 %v6376_v21, %v6467_v9 }
0x2c86   :  { %v4619_v41 = vadd.f32 %v4618_v36, %v4614_v25 }
0x2c88   :  { %v4620_v13 = vsel %vm558_vm4, %v4619_v41, 0.0  ;;  %v4624_v55 = vmul.f32 %v4619_v41, %v4619_v41 }
0x2c89   :  { %4621 = vadd.xlane.f32.xlu0 %v4620_v13 }
0x2c8a   :  { %v4625_v34 = vsel %vm558_vm4, %v4624_v55, 0.0 }
0x2c8b   :  { %4626 = vadd.xlane.f32.xlu1 %v4625_v34 }
0x2c9f   :  { %4885 = vrot.lane.b32.xlu0 %v7115_v39, %s6106_s16 }
0x2ca3   :  { %4895 = vrot.lane.b32.xlu0 %v6166_v6, %s6106_s16 }
0x2d12   :  { %v4622_v62 = vpop.xlane.xlu0 %4621 }
0x2d13   :  { %v4623_v31 = vmul.f32 0.041666668, %v4622_v62 }
0x2d14   :  { %v4627_v44 = vpop.xlane.xlu1 %4626 }
0x2d15   :  { %v4629_v0 = vmul.f32 %v4623_v31, %v4623_v31  ;;  %v4628_v63 = vmul.f32 0.041666668, %v4627_v44  ;;  %v4631_v46 = vsub.f32 %v4619_v41, %v4623_v31 }
0x2d16   :  { %v7174_v22 = vpop.permute.xlu0 %4885 }
0x2d17   :  { %v4630_v43 = vsub.f32 %v4628_v63, %v4629_v0 }
0x2d19   :  { %v4632_v61 = vadd.f32 1e-05, %v4630_v43 }
0x2d1a   :  { %v7176_v57 = vpop.permute.xlu0 %4895 }
0x2d1b   :  { %6007 = vrsqrt.f32 %v4632_v61  ;;  %v4898_v23 = vmul.f32 %v7176_v57, %v6485_v53  ;;  %v4900_v6 = vmul.f32 %v7176_v57, %v6690_v27  ;;  %v4901_v56 = vmul.f32 %v7176_v57, %v6800_v12 }
0x2d1c   :  { %6009 = vtanh.f32 %v7115_v39  ;;  %v4902_v45 = vmul.f32 %v7176_v57, %v6895_v60  ;;  %v4904_v16 = vmul.f32 %v7176_v57, %v7115_v39  ;;  %v4903_v43 = vmul.f32 %v7176_v57, %v7005_v52 }
0x2d1d   :  { %v4906_v19 = vsel %vm199_vm1, %v4898_v23, 0.0  ;;  %v4912_v32 = vsel %vm199_vm1, %v4900_v6, 0.0  ;;  %v4915_v5 = vsel %vm199_vm1, %v4901_v56, 0.0 }
0x2d1e   :  { %4907 = vadd.xlane.f32.xlu0 %v4906_v19  ;;  %v4918_v35 = vsel %vm199_vm1, %v4902_v45, 0.0  ;;  %v4924_v50 = vsel %vm199_vm1, %v4904_v16, 0.0  ;;  %v4921_v61 = vsel %vm199_vm1, %v4903_v43, 0.0 }
0x2d22   :  { %4913 = vadd.xlane.f32.xlu0 %v4912_v32 }
0x2d26   :  { %4916 = vadd.xlane.f32.xlu0 %v4915_v5 }
0x2d28   :  { %v6008_v8 = vpop.eup %6007 }
0x2d29   :  { %v4634_v48 = vmul.f32 %v6008_v8, %v4631_v46  ;;  %v6010_v33 = vpop.eup %6009 }
0x2d2a   :  { %4919 = vadd.xlane.f32.xlu0 %v4918_v35 }
0x2d2b   :  { %v4635_v37 = vmul.f32 %v4634_v48, %v6386_v14 }
0x2d2d   :  { %v4636_v49 = vadd.f32 %v4635_v37, %v6431_v51 }
0x2d2e   :  { %4925 = vadd.xlane.f32.xlu0 %v4924_v50 }
0x2d2f   :  { %5841 = vmatmul.mubr.msk.f32.vlgmr.msra.gmra.mxu0 %vm558_vm4, %v4636_v49 }
0x2d30   :  { %5855 = vmatpush3.msra.mxu0 %v6437_v58  ;;  %5858 = vmatprep.mubr.msk.f32.mxu0 %vm6101_vm2, %v6100_v17 }
0x2d31   :  { %5856 = vmatprep.subr.mxu0 %v6100_v17 }
0x2d32   :  { %5857 = vmatpush3.msra.mxu0 %v6440_v59 }
0x2d33   :  { %5859 = vmatmul.mubr.msk.f32.vlgmr.msra.gmra.mxu0 %vm199_vm1, %v6010_v33 }
0x2da7   :  { %v4908_v10 = vpop.xlane.xlu0 %4907 }
0x2da8   :  { %v4930_v47 = vadd.f32 %v4908_v10, %v6386_v14 }
0x2daa   :  { %4946 = vrot.lane.b32.xlu0 %v4930_v47, %s6105_s15 }
0x2dab   :  { %v7205_v51 = vpop.xlane.xlu0 %4913 }
0x2daf   :  { %v4917_v3 = vpop.xlane.xlu0 %4916 }
0x2db0   :  { %v4933_v58 = vadd.f32 %v4917_v3, %v6386_v14 }
0x2db2   :  { %4952 = vrot.lane.b32.xlu0 %v4933_v58, %s6105_s15 }
0x2db3   :  { %v7211_v29 = vpop.xlane.xlu0 %4919 }
0x2db7   :  { %v7213_v1 = vpop.xlane.xlu0 %4925 }
0x2def   :  { %v4706_v20 = vpop.f32.mrf.mxu0 }
0x2df0   :  { %v4707_v17 = vadd.f32 %v4706_v20, %v6433_v54  ;;  %v4936_v20 = vadd.f32 %v7213_v1, %v6386_v14 }
0x2df1   :  { %v5842_v42 = vpop.f32.mrf.mxu0 }
0x2df2   :  { %v4710_v26 = vmax.f32 %v4707_v17, 0.0 }
0x2df3   :  { %v4873_v59 = vpop.f32.mrf.mxu0 }
0x2df4   :  { %5852 = vmatmul.mubr.msk.f32.vlgmr.msra.gmra.mxu1 %vm558_vm4, %v4710_v26  ;;  %v4874_v25 = vadd.f32 %v4873_v59, %v443_v18 }
0x2df5   :  { %v5860_v40 = vpop.f32.mrf.mxu0 }
0x2df6   :  { %v5113_v36 = vmul.f32 -1.442695, %v4874_v25 }
0x2df8   :  { %6011 = vpow2.f32 %v5113_v36 }
0x2e05   :  { %v6012_v34 = vpop.eup %6011 }
0x2e06   :  { %v4880_v31 = vadd.f32 1.0, %v6012_v34 }
0x2e08   :  { %6013 = vrcp.f32 %v4880_v31 }
0x2e15   :  { %v6014_v21 = vpop.eup %6013 }
0x2e16   :  { %v4888_v9 = vmul.f32 %v6014_v21, %v7174_v22 }
0x2e1c   :  { %v4947_v28 = vpop.permute.xlu0 %4946 }
0x2e1d   :  { %v4970_v11 = vsel %vm199_vm1, %v6485_v53, %v4947_v28 }
0x2e1e   :  { %v4979_v2 = vsel %vm4978_vm5, %v4970_v11, 0.0 }
0x2e1f   :  { %4987 = vst [vmem:[#allocation5] sm:$0xff] %v4979_v2 }
0x2e24   :  { %v4953_v30 = vpop.permute.xlu0 %4952 }
0x2e25   :  { %v4973_v38 = vsel %vm199_vm1, %v6800_v12, %v4953_v30 }
0x2e26   :  { %v4982_v7 = vsel %vm4978_vm5, %v4973_v38, 0.0 }
0x2e27   :  { %4990 = vst [vmem:[#allocation5 + $0x18] sm:$0xff] %v4982_v7 }
0x2eb4   :  { %v4780_v41 = vpop.f32.mrf.mxu1 }
0x2eb5   :  { %v4781_v13 = vadd.f32 %v4780_v41, %v6433_v54  ;;  %v4899_v54 = vmul.f32 %v7176_v57, %v6580_v24 }
0x2eb6   :  { %v5853_v53 = vpop.f32.mrf.mxu1 }
0x2eb7   :  { %v4784_v55 = vmax.f32 %v4781_v13, 0.0  ;;  %v4909_v63 = vsel %vm199_vm1, %v4899_v54, 0.0 }
0x2eb9   :  { %v4785_v62 = vadd.f32 %v4784_v55, %v4636_v49 }
0x2ebb   :  { %v4786_v44 = vsel %vm558_vm4, %v4785_v62, 0.0  ;;  %v4790_v12 = vmul.f32 %v4785_v62, %v4785_v62 }
0x2ebc   :  { %4787 = vadd.xlane.f32.xlu1 %v4786_v44 }
0x2ebd   :  { %v4791_v0 = vsel %vm558_vm4, %v4790_v12, 0.0 }
0x2ec0   :  { %4792 = vadd.xlane.f32.xlu1 %v4791_v0 }
0x2ed1   :  { %4890 = vrot.lane.b32.xlu1 %v4888_v9, %s6103_s13 }
0x2ef5   :  { %4910 = vadd.xlane.f32.xlu1 %v4909_v63 }
0x2ef9   :  { %4922 = vadd.xlane.f32.xlu1 %v4921_v61 }
0x2f45   :  { %v4788_v23 = vpop.xlane.xlu1 %4787 }
0x2f46   :  { %v4789_v19 = vmul.f32 0.041666668, %v4788_v23 }
0x2f48   :  { %v4795_v32 = vmul.f32 %v4789_v19, %v4789_v19  ;;  %v4797_v45 = vsub.f32 %v4785_v62, %v4789_v19 }
0x2f49   :  { %v4793_v6 = vpop.xlane.xlu1 %4792 }
0x2f4a   :  { %v4794_v56 = vmul.f32 0.041666668, %v4793_v6 }
0x2f4c   :  { %v4796_v22 = vsub.f32 %v4794_v56, %v4795_v32 }
0x2f4d   :  { %v4891_v50 = vpop.permute.xlu1 %4890 }
0x2f4e   :  { %v4798_v5 = vadd.f32 1e-05, %v4796_v22 }
0x2f50   :  { %6015 = vrsqrt.f32 %v4798_v5 }
0x2f5d   :  { %v6016_v46 = vpop.eup %6015 }
0x2f5e   :  { %v4800_v8 = vmul.f32 %v6016_v46, %v4797_v45 }
0x2f60   :  { %v4801_v35 = vmul.f32 %v4800_v8, %v6479_v4 }
0x2f62   :  { %v4802_v16 = vadd.f32 %v4801_v35, %v6481_v15  ;;  %v4932_v15 = vadd.f32 %v7205_v51, %v6386_v14 }
0x2f64   :  { %6017 = vtanh.f32 %v4802_v16 }
0x2f71   :  { %v6018_v48 = vpop.eup %6017 }
0x2f72   :  { %v4884_v37 = vmul.f32 %v6018_v48, %v6014_v21 }
0x2f74   :  { %v4893_v49 = vadd.f32 %v4891_v50, %v4884_v37 }
0x2f76   :  { %4894 = vst.msk [vmem:[#allocation6] sm:$0xff] %vm199_vm1, %v4893_v49  ;;  %v4905_v33 = vmul.f32 %v7176_v57, %v4893_v49  ;;  %v4934_v57 = vadd.f32 %v7211_v29, %v6386_v14 }
0x2f78   :  { %v4927_v10 = vsel %vm199_vm1, %v4905_v33, 0.0 }
0x2f79   :  { %4928 = vadd.xlane.f32.xlu1 %v4927_v10 }
0x2f7e   :  { %v4911_v47 = vpop.xlane.xlu1 %4910 }
0x2f7f   :  { %v4931_v4 = vadd.f32 %v4911_v47, %v6386_v14 }
0x2f82   :  { %v4923_v3 = vpop.xlane.xlu1 %4922 }
0x2f83   :  { %v4935_v58 = vadd.f32 %v4923_v3, %v6386_v14 }
0x2f85   :  { %4956 = vrot.lane.b32.xlu0 %v4935_v58, %s6105_s15 }
0x2f8a   :  { %4948 = vrot.lane.b32.xlu1 %v4931_v4, %s6105_s15 }
0x2f8e   :  { %4950 = vrot.lane.b32.xlu1 %v4932_v15, %s6105_s15 }
0x2f92   :  { %4954 = vrot.lane.b32.xlu1 %v4934_v57, %s6105_s15 }
0x2f96   :  { %4958 = vrot.lane.b32.xlu1 %v4936_v20, %s6105_s15 }
0x2ff7   :  { %v4957_v17 = vpop.permute.xlu0 %4956 }
0x2ff8   :  { %v4975_v42 = vsel %vm199_vm1, %v7005_v52, %v4957_v17 }
0x2ff9   :  { %v4984_v26 = vsel %vm4978_vm5, %v4975_v42, 0.0 }
0x2ffa   :  { %4992 = vst [vmem:[#allocation5 + $0x28] sm:$0xff] %v4984_v26 }
0x2ffb   :  { %6062 = shalt.err (!%p6059_p9)
}
0x2ffc   :  { %5016 = dma.vmem_to_hbm [thread:$0]  %s5014_s30, 128, %s7283_s6, [#allocation7]  }
0x2ffd   :  { %s6108_s6 = smov [#allocation5]  }
0x3002   :  { %v4929_v51 = vpop.xlane.xlu1 %4928 }
0x3003   :  { %v4937_v52 = vadd.f32 %v4929_v51, %v6386_v14 }
0x3005   :  { %4960 = vrot.lane.b32.xlu0 %v4937_v52, %s6105_s15  ;;  %s5000_s15 = sshll.u32 %s6108_s6, 4  ;;  %s5001_s15 = int_to_ptr.vmem [resolvable:$true] %s5000_s15 }
0x3006   :  { %v4949_v59 = vpop.permute.xlu1 %4948  ;;  %s6071_s16 = scalar_lea.vmem %s5001_s15, 1024  ;;  %p6076_p11 = scmp.lt.s32.totalorder %s5001_s15, %s5001_s15 }
0x3007   :  { %v4971_v40 = vsel %vm199_vm1, %v6580_v24, %v4949_v59  ;;  %p6072_p10 = scmp.ne.s32.totalorder %s5001_s15, %s6071_s16  ;;  %p6077_p12 = scmp.lt.s32.totalorder %s6071_s16, %s6071_s16 }
0x3008   :  { %v4980_v29 = vsel %vm4978_vm5, %v4971_v40, 0.0 }
0x3009   :  { %4988 = vst [vmem:[#allocation5 + $0x8] sm:$0xff] %v4980_v29  ;;  %p6078_p13 = por %p6077_p12, %p6076_p11 }
0x300a   :  { %v4951_v1 = vpop.permute.xlu1 %4950 }
0x300b   :  { %v4972_v28 = vsel %vm199_vm1, %v6690_v27, %v4951_v1  ;;  %p6079_p0 = pnand %p6078_p13, %p6072_p10 }
0x300c   :  { %v4981_v11 = vsel %vm4978_vm5, %v4972_v28, 0.0 }
0x300d   :  { %4989 = vst [vmem:[#allocation5 + $0x10] sm:$0xff] %v4981_v11 }
0x300e   :  { %v4955_v2 = vpop.permute.xlu1 %4954 }
0x300f   :  { %v4974_v14 = vsel %vm199_vm1, %v6895_v60, %v4955_v2 }
0x3010   :  { %v4983_v30 = vsel %vm4978_vm5, %v4974_v14, 0.0 }
0x3011   :  { %4991 = vst [vmem:[#allocation5 + $0x20] sm:$0xff] %v4983_v30 }
0x3012   :  { %v4959_v38 = vpop.permute.xlu1 %4958 }
0x3013   :  { %v4976_v24 = vsel %vm199_vm1, %v7115_v39, %v4959_v38 }
0x3014   :  { %v4985_v7 = vsel %vm4978_vm5, %v4976_v24, 0.0 }
0x3015   :  { %4993 = vst [vmem:[#allocation5 + $0x30] sm:$0xff] %v4985_v7 }
0x3077   :  { %v4961_v27 = vpop.permute.xlu0 %4960 }
0x3078   :  { %v4977_v18 = vsel %vm199_vm1, %v4893_v49, %v4961_v27 }
0x3079   :  { %v4986_v25 = vsel %vm4978_vm5, %v4977_v18, 0.0 }
0x307a   :  { %4994 = vst [vmem:[#allocation5 + $0x38] sm:$0xff] %v4986_v25 }
0x307b   :  { %6082 = shalt.err (!%p6079_p0)
}
0x307c   :  { %s6109_s18 = smov 128   ;;  %s6110_s19 = smov 8  }
0x307d   :  { %5006 = dma.vmem_to_hbm [thread:$0]  %s5001_s15, 1024, %s7282_s5, [#allocation4], %s6109_s18, %s6109_s18, %s6110_s19  }
0x307e   :  { %6093 = dma.done.wait [#allocation4], 1024  }
0x307f   :  { %6094 = vsyncadd [#allocation4], 4294966272 }
0x3080   :  { %6095 = dma.done.wait [#allocation7], 128  }
0x3081   :  { %6096 = vsyncadd [#allocation7], 4294967168 }
0x3082   :  { %5023 = vsyncpa [#allocation3], 1 }
0x3083   :  { %5024 = vsyncpa [#allocation4], 1 }
0x3084   :  { %5025 = vsyncpa [#allocation7], 1 }

</bundles_post_ra>
